<compile_context>
chip_gen: v5e
topology: v5e:2x2
jax: 0.10.0
libtpu: 0.0.40
codegen_flags: <defaults>
</compile_context>

<pallas_src>
import numpy as np
import jax
import jax.numpy as jnp
from jax import lax
from jax.experimental import pallas as pl
from jax.experimental.pallas import tpu as pltpu

T = 20            # sequence length (fixed by x.view(-1, 20, 132))
F_IN = 132        # input feature size
H1, H2, H3 = 64, 128, 64
D = H1 + H2 + H3  # 256 = fused state width [h1|h2|h3]
N_OUT = 2


def _round_up(n, m):
    return ((n + m - 1) // m) * m


def rnn_fused_kernel(pre_ref, w_ref, state_ref):
    """Fused 3-layer tanh-RNN wavefront over one batch tile.

    pre_ref:   (T+2, Bt, 256) per-step additive term [pre1_t | b2 | b3]
               (prologue bias slots pre-zeroed, so no masking needed here).
    w_ref:     (256, 256) block-structured fused weight.
    state_ref: (Bt, 256) output block, reused as the recurrent state
               [h1 | h2 | h3]; after the last step its last 64 lanes hold
               layer-3's final hidden state (== h_0[-1] of the PyTorch model).
    """
    # s = 0: initial state is zero, so the matmul would contribute nothing.
    state_ref[...] = jnp.tanh(pre_ref[0])

    def step(s, carry):
        state_ref[...] = jnp.tanh(
            jnp.dot(state_ref[...], w_ref[...],
                    preferred_element_type=jnp.float32)
            + pre_ref[s])
        return carry

    # Steps 1 .. T+1: one fused MXU matmul per step; layer 3 finishes time
    # T-1 at s = T+1.  Fully unrolled fixed trip count for LLO visibility.
    lax.fori_loop(1, T + 2, step, 0, unroll=True)


def rnn_forward(x, params, *, b_tile=256):
    """x: any array reshapeable to (-1, 20, 132); returns (B, 2) softmax probs."""
    x = jnp.asarray(x, jnp.float32).reshape(-1, T, F_IN)       # x.view(-1,20,132)
    B = x.shape[0]
    (wih1, whh1, b1, wih2, whh2, b2, wih3, whh3, b3, wout, bout) = params

    # Layer-1 input projection as one well-shaped XLA matmul (keeps the
    # 132-wide input out of the kernel).  HIGH = bf16_3x, ~f32-accurate.
    x_tm = jnp.transpose(x, (1, 0, 2))                          # (T, B, 132)
    pre1 = jnp.matmul(x_tm, wih1, precision=lax.Precision.HIGH) + b1   # (T,B,64)

    # Per-step additive term for the fused state.  Zeroing b2 at s=0 and b3 at
    # s<2 keeps layers 2/3 exactly zero until the wavefront reaches them
    # (tanh(0)=0), replacing all in-kernel predication.  h1 lanes at s>=T are
    # zero (their results are never consumed).
    pre_big = jnp.zeros((T + 2, B, D), jnp.float32)
    pre_big = pre_big.at[:T, :, :H1].set(pre1)
    pre_big = pre_big.at[1:, :, H1:H1 + H2].set(b2)
    pre_big = pre_big.at[2:, :, H1 + H2:].set(b3)

    # Block-structured fused weight (weights are already stored (in, out)).
    w_big = jnp.zeros((D, D), jnp.float32)
    w_big = w_big.at[:H1, :H1].set(whh1)                        # h1 -> h1
    w_big = w_big.at[:H1, H1:H1 + H2].set(wih2)                 # h1 -> h2
    w_big = w_big.at[H1:H1 + H2, H1:H1 + H2].set(whh2)          # h2 -> h2
    w_big = w_big.at[H1:H1 + H2, H1 + H2:].set(wih3)            # h2 -> h3
    w_big = w_big.at[H1 + H2:, H1 + H2:].set(whh3)              # h3 -> h3

    # Batch tiling: multiple of 8 sublanes; prefer >= 2 tiles so the
    # "parallel" grid axis can be sharded across both v7x TensorCores.
    bt = min(b_tile, _round_up(B, 8))
    if B >= 16:
        bt = min(bt, _round_up((B + 1) // 2, 8))
    bt = max(bt, 8)
    B_pad = _round_up(B, bt)
    if B_pad != B:
        pre_big = jnp.pad(pre_big, ((0, 0), (0, B_pad - B), (0, 0)))
    n_tiles = B_pad // bt

    # VMEM budget: the double-buffered (T+2, bt, 256) pre block dominates.
    vmem_bytes = 2 * (T + 2) * bt * D * 4 + 2 * bt * D * 4 + 2 * D * D * 4
    vmem_bytes = int(min(vmem_bytes + (4 << 20), 64 << 20))     # cap for v7x (64 MiB VMEM)

    state = pl.pallas_call(
        rnn_fused_kernel,
        out_shape=jax.ShapeDtypeStruct((B_pad, D), jnp.float32),
        grid_spec=pltpu.PrefetchScalarGridSpec(
            num_scalar_prefetch=0,
            grid=(n_tiles,),
            in_specs=[
                pl.BlockSpec((T + 2, bt, D), lambda b: (0, b, 0)),   # pre_big
                pl.BlockSpec((D, D), lambda b: (0, 0)),              # w_big
            ],
            out_specs=pl.BlockSpec((bt, D), lambda b: (b, 0)),       # fused state
        ),
        compiler_params=pltpu.CompilerParams(
            dimension_semantics=("parallel",),
            vmem_limit_bytes=vmem_bytes),
    )(pre_big, w_big)

    # Lane-dense 256-wide kernel output; slice layer-3's final hidden here.
    h_last = state[:B, H1 + H2:]                                 # (B, 64)
    logits = jnp.matmul(h_last, wout, precision=lax.Precision.HIGHEST) + bout
    # Dropout(p=0.05): identity in eval/inference mode.
    # TODO(synk): training-mode dropout (random mask + 1/(1-p) scaling) not applied.
    return jax.nn.softmax(logits, axis=1)


def init_params(key):
    """Deterministic PyTorch-style init; weights pre-transposed to (in, out)."""
    def uni(k, shape, bound):
        return jax.random.uniform(k, shape, jnp.float32, -bound, bound)

    keys = jax.random.split(key, 14)
    params = []
    for i, (din, dh) in enumerate([(F_IN, H1), (H1, H2), (H2, H3)]):
        bound = 1.0 / np.sqrt(dh)
        w_ih = uni(keys[4 * i + 0], (dh, din), bound)   # PyTorch weight_ih_l0
        w_hh = uni(keys[4 * i + 1], (dh, dh), bound)    # PyTorch weight_hh_l0
        b_ih = uni(keys[4 * i + 2], (dh,), bound)
        b_hh = uni(keys[4 * i + 3], (dh,), bound)
        params += [w_ih.T, w_hh.T, (b_ih + b_hh).reshape(1, dh)]
    bound = 1.0 / np.sqrt(H3)
    w_out = uni(keys[12], (N_OUT, H3), bound)           # PyTorch Linear weight
    b_out = uni(keys[13], (N_OUT,), bound)
    params += [w_out.T, b_out.reshape(1, N_OUT)]
    return tuple(params)


def ref_forward(x, params):
    """Pure-JAX reference of the same forward pass (for verification)."""
    x = jnp.asarray(x, jnp.float32).reshape(-1, T, F_IN)
    seq = jnp.transpose(x, (1, 0, 2))                   # (T, B, F)
    (wih1, whh1, b1, wih2, whh2, b2, wih3, whh3, b3, wout, bout) = params

    def run_rnn(seq, wih, whh, b, dh):
        def step(h, xt):
            h = jnp.tanh(xt @ wih + h @ whh + b)
            return h, h
        h0 = jnp.zeros((seq.shape[1], dh), jnp.float32)
        h_last, ys = lax.scan(step, h0, seq)
        return ys, h_last

    with jax.default_matmul_precision("highest"):
        s1, _ = run_rnn(seq, wih1, whh1, b1, H1)
        s2, _ = run_rnn(s1, wih2, whh2, b2, H2)
        _, h_last = run_rnn(s2, wih3, whh3, b3, H3)
        logits = h_last @ wout + bout
    return jax.nn.softmax(logits, axis=1)


if __name__ == "__main__":
    key = jax.random.PRNGKey(0)
    pkey, xkey, xkey2 = jax.random.split(key, 3)
    params = init_params(pkey)

    # Case 1: small batch, single grid tile.
    B = 8
    x = jax.random.normal(xkey, (B, T, F_IN), jnp.float32)   # (8, 20, 132)
    out = jax.block_until_ready(rnn_forward(x, params))
    ref = ref_forward(x, params)
    np.testing.assert_allclose(np.asarray(out), np.asarray(ref),
                               rtol=1e-3, atol=1e-3)
    assert out.shape == (B, N_OUT)

    # Case 2: multi-tile parallel grid + batch padding (B=40, tile=16 -> 3 tiles).
    B2 = 40
    x2 = jax.random.normal(xkey2, (B2, T, F_IN), jnp.float32)
    out2 = jax.block_until_ready(rnn_forward(x2, params, b_tile=16))
    ref2 = ref_forward(x2, params)
    np.testing.assert_allclose(np.asarray(out2), np.asarray(ref2),
                               rtol=1e-3, atol=1e-3)
    assert out2.shape == (B2, N_OUT)

    print("KERNEL_OK")
</pallas_src>

<mosaic_0001>
module attributes {stable_mosaic.version = 11 : i64} {
  func.func @rnn_fused_kernel(%arg0: i32, %arg1: memref<22x8x256xf32, #tpu.memory_space<vmem>>, %arg2: memref<256x256xf32, #tpu.memory_space<vmem>>, %arg3: memref<8x256xf32, #tpu.memory_space<vmem>>) attributes {dimension_semantics = [#tpu.dimension_semantics<parallel>], iteration_bounds = array<i64: 1>, scalar_prefetch = 0 : i64, scratch_operands = 0 : i64, tpu.core_type = #tpu.core_type<tc>, window_params = [{transform_indices = @transform_0, window_bounds = array<i64: 22, 8, 256>}, {pipeline_mode = #tpu.pipeline_mode<synchronous>, transform_indices = @transform_1, window_bounds = array<i64: 256, 256>}, {transform_indices = @transform_2, window_bounds = array<i64: 8, 256>}]} {
    %c0 = arith.constant 0 : index
    %c0_0 = arith.constant 0 : index
    %c0_1 = arith.constant 0 : index
    %0 = vector.load %arg1[%c0, %c0_0, %c0_1] : memref<22x8x256xf32, #tpu.memory_space<vmem>>, vector<1x8x256xf32>
    %1 = vector.shape_cast %0 : vector<1x8x256xf32> to vector<8x256xf32>
    %2 = math.tanh %1 : vector<8x256xf32>
    %c0_2 = arith.constant 0 : index
    %c0_3 = arith.constant 0 : index
    %3 = vector.load %arg3[%c0_2, %c0_3] : memref<8x256xf32, #tpu.memory_space<vmem>>, vector<8x256xf32>
    tpu.vector_store %arg3[%c0_2, %c0_3], %2 {strides = array<i32>} : memref<8x256xf32, #tpu.memory_space<vmem>>, vector<8x256xf32>,
    %c1_i32 = arith.constant 1 : i32
    %c0_4 = arith.constant 0 : index
    %c0_5 = arith.constant 0 : index
    %4 = vector.load %arg3[%c0_4, %c0_5] : memref<8x256xf32, #tpu.memory_space<vmem>>, vector<8x256xf32>
    %c0_6 = arith.constant 0 : index
    %c0_7 = arith.constant 0 : index
    %5 = vector.load %arg2[%c0_6, %c0_7] : memref<256x256xf32, #tpu.memory_space<vmem>>, vector<256x256xf32>
    %cst = arith.constant dense<0.000000e+00> : vector<8x256xf32>
    %6 = tpu.matmul %4, %5, %cst {dimension_numbers = #tpu.dot_dimension_numbers<[1], [0], [0], [1], [0, 0, 1, 1], [], []>} : vector<8x256xf32>, vector<256x256xf32>, vector<8x256xf32> -> vector<8x256xf32>
    %7 = arith.index_cast %c1_i32 : i32 to index
    %c0_8 = arith.constant 0 : index
    %c0_9 = arith.constant 0 : index
    %8 = vector.load %arg1[%7, %c0_8, %c0_9] : memref<22x8x256xf32, #tpu.memory_space<vmem>>, vector<1x8x256xf32>
    %9 = vector.shape_cast %8 : vector<1x8x256xf32> to vector<8x256xf32>
    %10 = arith.addf %6, %9 : vector<8x256xf32>
    %11 = math.tanh %10 : vector<8x256xf32>
    %c0_10 = arith.constant 0 : index
    %c0_11 = arith.constant 0 : index
    %12 = vector.load %arg3[%c0_10, %c0_11] : memref<8x256xf32, #tpu.memory_space<vmem>>, vector<8x256xf32>
    tpu.vector_store %arg3[%c0_10, %c0_11], %11 {strides = array<i32>} : memref<8x256xf32, #tpu.memory_space<vmem>>, vector<8x256xf32>,
    %c2_i32 = arith.constant 2 : i32
    %c0_12 = arith.constant 0 : index
    %c0_13 = arith.constant 0 : index
    %13 = vector.load %arg3[%c0_12, %c0_13] : memref<8x256xf32, #tpu.memory_space<vmem>>, vector<8x256xf32>
    %c0_14 = arith.constant 0 : index
    %c0_15 = arith.constant 0 : index
    %14 = vector.load %arg2[%c0_14, %c0_15] : memref<256x256xf32, #tpu.memory_space<vmem>>, vector<256x256xf32>
    %cst_16 = arith.constant dense<0.000000e+00> : vector<8x256xf32>
    %15 = tpu.matmul %13, %14, %cst_16 {dimension_numbers = #tpu.dot_dimension_numbers<[1], [0], [0], [1], [0, 0, 1, 1], [], []>} : vector<8x256xf32>, vector<256x256xf32>, vector<8x256xf32> -> vector<8x256xf32>
    %16 = arith.index_cast %c2_i32 : i32 to index
    %c0_17 = arith.constant 0 : index
    %c0_18 = arith.constant 0 : index
    %17 = vector.load %arg1[%16, %c0_17, %c0_18] : memref<22x8x256xf32, #tpu.memory_space<vmem>>, vector<1x8x256xf32>
    %18 = vector.shape_cast %17 : vector<1x8x256xf32> to vector<8x256xf32>
    %19 = arith.addf %15, %18 : vector<8x256xf32>
    %20 = math.tanh %19 : vector<8x256xf32>
    %c0_19 = arith.constant 0 : index
    %c0_20 = arith.constant 0 : index
    %21 = vector.load %arg3[%c0_19, %c0_20] : memref<8x256xf32, #tpu.memory_space<vmem>>, vector<8x256xf32>
    tpu.vector_store %arg3[%c0_19, %c0_20], %20 {strides = array<i32>} : memref<8x256xf32, #tpu.memory_space<vmem>>, vector<8x256xf32>,
    %c3_i32 = arith.constant 3 : i32
    %c0_21 = arith.constant 0 : index
    %c0_22 = arith.constant 0 : index
    %22 = vector.load %arg3[%c0_21, %c0_22] : memref<8x256xf32, #tpu.memory_space<vmem>>, vector<8x256xf32>
    %c0_23 = arith.constant 0 : index
    %c0_24 = arith.constant 0 : index
    %23 = vector.load %arg2[%c0_23, %c0_24] : memref<256x256xf32, #tpu.memory_space<vmem>>, vector<256x256xf32>
    %cst_25 = arith.constant dense<0.000000e+00> : vector<8x256xf32>
    %24 = tpu.matmul %22, %23, %cst_25 {dimension_numbers = #tpu.dot_dimension_numbers<[1], [0], [0], [1], [0, 0, 1, 1], [], []>} : vector<8x256xf32>, vector<256x256xf32>, vector<8x256xf32> -> vector<8x256xf32>
    %25 = arith.index_cast %c3_i32 : i32 to index
    %c0_26 = arith.constant 0 : index
    %c0_27 = arith.constant 0 : index
    %26 = vector.load %arg1[%25, %c0_26, %c0_27] : memref<22x8x256xf32, #tpu.memory_space<vmem>>, vector<1x8x256xf32>
    %27 = vector.shape_cast %26 : vector<1x8x256xf32> to vector<8x256xf32>
    %28 = arith.addf %24, %27 : vector<8x256xf32>
    %29 = math.tanh %28 : vector<8x256xf32>
    %c0_28 = arith.constant 0 : index
    %c0_29 = arith.constant 0 : index
    %30 = vector.load %arg3[%c0_28, %c0_29] : memref<8x256xf32, #tpu.memory_space<vmem>>, vector<8x256xf32>
    tpu.vector_store %arg3[%c0_28, %c0_29], %29 {strides = array<i32>} : memref<8x256xf32, #tpu.memory_space<vmem>>, vector<8x256xf32>,
    %c4_i32 = arith.constant 4 : i32
    %c0_30 = arith.constant 0 : index
    %c0_31 = arith.constant 0 : index
    %31 = vector.load %arg3[%c0_30, %c0_31] : memref<8x256xf32, #tpu.memory_space<vmem>>, vector<8x256xf32>
    %c0_32 = arith.constant 0 : index
    %c0_33 = arith.constant 0 : index
    %32 = vector.load %arg2[%c0_32, %c0_33] : memref<256x256xf32, #tpu.memory_space<vmem>>, vector<256x256xf32>
    %cst_34 = arith.constant dense<0.000000e+00> : vector<8x256xf32>
    %33 = tpu.matmul %31, %32, %cst_34 {dimension_numbers = #tpu.dot_dimension_numbers<[1], [0], [0], [1], [0, 0, 1, 1], [], []>} : vector<8x256xf32>, vector<256x256xf32>, vector<8x256xf32> -> vector<8x256xf32>
    %34 = arith.index_cast %c4_i32 : i32 to index
    %c0_35 = arith.constant 0 : index
    %c0_36 = arith.constant 0 : index
    %35 = vector.load %arg1[%34, %c0_35, %c0_36] : memref<22x8x256xf32, #tpu.memory_space<vmem>>, vector<1x8x256xf32>
    %36 = vector.shape_cast %35 : vector<1x8x256xf32> to vector<8x256xf32>
    %37 = arith.addf %33, %36 : vector<8x256xf32>
    %38 = math.tanh %37 : vector<8x256xf32>
    %c0_37 = arith.constant 0 : index
    %c0_38 = arith.constant 0 : index
    %39 = vector.load %arg3[%c0_37, %c0_38] : memref<8x256xf32, #tpu.memory_space<vmem>>, vector<8x256xf32>
    tpu.vector_store %arg3[%c0_37, %c0_38], %38 {strides = array<i32>} : memref<8x256xf32, #tpu.memory_space<vmem>>, vector<8x256xf32>,
    %c5_i32 = arith.constant 5 : i32
    %c0_39 = arith.constant 0 : index
    %c0_40 = arith.constant 0 : index
    %40 = vector.load %arg3[%c0_39, %c0_40] : memref<8x256xf32, #tpu.memory_space<vmem>>, vector<8x256xf32>
    %c0_41 = arith.constant 0 : index
    %c0_42 = arith.constant 0 : index
    %41 = vector.load %arg2[%c0_41, %c0_42] : memref<256x256xf32, #tpu.memory_space<vmem>>, vector<256x256xf32>
    %cst_43 = arith.constant dense<0.000000e+00> : vector<8x256xf32>
    %42 = tpu.matmul %40, %41, %cst_43 {dimension_numbers = #tpu.dot_dimension_numbers<[1], [0], [0], [1], [0, 0, 1, 1], [], []>} : vector<8x256xf32>, vector<256x256xf32>, vector<8x256xf32> -> vector<8x256xf32>
    %43 = arith.index_cast %c5_i32 : i32 to index
    %c0_44 = arith.constant 0 : index
    %c0_45 = arith.constant 0 : index
    %44 = vector.load %arg1[%43, %c0_44, %c0_45] : memref<22x8x256xf32, #tpu.memory_space<vmem>>, vector<1x8x256xf32>
    %45 = vector.shape_cast %44 : vector<1x8x256xf32> to vector<8x256xf32>
    %46 = arith.addf %42, %45 : vector<8x256xf32>
    %47 = math.tanh %46 : vector<8x256xf32>
    %c0_46 = arith.constant 0 : index
    %c0_47 = arith.constant 0 : index
    %48 = vector.load %arg3[%c0_46, %c0_47] : memref<8x256xf32, #tpu.memory_space<vmem>>, vector<8x256xf32>
    tpu.vector_store %arg3[%c0_46, %c0_47], %47 {strides = array<i32>} : memref<8x256xf32, #tpu.memory_space<vmem>>, vector<8x256xf32>,
    %c6_i32 = arith.constant 6 : i32
    %c0_48 = arith.constant 0 : index
    %c0_49 = arith.constant 0 : index
    %49 = vector.load %arg3[%c0_48, %c0_49] : memref<8x256xf32, #tpu.memory_space<vmem>>, vector<8x256xf32>
    %c0_50 = arith.constant 0 : index
    %c0_51 = arith.constant 0 : index
    %50 = vector.load %arg2[%c0_50, %c0_51] : memref<256x256xf32, #tpu.memory_space<vmem>>, vector<256x256xf32>
    %cst_52 = arith.constant dense<0.000000e+00> : vector<8x256xf32>
    %51 = tpu.matmul %49, %50, %cst_52 {dimension_numbers = #tpu.dot_dimension_numbers<[1], [0], [0], [1], [0, 0, 1, 1], [], []>} : vector<8x256xf32>, vector<256x256xf32>, vector<8x256xf32> -> vector<8x256xf32>
    %52 = arith.index_cast %c6_i32 : i32 to index
    %c0_53 = arith.constant 0 : index
    %c0_54 = arith.constant 0 : index
    %53 = vector.load %arg1[%52, %c0_53, %c0_54] : memref<22x8x256xf32, #tpu.memory_space<vmem>>, vector<1x8x256xf32>
    %54 = vector.shape_cast %53 : vector<1x8x256xf32> to vector<8x256xf32>
    %55 = arith.addf %51, %54 : vector<8x256xf32>
    %56 = math.tanh %55 : vector<8x256xf32>
    %c0_55 = arith.constant 0 : index
    %c0_56 = arith.constant 0 : index
    %57 = vector.load %arg3[%c0_55, %c0_56] : memref<8x256xf32, #tpu.memory_space<vmem>>, vector<8x256xf32>
    tpu.vector_store %arg3[%c0_55, %c0_56], %56 {strides = array<i32>} : memref<8x256xf32, #tpu.memory_space<vmem>>, vector<8x256xf32>,
    %c7_i32 = arith.constant 7 : i32
    %c0_57 = arith.constant 0 : index
    %c0_58 = arith.constant 0 : index
    %58 = vector.load %arg3[%c0_57, %c0_58] : memref<8x256xf32, #tpu.memory_space<vmem>>, vector<8x256xf32>
    %c0_59 = arith.constant 0 : index
    %c0_60 = arith.constant 0 : index
    %59 = vector.load %arg2[%c0_59, %c0_60] : memref<256x256xf32, #tpu.memory_space<vmem>>, vector<256x256xf32>
    %cst_61 = arith.constant dense<0.000000e+00> : vector<8x256xf32>
    %60 = tpu.matmul %58, %59, %cst_61 {dimension_numbers = #tpu.dot_dimension_numbers<[1], [0], [0], [1], [0, 0, 1, 1], [], []>} : vector<8x256xf32>, vector<256x256xf32>, vector<8x256xf32> -> vector<8x256xf32>
    %61 = arith.index_cast %c7_i32 : i32 to index
    %c0_62 = arith.constant 0 : index
    %c0_63 = arith.constant 0 : index
    %62 = vector.load %arg1[%61, %c0_62, %c0_63] : memref<22x8x256xf32, #tpu.memory_space<vmem>>, vector<1x8x256xf32>
    %63 = vector.shape_cast %62 : vector<1x8x256xf32> to vector<8x256xf32>
    %64 = arith.addf %60, %63 : vector<8x256xf32>
    %65 = math.tanh %64 : vector<8x256xf32>
    %c0_64 = arith.constant 0 : index
    %c0_65 = arith.constant 0 : index
    %66 = vector.load %arg3[%c0_64, %c0_65] : memref<8x256xf32, #tpu.memory_space<vmem>>, vector<8x256xf32>
    tpu.vector_store %arg3[%c0_64, %c0_65], %65 {strides = array<i32>} : memref<8x256xf32, #tpu.memory_space<vmem>>, vector<8x256xf32>,
    %c8_i32 = arith.constant 8 : i32
    %c0_66 = arith.constant 0 : index
    %c0_67 = arith.constant 0 : index
    %67 = vector.load %arg3[%c0_66, %c0_67] : memref<8x256xf32, #tpu.memory_space<vmem>>, vector<8x256xf32>
    %c0_68 = arith.constant 0 : index
    %c0_69 = arith.constant 0 : index
    %68 = vector.load %arg2[%c0_68, %c0_69] : memref<256x256xf32, #tpu.memory_space<vmem>>, vector<256x256xf32>
    %cst_70 = arith.constant dense<0.000000e+00> : vector<8x256xf32>
    %69 = tpu.matmul %67, %68, %cst_70 {dimension_numbers = #tpu.dot_dimension_numbers<[1], [0], [0], [1], [0, 0, 1, 1], [], []>} : vector<8x256xf32>, vector<256x256xf32>, vector<8x256xf32> -> vector<8x256xf32>
    %70 = arith.index_cast %c8_i32 : i32 to index
    %c0_71 = arith.constant 0 : index
    %c0_72 = arith.constant 0 : index
    %71 = vector.load %arg1[%70, %c0_71, %c0_72] : memref<22x8x256xf32, #tpu.memory_space<vmem>>, vector<1x8x256xf32>
    %72 = vector.shape_cast %71 : vector<1x8x256xf32> to vector<8x256xf32>
    %73 = arith.addf %69, %72 : vector<8x256xf32>
    %74 = math.tanh %73 : vector<8x256xf32>
    %c0_73 = arith.constant 0 : index
    %c0_74 = arith.constant 0 : index
    %75 = vector.load %arg3[%c0_73, %c0_74] : memref<8x256xf32, #tpu.memory_space<vmem>>, vector<8x256xf32>
    tpu.vector_store %arg3[%c0_73, %c0_74], %74 {strides = array<i32>} : memref<8x256xf32, #tpu.memory_space<vmem>>, vector<8x256xf32>,
    %c9_i32 = arith.constant 9 : i32
    %c0_75 = arith.constant 0 : index
    %c0_76 = arith.constant 0 : index
    %76 = vector.load %arg3[%c0_75, %c0_76] : memref<8x256xf32, #tpu.memory_space<vmem>>, vector<8x256xf32>
    %c0_77 = arith.constant 0 : index
    %c0_78 = arith.constant 0 : index
    %77 = vector.load %arg2[%c0_77, %c0_78] : memref<256x256xf32, #tpu.memory_space<vmem>>, vector<256x256xf32>
    %cst_79 = arith.constant dense<0.000000e+00> : vector<8x256xf32>
    %78 = tpu.matmul %76, %77, %cst_79 {dimension_numbers = #tpu.dot_dimension_numbers<[1], [0], [0], [1], [0, 0, 1, 1], [], []>} : vector<8x256xf32>, vector<256x256xf32>, vector<8x256xf32> -> vector<8x256xf32>
    %79 = arith.index_cast %c9_i32 : i32 to index
    %c0_80 = arith.constant 0 : index
    %c0_81 = arith.constant 0 : index
    %80 = vector.load %arg1[%79, %c0_80, %c0_81] : memref<22x8x256xf32, #tpu.memory_space<vmem>>, vector<1x8x256xf32>
    %81 = vector.shape_cast %80 : vector<1x8x256xf32> to vector<8x256xf32>
    %82 = arith.addf %78, %81 : vector<8x256xf32>
    %83 = math.tanh %82 : vector<8x256xf32>
    %c0_82 = arith.constant 0 : index
    %c0_83 = arith.constant 0 : index
    %84 = vector.load %arg3[%c0_82, %c0_83] : memref<8x256xf32, #tpu.memory_space<vmem>>, vector<8x256xf32>
    tpu.vector_store %arg3[%c0_82, %c0_83], %83 {strides = array<i32>} : memref<8x256xf32, #tpu.memory_space<vmem>>, vector<8x256xf32>,
    %c10_i32 = arith.constant 10 : i32
    %c0_84 = arith.constant 0 : index
    %c0_85 = arith.constant 0 : index
    %85 = vector.load %arg3[%c0_84, %c0_85] : memref<8x256xf32, #tpu.memory_space<vmem>>, vector<8x256xf32>
    %c0_86 = arith.constant 0 : index
    %c0_87 = arith.constant 0 : index
    %86 = vector.load %arg2[%c0_86, %c0_87] : memref<256x256xf32, #tpu.memory_space<vmem>>, vector<256x256xf32>
    %cst_88 = arith.constant dense<0.000000e+00> : vector<8x256xf32>
    %87 = tpu.matmul %85, %86, %cst_88 {dimension_numbers = #tpu.dot_dimension_numbers<[1], [0], [0], [1], [0, 0, 1, 1], [], []>} : vector<8x256xf32>, vector<256x256xf32>, vector<8x256xf32> -> vector<8x256xf32>
    %88 = arith.index_cast %c10_i32 : i32 to index
    %c0_89 = arith.constant 0 : index
    %c0_90 = arith.constant 0 : index
    %89 = vector.load %arg1[%88, %c0_89, %c0_90] : memref<22x8x256xf32, #tpu.memory_space<vmem>>, vector<1x8x256xf32>
    %90 = vector.shape_cast %89 : vector<1x8x256xf32> to vector<8x256xf32>
    %91 = arith.addf %87, %90 : vector<8x256xf32>
    %92 = math.tanh %91 : vector<8x256xf32>
    %c0_91 = arith.constant 0 : index
    %c0_92 = arith.constant 0 : index
    %93 = vector.load %arg3[%c0_91, %c0_92] : memref<8x256xf32, #tpu.memory_space<vmem>>, vector<8x256xf32>
    tpu.vector_store %arg3[%c0_91, %c0_92], %92 {strides = array<i32>} : memref<8x256xf32, #tpu.memory_space<vmem>>, vector<8x256xf32>,
    %c11_i32 = arith.constant 11 : i32
    %c0_93 = arith.constant 0 : index
    %c0_94 = arith.constant 0 : index
    %94 = vector.load %arg3[%c0_93, %c0_94] : memref<8x256xf32, #tpu.memory_space<vmem>>, vector<8x256xf32>
    %c0_95 = arith.constant 0 : index
    %c0_96 = arith.constant 0 : index
    %95 = vector.load %arg2[%c0_95, %c0_96] : memref<256x256xf32, #tpu.memory_space<vmem>>, vector<256x256xf32>
    %cst_97 = arith.constant dense<0.000000e+00> : vector<8x256xf32>
    %96 = tpu.matmul %94, %95, %cst_97 {dimension_numbers = #tpu.dot_dimension_numbers<[1], [0], [0], [1], [0, 0, 1, 1], [], []>} : vector<8x256xf32>, vector<256x256xf32>, vector<8x256xf32> -> vector<8x256xf32>
    %97 = arith.index_cast %c11_i32 : i32 to index
    %c0_98 = arith.constant 0 : index
    %c0_99 = arith.constant 0 : index
    %98 = vector.load %arg1[%97, %c0_98, %c0_99] : memref<22x8x256xf32, #tpu.memory_space<vmem>>, vector<1x8x256xf32>
    %99 = vector.shape_cast %98 : vector<1x8x256xf32> to vector<8x256xf32>
    %100 = arith.addf %96, %99 : vector<8x256xf32>
    %101 = math.tanh %100 : vector<8x256xf32>
    %c0_100 = arith.constant 0 : index
    %c0_101 = arith.constant 0 : index
    %102 = vector.load %arg3[%c0_100, %c0_101] : memref<8x256xf32, #tpu.memory_space<vmem>>, vector<8x256xf32>
    tpu.vector_store %arg3[%c0_100, %c0_101], %101 {strides = array<i32>} : memref<8x256xf32, #tpu.memory_space<vmem>>, vector<8x256xf32>,
    %c12_i32 = arith.constant 12 : i32
    %c0_102 = arith.constant 0 : index
    %c0_103 = arith.constant 0 : index
    %103 = vector.load %arg3[%c0_102, %c0_103] : memref<8x256xf32, #tpu.memory_space<vmem>>, vector<8x256xf32>
    %c0_104 = arith.constant 0 : index
    %c0_105 = arith.constant 0 : index
    %104 = vector.load %arg2[%c0_104, %c0_105] : memref<256x256xf32, #tpu.memory_space<vmem>>, vector<256x256xf32>
    %cst_106 = arith.constant dense<0.000000e+00> : vector<8x256xf32>
    %105 = tpu.matmul %103, %104, %cst_106 {dimension_numbers = #tpu.dot_dimension_numbers<[1], [0], [0], [1], [0, 0, 1, 1], [], []>} : vector<8x256xf32>, vector<256x256xf32>, vector<8x256xf32> -> vector<8x256xf32>
    %106 = arith.index_cast %c12_i32 : i32 to index
    %c0_107 = arith.constant 0 : index
    %c0_108 = arith.constant 0 : index
    %107 = vector.load %arg1[%106, %c0_107, %c0_108] : memref<22x8x256xf32, #tpu.memory_space<vmem>>, vector<1x8x256xf32>
    %108 = vector.shape_cast %107 : vector<1x8x256xf32> to vector<8x256xf32>
    %109 = arith.addf %105, %108 : vector<8x256xf32>
    %110 = math.tanh %109 : vector<8x256xf32>
    %c0_109 = arith.constant 0 : index
    %c0_110 = arith.constant 0 : index
    %111 = vector.load %arg3[%c0_109, %c0_110] : memref<8x256xf32, #tpu.memory_space<vmem>>, vector<8x256xf32>
    tpu.vector_store %arg3[%c0_109, %c0_110], %110 {strides = array<i32>} : memref<8x256xf32, #tpu.memory_space<vmem>>, vector<8x256xf32>,
    %c13_i32 = arith.constant 13 : i32
    %c0_111 = arith.constant 0 : index
    %c0_112 = arith.constant 0 : index
    %112 = vector.load %arg3[%c0_111, %c0_112] : memref<8x256xf32, #tpu.memory_space<vmem>>, vector<8x256xf32>
    %c0_113 = arith.constant 0 : index
    %c0_114 = arith.constant 0 : index
    %113 = vector.load %arg2[%c0_113, %c0_114] : memref<256x256xf32, #tpu.memory_space<vmem>>, vector<256x256xf32>
    %cst_115 = arith.constant dense<0.000000e+00> : vector<8x256xf32>
    %114 = tpu.matmul %112, %113, %cst_115 {dimension_numbers = #tpu.dot_dimension_numbers<[1], [0], [0], [1], [0, 0, 1, 1], [], []>} : vector<8x256xf32>, vector<256x256xf32>, vector<8x256xf32> -> vector<8x256xf32>
    %115 = arith.index_cast %c13_i32 : i32 to index
    %c0_116 = arith.constant 0 : index
    %c0_117 = arith.constant 0 : index
    %116 = vector.load %arg1[%115, %c0_116, %c0_117] : memref<22x8x256xf32, #tpu.memory_space<vmem>>, vector<1x8x256xf32>
    %117 = vector.shape_cast %116 : vector<1x8x256xf32> to vector<8x256xf32>
    %118 = arith.addf %114, %117 : vector<8x256xf32>
    %119 = math.tanh %118 : vector<8x256xf32>
    %c0_118 = arith.constant 0 : index
    %c0_119 = arith.constant 0 : index
    %120 = vector.load %arg3[%c0_118, %c0_119] : memref<8x256xf32, #tpu.memory_space<vmem>>, vector<8x256xf32>
    tpu.vector_store %arg3[%c0_118, %c0_119], %119 {strides = array<i32>} : memref<8x256xf32, #tpu.memory_space<vmem>>, vector<8x256xf32>,
    %c14_i32 = arith.constant 14 : i32
    %c0_120 = arith.constant 0 : index
    %c0_121 = arith.constant 0 : index
    %121 = vector.load %arg3[%c0_120, %c0_121] : memref<8x256xf32, #tpu.memory_space<vmem>>, vector<8x256xf32>
    %c0_122 = arith.constant 0 : index
    %c0_123 = arith.constant 0 : index
    %122 = vector.load %arg2[%c0_122, %c0_123] : memref<256x256xf32, #tpu.memory_space<vmem>>, vector<256x256xf32>
    %cst_124 = arith.constant dense<0.000000e+00> : vector<8x256xf32>
    %123 = tpu.matmul %121, %122, %cst_124 {dimension_numbers = #tpu.dot_dimension_numbers<[1], [0], [0], [1], [0, 0, 1, 1], [], []>} : vector<8x256xf32>, vector<256x256xf32>, vector<8x256xf32> -> vector<8x256xf32>
    %124 = arith.index_cast %c14_i32 : i32 to index
    %c0_125 = arith.constant 0 : index
    %c0_126 = arith.constant 0 : index
    %125 = vector.load %arg1[%124, %c0_125, %c0_126] : memref<22x8x256xf32, #tpu.memory_space<vmem>>, vector<1x8x256xf32>
    %126 = vector.shape_cast %125 : vector<1x8x256xf32> to vector<8x256xf32>
    %127 = arith.addf %123, %126 : vector<8x256xf32>
    %128 = math.tanh %127 : vector<8x256xf32>
    %c0_127 = arith.constant 0 : index
    %c0_128 = arith.constant 0 : index
    %129 = vector.load %arg3[%c0_127, %c0_128] : memref<8x256xf32, #tpu.memory_space<vmem>>, vector<8x256xf32>
    tpu.vector_store %arg3[%c0_127, %c0_128], %128 {strides = array<i32>} : memref<8x256xf32, #tpu.memory_space<vmem>>, vector<8x256xf32>,
    %c15_i32 = arith.constant 15 : i32
    %c0_129 = arith.constant 0 : index
    %c0_130 = arith.constant 0 : index
    %130 = vector.load %arg3[%c0_129, %c0_130] : memref<8x256xf32, #tpu.memory_space<vmem>>, vector<8x256xf32>
    %c0_131 = arith.constant 0 : index
    %c0_132 = arith.constant 0 : index
    %131 = vector.load %arg2[%c0_131, %c0_132] : memref<256x256xf32, #tpu.memory_space<vmem>>, vector<256x256xf32>
    %cst_133 = arith.constant dense<0.000000e+00> : vector<8x256xf32>
    %132 = tpu.matmul %130, %131, %cst_133 {dimension_numbers = #tpu.dot_dimension_numbers<[1], [0], [0], [1], [0, 0, 1, 1], [], []>} : vector<8x256xf32>, vector<256x256xf32>, vector<8x256xf32> -> vector<8x256xf32>
    %133 = arith.index_cast %c15_i32 : i32 to index
    %c0_134 = arith.constant 0 : index
    %c0_135 = arith.constant 0 : index
    %134 = vector.load %arg1[%133, %c0_134, %c0_135] : memref<22x8x256xf32, #tpu.memory_space<vmem>>, vector<1x8x256xf32>
    %135 = vector.shape_cast %134 : vector<1x8x256xf32> to vector<8x256xf32>
    %136 = arith.addf %132, %135 : vector<8x256xf32>
    %137 = math.tanh %136 : vector<8x256xf32>
    %c0_136 = arith.constant 0 : index
    %c0_137 = arith.constant 0 : index
    %138 = vector.load %arg3[%c0_136, %c0_137] : memref<8x256xf32, #tpu.memory_space<vmem>>, vector<8x256xf32>
    tpu.vector_store %arg3[%c0_136, %c0_137], %137 {strides = array<i32>} : memref<8x256xf32, #tpu.memory_space<vmem>>, vector<8x256xf32>,
    %c16_i32 = arith.constant 16 : i32
    %c0_138 = arith.constant 0 : index
    %c0_139 = arith.constant 0 : index
    %139 = vector.load %arg3[%c0_138, %c0_139] : memref<8x256xf32, #tpu.memory_space<vmem>>, vector<8x256xf32>
    %c0_140 = arith.constant 0 : index
    %c0_141 = arith.constant 0 : index
    %140 = vector.load %arg2[%c0_140, %c0_141] : memref<256x256xf32, #tpu.memory_space<vmem>>, vector<256x256xf32>
    %cst_142 = arith.constant dense<0.000000e+00> : vector<8x256xf32>
    %141 = tpu.matmul %139, %140, %cst_142 {dimension_numbers = #tpu.dot_dimension_numbers<[1], [0], [0], [1], [0, 0, 1, 1], [], []>} : vector<8x256xf32>, vector<256x256xf32>, vector<8x256xf32> -> vector<8x256xf32>
    %142 = arith.index_cast %c16_i32 : i32 to index
    %c0_143 = arith.constant 0 : index
    %c0_144 = arith.constant 0 : index
    %143 = vector.load %arg1[%142, %c0_143, %c0_144] : memref<22x8x256xf32, #tpu.memory_space<vmem>>, vector<1x8x256xf32>
    %144 = vector.shape_cast %143 : vector<1x8x256xf32> to vector<8x256xf32>
    %145 = arith.addf %141, %144 : vector<8x256xf32>
    %146 = math.tanh %145 : vector<8x256xf32>
    %c0_145 = arith.constant 0 : index
    %c0_146 = arith.constant 0 : index
    %147 = vector.load %arg3[%c0_145, %c0_146] : memref<8x256xf32, #tpu.memory_space<vmem>>, vector<8x256xf32>
    tpu.vector_store %arg3[%c0_145, %c0_146], %146 {strides = array<i32>} : memref<8x256xf32, #tpu.memory_space<vmem>>, vector<8x256xf32>,
    %c17_i32 = arith.constant 17 : i32
    %c0_147 = arith.constant 0 : index
    %c0_148 = arith.constant 0 : index
    %148 = vector.load %arg3[%c0_147, %c0_148] : memref<8x256xf32, #tpu.memory_space<vmem>>, vector<8x256xf32>
    %c0_149 = arith.constant 0 : index
    %c0_150 = arith.constant 0 : index
    %149 = vector.load %arg2[%c0_149, %c0_150] : memref<256x256xf32, #tpu.memory_space<vmem>>, vector<256x256xf32>
    %cst_151 = arith.constant dense<0.000000e+00> : vector<8x256xf32>
    %150 = tpu.matmul %148, %149, %cst_151 {dimension_numbers = #tpu.dot_dimension_numbers<[1], [0], [0], [1], [0, 0, 1, 1], [], []>} : vector<8x256xf32>, vector<256x256xf32>, vector<8x256xf32> -> vector<8x256xf32>
    %151 = arith.index_cast %c17_i32 : i32 to index
    %c0_152 = arith.constant 0 : index
    %c0_153 = arith.constant 0 : index
    %152 = vector.load %arg1[%151, %c0_152, %c0_153] : memref<22x8x256xf32, #tpu.memory_space<vmem>>, vector<1x8x256xf32>
    %153 = vector.shape_cast %152 : vector<1x8x256xf32> to vector<8x256xf32>
    %154 = arith.addf %150, %153 : vector<8x256xf32>
    %155 = math.tanh %154 : vector<8x256xf32>
    %c0_154 = arith.constant 0 : index
    %c0_155 = arith.constant 0 : index
    %156 = vector.load %arg3[%c0_154, %c0_155] : memref<8x256xf32, #tpu.memory_space<vmem>>, vector<8x256xf32>
    tpu.vector_store %arg3[%c0_154, %c0_155], %155 {strides = array<i32>} : memref<8x256xf32, #tpu.memory_space<vmem>>, vector<8x256xf32>,
    %c18_i32 = arith.constant 18 : i32
    %c0_156 = arith.constant 0 : index
    %c0_157 = arith.constant 0 : index
    %157 = vector.load %arg3[%c0_156, %c0_157] : memref<8x256xf32, #tpu.memory_space<vmem>>, vector<8x256xf32>
    %c0_158 = arith.constant 0 : index
    %c0_159 = arith.constant 0 : index
    %158 = vector.load %arg2[%c0_158, %c0_159] : memref<256x256xf32, #tpu.memory_space<vmem>>, vector<256x256xf32>
    %cst_160 = arith.constant dense<0.000000e+00> : vector<8x256xf32>
    %159 = tpu.matmul %157, %158, %cst_160 {dimension_numbers = #tpu.dot_dimension_numbers<[1], [0], [0], [1], [0, 0, 1, 1], [], []>} : vector<8x256xf32>, vector<256x256xf32>, vector<8x256xf32> -> vector<8x256xf32>
    %160 = arith.index_cast %c18_i32 : i32 to index
    %c0_161 = arith.constant 0 : index
    %c0_162 = arith.constant 0 : index
    %161 = vector.load %arg1[%160, %c0_161, %c0_162] : memref<22x8x256xf32, #tpu.memory_space<vmem>>, vector<1x8x256xf32>
    %162 = vector.shape_cast %161 : vector<1x8x256xf32> to vector<8x256xf32>
    %163 = arith.addf %159, %162 : vector<8x256xf32>
    %164 = math.tanh %163 : vector<8x256xf32>
    %c0_163 = arith.constant 0 : index
    %c0_164 = arith.constant 0 : index
    %165 = vector.load %arg3[%c0_163, %c0_164] : memref<8x256xf32, #tpu.memory_space<vmem>>, vector<8x256xf32>
    tpu.vector_store %arg3[%c0_163, %c0_164], %164 {strides = array<i32>} : memref<8x256xf32, #tpu.memory_space<vmem>>, vector<8x256xf32>,
    %c19_i32 = arith.constant 19 : i32
    %c0_165 = arith.constant 0 : index
    %c0_166 = arith.constant 0 : index
    %166 = vector.load %arg3[%c0_165, %c0_166] : memref<8x256xf32, #tpu.memory_space<vmem>>, vector<8x256xf32>
    %c0_167 = arith.constant 0 : index
    %c0_168 = arith.constant 0 : index
    %167 = vector.load %arg2[%c0_167, %c0_168] : memref<256x256xf32, #tpu.memory_space<vmem>>, vector<256x256xf32>
    %cst_169 = arith.constant dense<0.000000e+00> : vector<8x256xf32>
    %168 = tpu.matmul %166, %167, %cst_169 {dimension_numbers = #tpu.dot_dimension_numbers<[1], [0], [0], [1], [0, 0, 1, 1], [], []>} : vector<8x256xf32>, vector<256x256xf32>, vector<8x256xf32> -> vector<8x256xf32>
    %169 = arith.index_cast %c19_i32 : i32 to index
    %c0_170 = arith.constant 0 : index
    %c0_171 = arith.constant 0 : index
    %170 = vector.load %arg1[%169, %c0_170, %c0_171] : memref<22x8x256xf32, #tpu.memory_space<vmem>>, vector<1x8x256xf32>
    %171 = vector.shape_cast %170 : vector<1x8x256xf32> to vector<8x256xf32>
    %172 = arith.addf %168, %171 : vector<8x256xf32>
    %173 = math.tanh %172 : vector<8x256xf32>
    %c0_172 = arith.constant 0 : index
    %c0_173 = arith.constant 0 : index
    %174 = vector.load %arg3[%c0_172, %c0_173] : memref<8x256xf32, #tpu.memory_space<vmem>>, vector<8x256xf32>
    tpu.vector_store %arg3[%c0_172, %c0_173], %173 {strides = array<i32>} : memref<8x256xf32, #tpu.memory_space<vmem>>, vector<8x256xf32>,
    %c20_i32 = arith.constant 20 : i32
    %c0_174 = arith.constant 0 : index
    %c0_175 = arith.constant 0 : index
    %175 = vector.load %arg3[%c0_174, %c0_175] : memref<8x256xf32, #tpu.memory_space<vmem>>, vector<8x256xf32>
    %c0_176 = arith.constant 0 : index
    %c0_177 = arith.constant 0 : index
    %176 = vector.load %arg2[%c0_176, %c0_177] : memref<256x256xf32, #tpu.memory_space<vmem>>, vector<256x256xf32>
    %cst_178 = arith.constant dense<0.000000e+00> : vector<8x256xf32>
    %177 = tpu.matmul %175, %176, %cst_178 {dimension_numbers = #tpu.dot_dimension_numbers<[1], [0], [0], [1], [0, 0, 1, 1], [], []>} : vector<8x256xf32>, vector<256x256xf32>, vector<8x256xf32> -> vector<8x256xf32>
    %178 = arith.index_cast %c20_i32 : i32 to index
    %c0_179 = arith.constant 0 : index
    %c0_180 = arith.constant 0 : index
    %179 = vector.load %arg1[%178, %c0_179, %c0_180] : memref<22x8x256xf32, #tpu.memory_space<vmem>>, vector<1x8x256xf32>
    %180 = vector.shape_cast %179 : vector<1x8x256xf32> to vector<8x256xf32>
    %181 = arith.addf %177, %180 : vector<8x256xf32>
    %182 = math.tanh %181 : vector<8x256xf32>
    %c0_181 = arith.constant 0 : index
    %c0_182 = arith.constant 0 : index
    %183 = vector.load %arg3[%c0_181, %c0_182] : memref<8x256xf32, #tpu.memory_space<vmem>>, vector<8x256xf32>
    tpu.vector_store %arg3[%c0_181, %c0_182], %182 {strides = array<i32>} : memref<8x256xf32, #tpu.memory_space<vmem>>, vector<8x256xf32>,
    %c21_i32 = arith.constant 21 : i32
    %c0_183 = arith.constant 0 : index
    %c0_184 = arith.constant 0 : index
    %184 = vector.load %arg3[%c0_183, %c0_184] : memref<8x256xf32, #tpu.memory_space<vmem>>, vector<8x256xf32>
    %c0_185 = arith.constant 0 : index
    %c0_186 = arith.constant 0 : index
    %185 = vector.load %arg2[%c0_185, %c0_186] : memref<256x256xf32, #tpu.memory_space<vmem>>, vector<256x256xf32>
    %cst_187 = arith.constant dense<0.000000e+00> : vector<8x256xf32>
    %186 = tpu.matmul %184, %185, %cst_187 {dimension_numbers = #tpu.dot_dimension_numbers<[1], [0], [0], [1], [0, 0, 1, 1], [], []>} : vector<8x256xf32>, vector<256x256xf32>, vector<8x256xf32> -> vector<8x256xf32>
    %187 = arith.index_cast %c21_i32 : i32 to index
    %c0_188 = arith.constant 0 : index
    %c0_189 = arith.constant 0 : index
    %188 = vector.load %arg1[%187, %c0_188, %c0_189] : memref<22x8x256xf32, #tpu.memory_space<vmem>>, vector<1x8x256xf32>
    %189 = vector.shape_cast %188 : vector<1x8x256xf32> to vector<8x256xf32>
    %190 = arith.addf %186, %189 : vector<8x256xf32>
    %191 = math.tanh %190 : vector<8x256xf32>
    %c0_190 = arith.constant 0 : index
    %c0_191 = arith.constant 0 : index
    %192 = vector.load %arg3[%c0_190, %c0_191] : memref<8x256xf32, #tpu.memory_space<vmem>>, vector<8x256xf32>
    tpu.vector_store %arg3[%c0_190, %c0_191], %191 {strides = array<i32>} : memref<8x256xf32, #tpu.memory_space<vmem>>, vector<8x256xf32>,
    %c21_i32_192 = arith.constant 21 : i32
    return
  }
  func.func @transform_0(%arg0: i32) -> (i32, i32, i32) {
    %c0_i32 = arith.constant 0 : i32
    %c0_i32_0 = arith.constant 0 : i32
    %c0_i32_1 = arith.constant 0 : i32
    return %c0_i32, %arg0, %c0_i32_0 : i32, i32, i32
  }
  func.func @transform_1(%arg0: i32) -> (i32, i32) {
    %c0_i32 = arith.constant 0 : i32
    %c0_i32_0 = arith.constant 0 : i32
    %c0_i32_1 = arith.constant 0 : i32
    return %c0_i32, %c0_i32_0 : i32, i32
  }
  func.func @transform_2(%arg0: i32) -> (i32, i32) {
    %c0_i32 = arith.constant 0 : i32
    %c0_i32_0 = arith.constant 0 : i32
    return %arg0, %c0_i32 : i32, i32
  }
}

</mosaic_0001>

<bundles_post_ra>
// kernel: tpu_custom_call.1
= control target key start
LH: loop header
LB: loop body
LE: loop exit
PB: predicated region body
PF: predicated region fallthrough
CT: control target
= control target key end

     0   :  { %7 = vsyncpa [#allocation3], 0  ;;  %s5401_s0 = inlined_call_operand.hbm [shape: f32[22,8,256], index: 0, kind: input, shape index: {}]   ;;  %s5402_s1 = inlined_call_operand.hbm [shape: f32[256,256], index: 1, kind: input, shape index: {}]   ;;  %s5403_s2 = inlined_call_operand.hbm [shape: f32[8,256], index: 2, kind: output, shape index: {}]  }
   0x1   :  { %8 = vsyncpa [#allocation6], 0 }
   0x2   :  { %9 = vsyncpa [#allocation4], 0  ;;  %s14_s11 = sshll.u32 %s5401_s0, 4  ;;  %s3452_s12 = smov [#allocation2]   ;;  %s15_s11 = int_to_ptr.hbm [resolvable:$true] %s14_s11 }
   0x3   :  { %s16_s13 = sshll.u32 %s3452_s12, 4  ;;  %s27_s16 = sshll.u32 %s5402_s1, 4  ;;  %s17_s13 = int_to_ptr.vmem [resolvable:$true] %s16_s13  ;;  %s28_s16 = int_to_ptr.hbm [resolvable:$true] %s27_s16 }
   0x4   :  { %s3453_s17 = smov 256   ;;  %s3454_s18 = smov 16  }
   0x5   :  { %22 = dma.hbm_to_vmem [thread:$0]  %s15_s11, 5632, %s17_s13, [#allocation3], %s3453_s17, %s3453_s17, %s3454_s18  }
   0x6   :  { %s3455_s19 = smov [#allocation5]  }
   0x7   :  { %s29_s20 = sshll.u32 %s3455_s19, 4  ;;  %s30_s20 = int_to_ptr.vmem [resolvable:$true] %s29_s20 }
   0x8   :  { %35 = dma.hbm_to_vmem [thread:$0]  %s28_s16, 8192, %s30_s20, [#allocation6], %s3453_s17, %s3453_s17, %s3454_s18  }
   0x9   :  { %3446 = dma.done.wait [#allocation3], 5632  }
   0xa   :  { %3447 = vsyncadd [#allocation3], 4294961664 }
   0xb   :  { %3448 = dma.done.wait [#allocation6], 8192  }
   0xc   :  { %3449 = vsyncadd [#allocation6], 4294959104  ;;  %v3478_v0 = vld [vmem:[#allocation5 + $0xf8] sm:$0xff]  ;;  %v3480_v1 = vld [vmem:[#allocation5 + $0xe8] sm:$0xff]  ;;  %s3456_s0 = smov [#allocation7]   ;;  %s3270_s23 = sshll.u32 %s5403_s2, 4  ;;  %s3271_s23 = int_to_ptr.hbm [resolvable:$true] %s3270_s23 }
   0xd   :  { %v3482_v2 = vld [vmem:[#allocation5 + $0x1f8] sm:$0xff]  ;;  %159 = vmatpush.msra.mxu2 %v3478_v0  ;;  %v3486_v3 = vld [vmem:[#allocation5 + $0xf0] sm:$0xff]  ;;  %v3488_v4 = vld [vmem:[#allocation5 + $0x1e8] sm:$0xff]  ;;  %s3268_s1 = sshll.u32 %s3456_s0, 4  ;;  %s3269_s1 = int_to_ptr.vmem [resolvable:$true] %s3268_s1 }
   0xe   :  { %179 = vmatpush.msra.mxu3 %v3482_v2  ;;  %119 = vmatpush.msra.mxu0 %v3486_v3  ;;  %v3491_v5 = vld [vmem:[#allocation5 + $0xd8] sm:$0xff]  ;;  %v3493_v6 = vld [vmem:[#allocation5 + $0xe0] sm:$0xff]  ;;  %v3495_v7 = vld [vmem:[#allocation5 + $0x1f0] sm:$0xff] }
   0xf   :  { %160 = vmatpush.msra.mxu2 %v3480_v1  ;;  %v3499_v8 = vld [vmem:[#allocation5 + $0x1d8] sm:$0xff]  ;;  %v3501_v9 = vld [vmem:[#allocation5 + $0xd0] sm:$0xff]  ;;  %v3503_v10 = vld [vmem:[#allocation5 + $0x1e0] sm:$0xff]  ;;  %139 = vmatpush.msra.mxu1 %v3495_v7 }
  0x10   :  { %180 = vmatpush.msra.mxu3 %v3488_v4  ;;  %120 = vmatpush.msra.mxu0 %v3493_v6  ;;  %v3507_v11 = vld [vmem:[#allocation5 + $0xc8] sm:$0xff]  ;;  %v3513_v13 = vld [vmem:[#allocation5 + $0xc0] sm:$0xff]  ;;  %v3515_v14 = vld [vmem:[#allocation5 + $0x1d0] sm:$0xff] }
  0x11   :  { %v3509_v12 = vld [vmem:[#allocation5 + $0x1c8] sm:$0xff]  ;;  %161 = vmatpush.msra.mxu2 %v3491_v5  ;;  %140 = vmatpush.msra.mxu1 %v3503_v10  ;;  %v3519_v15 = vld [vmem:[#allocation5 + $0xb8] sm:$0xff]  ;;  %v3525_v17 = vld [vmem:[#allocation5 + $0xb0] sm:$0xff] }
  0x12   :  { %181 = vmatpush.msra.mxu3 %v3499_v8  ;;  %121 = vmatpush.msra.mxu0 %v3501_v9  ;;  %v3521_v16 = vld [vmem:[#allocation5 + $0x1b8] sm:$0xff]  ;;  %v3527_v18 = vld [vmem:[#allocation5 + $0x1c0] sm:$0xff]  ;;  %v3531_v19 = vld [vmem:[#allocation5 + $0xa8] sm:$0xff] }
  0x13   :  { %162 = vmatpush.msra.mxu2 %v3507_v11  ;;  %141 = vmatpush.msra.mxu1 %v3515_v14  ;;  %v3533_v20 = vld [vmem:[#allocation5 + $0x1a8] sm:$0xff]  ;;  %v3537_v21 = vld [vmem:[#allocation5 + $0xa0] sm:$0xff]  ;;  %v3539_v22 = vld [vmem:[#allocation5 + $0x1b0] sm:$0xff] }
  0x14   :  { %182 = vmatpush.msra.mxu3 %v3509_v12  ;;  %122 = vmatpush.msra.mxu0 %v3513_v13  ;;  %v3543_v23 = vld [vmem:[#allocation5 + $0x98] sm:$0xff]  ;;  %v3549_v25 = vld [vmem:[#allocation5 + $0x90] sm:$0xff]  ;;  %v3551_v26 = vld [vmem:[#allocation5 + $0x1a0] sm:$0xff] }
  0x15   :  { %163 = vmatpush.msra.mxu2 %v3519_v15  ;;  %142 = vmatpush.msra.mxu1 %v3527_v18  ;;  %v3545_v24 = vld [vmem:[#allocation5 + $0x198] sm:$0xff]  ;;  %v3555_v27 = vld [vmem:[#allocation5 + $0x88] sm:$0xff]  ;;  %v3561_v29 = vld [vmem:[#allocation5 + $0x80] sm:$0xff] }
  0x16   :  { %183 = vmatpush.msra.mxu3 %v3521_v16  ;;  %123 = vmatpush.msra.mxu0 %v3525_v17  ;;  %v3557_v28 = vld [vmem:[#allocation5 + $0x188] sm:$0xff]  ;;  %v3563_v30 = vld [vmem:[#allocation5 + $0x190] sm:$0xff]  ;;  %v3567_v31 = vld [vmem:[#allocation5 + $0x78] sm:$0xff] }
  0x17   :  { %164 = vmatpush.msra.mxu2 %v3531_v19  ;;  %143 = vmatpush.msra.mxu1 %v3539_v22  ;;  %v3569_v32 = vld [vmem:[#allocation5 + $0x178] sm:$0xff]  ;;  %v3573_v33 = vld [vmem:[#allocation5 + $0x70] sm:$0xff]  ;;  %v3575_v34 = vld [vmem:[#allocation5 + $0x180] sm:$0xff] }
  0x18   :  { %184 = vmatpush.msra.mxu3 %v3533_v20  ;;  %124 = vmatpush.msra.mxu0 %v3537_v21  ;;  %v3579_v35 = vld [vmem:[#allocation5 + $0x68] sm:$0xff]  ;;  %v3585_v37 = vld [vmem:[#allocation5 + $0x60] sm:$0xff]  ;;  %v3587_v38 = vld [vmem:[#allocation5 + $0x170] sm:$0xff] }
  0x19   :  { %165 = vmatpush.msra.mxu2 %v3543_v23  ;;  %144 = vmatpush.msra.mxu1 %v3551_v26  ;;  %v3581_v36 = vld [vmem:[#allocation5 + $0x168] sm:$0xff]  ;;  %v3591_v39 = vld [vmem:[#allocation5 + $0x58] sm:$0xff]  ;;  %v3597_v41 = vld [vmem:[#allocation5 + $0x50] sm:$0xff] }
  0x1a   :  { %185 = vmatpush.msra.mxu3 %v3545_v24  ;;  %125 = vmatpush.msra.mxu0 %v3549_v25  ;;  %v3593_v40 = vld [vmem:[#allocation5 + $0x158] sm:$0xff]  ;;  %v3599_v42 = vld [vmem:[#allocation5 + $0x160] sm:$0xff]  ;;  %v3603_v44 = vld [vmem:[#allocation5 + $0x48] sm:$0xff] }
  0x1b   :  { %166 = vmatpush.msra.mxu2 %v3555_v27  ;;  %145 = vmatpush.msra.mxu1 %v3563_v30  ;;  %v44_v43 = vld [vmem:[#allocation2] sm:$0xff]  ;;  %v3605_v45 = vld [vmem:[#allocation5 + $0x148] sm:$0xff]  ;;  %v3611_v48 = vld [vmem:[#allocation5 + $0x150] sm:$0xff] }
  0x1c   :  { %186 = vmatpush.msra.mxu3 %v3557_v28  ;;  %126 = vmatpush.msra.mxu0 %v3561_v29  ;;  %5520 = vst [vmem:[#allocation11_spill] sm:$0xff] %v3605_v45  ;;  %v45_v46 = vld [vmem:[#allocation2 + $0x8] sm:$0xff]  ;;  %v3609_v47 = vld [vmem:[#allocation5 + $0x40] sm:$0xff]  ;;  %v3615_v49 = vld [vmem:[#allocation5 + $0x38] sm:$0xff]  ;;  %3286 = vtanh.f32 %v44_v43 }
  0x1d   :  { %167 = vmatpush.msra.mxu2 %v3567_v31  ;;  %146 = vmatpush.msra.mxu1 %v3575_v34  ;;  %v3617_v50 = vld [vmem:[#allocation5 + $0x138] sm:$0xff]  ;;  %v3621_v51 = vld [vmem:[#allocation5 + $0x30] sm:$0xff]  ;;  %v3623_v52 = vld [vmem:[#allocation5 + $0x140] sm:$0xff]  ;;  %3288 = vtanh.f32 %v45_v46 }
  0x1e   :  { %187 = vmatpush.msra.mxu3 %v3569_v32  ;;  %127 = vmatpush.msra.mxu0 %v3573_v33  ;;  %5521 = vst [vmem:[#allocation12_spill] sm:$0xff] %v3617_v50  ;;  %v3627_v53 = vld [vmem:[#allocation5 + $0x28] sm:$0xff]  ;;  %v3633_v55 = vld [vmem:[#allocation5 + $0x20] sm:$0xff]  ;;  %v3635_v56 = vld [vmem:[#allocation5 + $0x130] sm:$0xff] }
  0x1f   :  { %168 = vmatpush.msra.mxu2 %v3579_v35  ;;  %147 = vmatpush.msra.mxu1 %v3587_v38  ;;  %5522 = vst [vmem:[#allocation13_spill] sm:$0xff] %v3623_v52  ;;  %v3629_v54 = vld [vmem:[#allocation5 + $0x128] sm:$0xff]  ;;  %v3639_v57 = vld [vmem:[#allocation5 + $0x18] sm:$0xff]  ;;  %v3645_v59 = vld [vmem:[#allocation5 + $0x10] sm:$0xff] }
  0x20   :  { %188 = vmatpush.msra.mxu3 %v3581_v36  ;;  %128 = vmatpush.msra.mxu0 %v3585_v37  ;;  %5523 = vst [vmem:[#allocation14_spill] sm:$0xff] %v3627_v53  ;;  %v3641_v58 = vld [vmem:[#allocation5 + $0x118] sm:$0xff]  ;;  %v3647_v60 = vld [vmem:[#allocation5 + $0x120] sm:$0xff]  ;;  %v3651_v62 = vld [vmem:[#allocation5 + $0x8] sm:$0xff] }
  0x21   :  { %169 = vmatpush.msra.mxu2 %v3591_v39  ;;  %148 = vmatpush.msra.mxu1 %v3599_v42  ;;  %5524 = vst [vmem:[#allocation15_spill] sm:$0xff] %v3629_v54  ;;  %v3653_v63 = vld [vmem:[#allocation5 + $0x108] sm:$0xff]  ;;  %v3659_v46 = vld [vmem:[#allocation5] sm:$0xff] }
  0x22   :  { %189 = vmatpush.msra.mxu3 %v3593_v40  ;;  %129 = vmatpush.msra.mxu0 %v3597_v41  ;;  %5525 = vst [vmem:[#allocation16_spill] sm:$0xff] %v3635_v56  ;;  %v3287_v61 = vpop.eup %3286 }
  0x23   :  { %170 = vmatpush.msra.mxu2 %v3603_v44  ;;  %149 = vmatpush.msra.mxu1 %v3611_v48  ;;  %5526 = vst [vmem:[#allocation17_spill] sm:$0xff] %v3639_v57  ;;  %v3289_v43 = vpop.eup %3288 }
  0x24   :  { %190 = vmatpush.msra.mxu3 %v3605_v45  ;;  %130 = vmatpush.msra.mxu0 %v3609_v47  ;;  %5527 = vst [vmem:[#allocation18_spill] sm:$0xff] %v3645_v59 }
  0x25   :  { %171 = vmatpush.msra.mxu2 %v3615_v49  ;;  %150 = vmatpush.msra.mxu1 %v3623_v52  ;;  %5528 = vst [vmem:[#allocation19_spill] sm:$0xff] %v3647_v60 }
  0x26   :  { %191 = vmatpush.msra.mxu3 %v3617_v50  ;;  %131 = vmatpush.msra.mxu0 %v3621_v51  ;;  %5529 = vst [vmem:[#allocation20_spill] sm:$0xff] %v3651_v62  ;;  %v3665_v50 = vld [vmem:[#allocation5 + $0x100] sm:$0xff] }
  0x27   :  { %172 = vmatpush.msra.mxu2 %v3627_v53  ;;  %151 = vmatpush.msra.mxu1 %v3635_v56  ;;  %5530 = vst [vmem:[#allocation21_spill] sm:$0xff] %v3653_v63 }
  0x28   :  { %192 = vmatpush.msra.mxu3 %v3629_v54  ;;  %132 = vmatpush.msra.mxu0 %v3633_v55  ;;  %5531 = vst [vmem:[#allocation22_spill] sm:$0xff] %v3659_v46  ;;  %v3661_v54 = vld [vmem:[#allocation5 + $0x110] sm:$0xff] }
  0x29   :  { %173 = vmatpush.msra.mxu2 %v3639_v57  ;;  %152 = vmatpush.msra.mxu1 %v3647_v60 }
  0x2a   :  { %193 = vmatpush.msra.mxu3 %v3641_v58  ;;  %133 = vmatpush.msra.mxu0 %v3645_v59 }
  0x2b   :  { %174 = vmatpush.msra.mxu2 %v3651_v62  ;;  %153 = vmatpush.msra.mxu1 %v3661_v54 }
  0x2c   :  { %194 = vmatpush.msra.mxu3 %v3653_v63  ;;  %175 = vmatmul.f32.vlgmr.msra.gmra.mxu2 %v3287_v61 }
  0x2d   :  { %195 = vmatmul.f32.vlgmr.msra.gmra.mxu3 %v3289_v43  ;;  %134 = vmatpush.msra.mxu0 %v3659_v46 }
  0x2e   :  { %135 = vmatmul.f32.vlgmr.msra.gmra.mxu0 %v3287_v61  ;;  %312 = vmatpush.msrb.mxu2 %v3478_v0  ;;  %v5532_v61 = vld [vmem:[#allocation12_spill] sm:$0xff] }
  0x2f   :  { %154 = vmatpush.msra.mxu1 %v3665_v50  ;;  %272 = vmatpush.msrb.mxu0 %v3486_v3 }
  0x30   :  { %155 = vmatmul.f32.vlgmr.msra.gmra.mxu1 %v3289_v43  ;;  %313 = vmatpush.msrb.mxu2 %v3480_v1  ;;  %v5533_v43 = vld [vmem:[#allocation15_spill] sm:$0xff] }
  0x31   :  { %273 = vmatpush.msrb.mxu0 %v3493_v6  ;;  %292 = vmatpush.msrb.mxu1 %v3495_v7 }
  0x32   :  { %332 = vmatpush.msrb.mxu3 %v3482_v2  ;;  %314 = vmatpush.msrb.mxu2 %v3491_v5 }
  0x33   :  { %274 = vmatpush.msrb.mxu0 %v3501_v9  ;;  %293 = vmatpush.msrb.mxu1 %v3503_v10 }
  0x34   :  { %333 = vmatpush.msrb.mxu3 %v3488_v4  ;;  %315 = vmatpush.msrb.mxu2 %v3507_v11 }
  0x35   :  { %275 = vmatpush.msrb.mxu0 %v3513_v13  ;;  %294 = vmatpush.msrb.mxu1 %v3515_v14 }
  0x36   :  { %334 = vmatpush.msrb.mxu3 %v3499_v8  ;;  %316 = vmatpush.msrb.mxu2 %v3519_v15 }
  0x37   :  { %276 = vmatpush.msrb.mxu0 %v3525_v17  ;;  %295 = vmatpush.msrb.mxu1 %v3527_v18 }
  0x38   :  { %335 = vmatpush.msrb.mxu3 %v3509_v12  ;;  %317 = vmatpush.msrb.mxu2 %v3531_v19 }
  0x39   :  { %277 = vmatpush.msrb.mxu0 %v3537_v21  ;;  %296 = vmatpush.msrb.mxu1 %v3539_v22 }
  0x3a   :  { %336 = vmatpush.msrb.mxu3 %v3521_v16  ;;  %318 = vmatpush.msrb.mxu2 %v3543_v23 }
  0x3b   :  { %278 = vmatpush.msrb.mxu0 %v3549_v25  ;;  %297 = vmatpush.msrb.mxu1 %v3551_v26 }
  0x3c   :  { %337 = vmatpush.msrb.mxu3 %v3533_v20  ;;  %319 = vmatpush.msrb.mxu2 %v3555_v27 }
  0x3d   :  { %279 = vmatpush.msrb.mxu0 %v3561_v29  ;;  %298 = vmatpush.msrb.mxu1 %v3563_v30 }
  0x3e   :  { %338 = vmatpush.msrb.mxu3 %v3545_v24  ;;  %320 = vmatpush.msrb.mxu2 %v3567_v31 }
  0x3f   :  { %280 = vmatpush.msrb.mxu0 %v3573_v33  ;;  %299 = vmatpush.msrb.mxu1 %v3575_v34 }
  0x40   :  { %339 = vmatpush.msrb.mxu3 %v3557_v28  ;;  %321 = vmatpush.msrb.mxu2 %v3579_v35 }
  0x41   :  { %281 = vmatpush.msrb.mxu0 %v3585_v37  ;;  %300 = vmatpush.msrb.mxu1 %v3587_v38 }
  0x42   :  { %340 = vmatpush.msrb.mxu3 %v3569_v32  ;;  %322 = vmatpush.msrb.mxu2 %v3591_v39 }
  0x43   :  { %282 = vmatpush.msrb.mxu0 %v3597_v41  ;;  %301 = vmatpush.msrb.mxu1 %v3599_v42 }
  0x44   :  { %341 = vmatpush.msrb.mxu3 %v3581_v36  ;;  %323 = vmatpush.msrb.mxu2 %v3603_v44 }
  0x45   :  { %283 = vmatpush.msrb.mxu0 %v3609_v47  ;;  %302 = vmatpush.msrb.mxu1 %v3611_v48 }
  0x46   :  { %342 = vmatpush.msrb.mxu3 %v3593_v40  ;;  %324 = vmatpush.msrb.mxu2 %v3615_v49 }
  0x47   :  { %284 = vmatpush.msrb.mxu0 %v3621_v51  ;;  %303 = vmatpush.msrb.mxu1 %v3623_v52 }
  0x48   :  { %343 = vmatpush.msrb.mxu3 %v3605_v45  ;;  %325 = vmatpush.msrb.mxu2 %v3627_v53 }
  0x49   :  { %285 = vmatpush.msrb.mxu0 %v3633_v55  ;;  %304 = vmatpush.msrb.mxu1 %v3635_v56 }
  0x4a   :  { %344 = vmatpush.msrb.mxu3 %v5532_v61  ;;  %326 = vmatpush.msrb.mxu2 %v3639_v57 }
  0x4b   :  { %286 = vmatpush.msrb.mxu0 %v3645_v59  ;;  %305 = vmatpush.msrb.mxu1 %v3647_v60 }
  0x4c   :  { %345 = vmatpush.msrb.mxu3 %v5533_v43  ;;  %327 = vmatpush.msrb.mxu2 %v3651_v62 }
  0x4d   :  { %287 = vmatpush.msrb.mxu0 %v3659_v46  ;;  %306 = vmatpush.msrb.mxu1 %v3661_v54 }
  0x4e   :  { %346 = vmatpush.msrb.mxu3 %v3641_v58  ;;  %465 = vmatpush.msra.mxu2 %v3478_v0 }
  0x4f   :  { %425 = vmatpush.msra.mxu0 %v3486_v3  ;;  %307 = vmatpush.msrb.mxu1 %v3665_v50 }
  0x50   :  { %347 = vmatpush.msrb.mxu3 %v3653_v63  ;;  %466 = vmatpush.msra.mxu2 %v3480_v1 }
  0x51   :  { %426 = vmatpush.msra.mxu0 %v3493_v6  ;;  %445 = vmatpush.msra.mxu1 %v3495_v7 }
  0x52   :  { %485 = vmatpush.msra.mxu3 %v3482_v2  ;;  %467 = vmatpush.msra.mxu2 %v3491_v5 }
  0x53   :  { %427 = vmatpush.msra.mxu0 %v3501_v9  ;;  %446 = vmatpush.msra.mxu1 %v3503_v10 }
  0x54   :  { %486 = vmatpush.msra.mxu3 %v3488_v4  ;;  %468 = vmatpush.msra.mxu2 %v3507_v11 }
  0x55   :  { %428 = vmatpush.msra.mxu0 %v3513_v13  ;;  %447 = vmatpush.msra.mxu1 %v3515_v14 }
  0x56   :  { %487 = vmatpush.msra.mxu3 %v3499_v8  ;;  %469 = vmatpush.msra.mxu2 %v3519_v15 }
  0x57   :  { %429 = vmatpush.msra.mxu0 %v3525_v17  ;;  %448 = vmatpush.msra.mxu1 %v3527_v18 }
  0x58   :  { %488 = vmatpush.msra.mxu3 %v3509_v12  ;;  %470 = vmatpush.msra.mxu2 %v3531_v19 }
  0x59   :  { %430 = vmatpush.msra.mxu0 %v3537_v21  ;;  %449 = vmatpush.msra.mxu1 %v3539_v22 }
  0x5a   :  { %489 = vmatpush.msra.mxu3 %v3521_v16  ;;  %471 = vmatpush.msra.mxu2 %v3543_v23 }
  0x5b   :  { %431 = vmatpush.msra.mxu0 %v3549_v25  ;;  %450 = vmatpush.msra.mxu1 %v3551_v26 }
  0x5c   :  { %490 = vmatpush.msra.mxu3 %v3533_v20  ;;  %472 = vmatpush.msra.mxu2 %v3555_v27 }
  0x5d   :  { %432 = vmatpush.msra.mxu0 %v3561_v29  ;;  %451 = vmatpush.msra.mxu1 %v3563_v30 }
  0x5e   :  { %491 = vmatpush.msra.mxu3 %v3545_v24  ;;  %473 = vmatpush.msra.mxu2 %v3567_v31 }
  0x5f   :  { %433 = vmatpush.msra.mxu0 %v3573_v33  ;;  %452 = vmatpush.msra.mxu1 %v3575_v34 }
  0x60   :  { %492 = vmatpush.msra.mxu3 %v3557_v28  ;;  %474 = vmatpush.msra.mxu2 %v3579_v35 }
  0x61   :  { %434 = vmatpush.msra.mxu0 %v3585_v37  ;;  %453 = vmatpush.msra.mxu1 %v3587_v38 }
  0x62   :  { %493 = vmatpush.msra.mxu3 %v3569_v32  ;;  %475 = vmatpush.msra.mxu2 %v3591_v39 }
  0x63   :  { %435 = vmatpush.msra.mxu0 %v3597_v41  ;;  %454 = vmatpush.msra.mxu1 %v3599_v42 }
  0x64   :  { %494 = vmatpush.msra.mxu3 %v3581_v36  ;;  %476 = vmatpush.msra.mxu2 %v3603_v44 }
  0x65   :  { %436 = vmatpush.msra.mxu0 %v3609_v47  ;;  %455 = vmatpush.msra.mxu1 %v3611_v48 }
  0x66   :  { %495 = vmatpush.msra.mxu3 %v3593_v40  ;;  %477 = vmatpush.msra.mxu2 %v3615_v49 }
  0x67   :  { %437 = vmatpush.msra.mxu0 %v3621_v51  ;;  %456 = vmatpush.msra.mxu1 %v3623_v52 }
  0x68   :  { %496 = vmatpush.msra.mxu3 %v3605_v45  ;;  %478 = vmatpush.msra.mxu2 %v3627_v53  ;;  %v118_v45 = vld [vmem:[#allocation2 + $0x18] sm:$0xff] }
  0x69   :  { %438 = vmatpush.msra.mxu0 %v3633_v55  ;;  %457 = vmatpush.msra.mxu1 %v3635_v56  ;;  %v117_v56 = vld [vmem:[#allocation2 + $0x10] sm:$0xff] }
  0x6a   :  { %497 = vmatpush.msra.mxu3 %v5532_v61  ;;  %479 = vmatpush.msra.mxu2 %v3639_v57 }
  0x6b   :  { %439 = vmatpush.msra.mxu0 %v3645_v59  ;;  %458 = vmatpush.msra.mxu1 %v3647_v60 }
  0x6c   :  { %498 = vmatpush.msra.mxu3 %v5533_v43  ;;  %480 = vmatpush.msra.mxu2 %v3651_v62 }
  0x6d   :  { %440 = vmatpush.msra.mxu0 %v3659_v46  ;;  %459 = vmatpush.msra.mxu1 %v3661_v54 }
  0x6e   :  { %499 = vmatpush.msra.mxu3 %v3641_v58 }
  0x6f   :  { %460 = vmatpush.msra.mxu1 %v3665_v50 }
  0x70   :  { %500 = vmatpush.msra.mxu3 %v3653_v63 }
  0xab   :  { %v136_v61 = vpop.f32.mrf.mxu0 }
  0xac   :  { %v137_v59 = vadd.f32 %v136_v61, %v117_v56  ;;  %v3916_v56 = vld [vmem:[#allocation5 + $0x90] sm:$0xff] }
  0xad   :  { %v156_v57 = vpop.f32.mrf.mxu1  ;;  %v3940_v61 = vld [vmem:[#allocation5 + $0x70] sm:$0xff] }
  0xae   :  { %v157_v60 = vadd.f32 %v156_v57, %v137_v59  ;;  %v3918_v57 = vld [vmem:[#allocation5 + $0x1c0] sm:$0xff]  ;;  %v3924_v59 = vld [vmem:[#allocation5 + $0x1c8] sm:$0xff] }
  0xaf   :  { %v176_v52 = vpop.f32.mrf.mxu2 }
  0xb0   :  { %v196_v46 = vpop.f32.mrf.mxu3  ;;  %3290 = vtanh.f32 %v157_v60  ;;  %v177_v43 = vadd.f32 %v176_v52, %v118_v45  ;;  %v3904_v52 = vld [vmem:[#allocation5 + $0xa0] sm:$0xff] }
  0xb1   :  { %v3928_v60 = vld [vmem:[#allocation5 + $0x80] sm:$0xff] }
  0xb2   :  { %v197_v53 = vadd.f32 %v196_v46, %v177_v43  ;;  %v3936_v46 = vld [vmem:[#allocation5 + $0x1b8] sm:$0xff]  ;;  %v3942_v43 = vld [vmem:[#allocation5 + $0x1a0] sm:$0xff] }
  0xb4   :  { %3292 = vtanh.f32 %v197_v53  ;;  %v3906_v53 = vld [vmem:[#allocation5 + $0x1d0] sm:$0xff] }
  0xb6   :  { %v3291_v62 = vpop.eup %3290 }
  0xb7   :  { %288 = vmatmul.f32.vlgmr.msrb.gmra.mxu0 %v3291_v62  ;;  %328 = vmatmul.f32.vlgmr.msrb.gmra.mxu2 %v3291_v62  ;;  %v3930_v62 = vld [vmem:[#allocation5 + $0x1b0] sm:$0xff] }
  0xb8   :  { %578 = vmatpush.msrb.mxu0 %v3486_v3  ;;  %618 = vmatpush.msrb.mxu2 %v3478_v0  ;;  %v5534_v0 = vld [vmem:[#allocation14_spill] sm:$0xff] }
  0xb9   :  { %v5537_v3 = vld [vmem:[#allocation18_spill] sm:$0xff] }
  0xba   :  { %v3293_v63 = vpop.eup %3292  ;;  %579 = vmatpush.msrb.mxu0 %v3493_v6  ;;  %619 = vmatpush.msrb.mxu2 %v3480_v1  ;;  %v5535_v1 = vld [vmem:[#allocation13_spill] sm:$0xff]  ;;  %v5540_v6 = vld [vmem:[#allocation12_spill] sm:$0xff]  ;;  %5549 = vst [vmem:[#allocation18_spill] sm:$0xff] %v3940_v61 }
  0xbb   :  { %308 = vmatmul.f32.vlgmr.msrb.gmra.mxu1 %v3293_v63  ;;  %348 = vmatmul.f32.vlgmr.msrb.gmra.mxu3 %v3293_v63  ;;  %5547 = vst [vmem:[#allocation13_spill] sm:$0xff] %v3916_v56  ;;  %v3932_v63 = vld [vmem:[#allocation5 + $0x88] sm:$0xff] }
  0xbc   :  { %580 = vmatpush.msrb.mxu0 %v3501_v9  ;;  %620 = vmatpush.msrb.mxu2 %v3491_v5  ;;  %v5539_v5 = vld [vmem:[#allocation16_spill] sm:$0xff]  ;;  %v5543_v9 = vld [vmem:[#allocation19_spill] sm:$0xff] }
  0xbd   :  { %598 = vmatpush.msrb.mxu1 %v3495_v7  ;;  %638 = vmatpush.msrb.mxu3 %v3482_v2  ;;  %v5536_v2 = vld [vmem:[#allocation11_spill] sm:$0xff]  ;;  %v5541_v7 = vld [vmem:[#allocation22_spill] sm:$0xff] }
  0xbe   :  { %581 = vmatpush.msrb.mxu0 %v3513_v13  ;;  %621 = vmatpush.msrb.mxu2 %v3507_v11  ;;  %v5545_v11 = vld [vmem:[#allocation21_spill] sm:$0xff]  ;;  %5548 = vst [vmem:[#allocation11_spill] sm:$0xff] %v3932_v63 }
  0xbf   :  { %599 = vmatpush.msrb.mxu1 %v3503_v10  ;;  %639 = vmatpush.msrb.mxu3 %v3488_v4  ;;  %v5538_v4 = vld [vmem:[#allocation17_spill] sm:$0xff]  ;;  %v5544_v10 = vld [vmem:[#allocation15_spill] sm:$0xff] }
  0xc0   :  { %582 = vmatpush.msrb.mxu0 %v3525_v17  ;;  %622 = vmatpush.msrb.mxu2 %v3519_v15 }
  0xc1   :  { %600 = vmatpush.msrb.mxu1 %v3515_v14  ;;  %640 = vmatpush.msrb.mxu3 %v3499_v8  ;;  %v5542_v8 = vld [vmem:[#allocation20_spill] sm:$0xff] }
  0xc2   :  { %583 = vmatpush.msrb.mxu0 %v3537_v21  ;;  %623 = vmatpush.msrb.mxu2 %v3531_v19 }
  0xc3   :  { %601 = vmatpush.msrb.mxu1 %v3527_v18  ;;  %641 = vmatpush.msrb.mxu3 %v3509_v12  ;;  %v270_v12 = vld [vmem:[#allocation2 + $0x20] sm:$0xff] }
  0xc4   :  { %584 = vmatpush.msrb.mxu0 %v3549_v25  ;;  %624 = vmatpush.msrb.mxu2 %v3543_v23  ;;  %v3864_v25 = vld [vmem:[#allocation5 + $0xf8] sm:$0xff] }
  0xc5   :  { %602 = vmatpush.msrb.mxu1 %v3539_v22  ;;  %642 = vmatpush.msrb.mxu3 %v3521_v16  ;;  %v271_v16 = vld [vmem:[#allocation2 + $0x28] sm:$0xff] }
  0xc6   :  { %585 = vmatpush.msrb.mxu0 %v3561_v29  ;;  %625 = vmatpush.msrb.mxu2 %v3555_v27  ;;  %v3870_v27 = vld [vmem:[#allocation5 + $0xe8] sm:$0xff]  ;;  %v3874_v29 = vld [vmem:[#allocation5 + $0xd8] sm:$0xff] }
  0xc7   :  { %603 = vmatpush.msrb.mxu1 %v3551_v26  ;;  %643 = vmatpush.msrb.mxu3 %v3533_v20  ;;  %v3866_v26 = vld [vmem:[#allocation5 + $0xe0] sm:$0xff] }
  0xc8   :  { %586 = vmatpush.msrb.mxu0 %v3573_v33  ;;  %626 = vmatpush.msrb.mxu2 %v3567_v31  ;;  %v3880_v31 = vld [vmem:[#allocation5 + $0x1f8] sm:$0xff]  ;;  %v3885_v33 = vld [vmem:[#allocation5 + $0xc8] sm:$0xff] }
  0xc9   :  { %604 = vmatpush.msrb.mxu1 %v3563_v30  ;;  %644 = vmatpush.msrb.mxu3 %v3545_v24  ;;  %v3862_v24 = vld [vmem:[#allocation5 + $0xf0] sm:$0xff] }
  0xca   :  { %587 = vmatpush.msrb.mxu0 %v3585_v37  ;;  %627 = vmatpush.msrb.mxu2 %v3579_v35  ;;  %v3876_v30 = vld [vmem:[#allocation5 + $0x1f0] sm:$0xff] }
  0xcb   :  { %605 = vmatpush.msrb.mxu1 %v3575_v34  ;;  %645 = vmatpush.msrb.mxu3 %v3557_v28  ;;  %v3872_v28 = vld [vmem:[#allocation5 + $0xd0] sm:$0xff] }
  0xcc   :  { %588 = vmatpush.msrb.mxu0 %v3597_v41  ;;  %628 = vmatpush.msrb.mxu2 %v3591_v39  ;;  %v423_v34 = vld [vmem:[#allocation2 + $0x30] sm:$0xff]  ;;  %v424_v39 = vld [vmem:[#allocation2 + $0x38] sm:$0xff] }
  0xcd   :  { %606 = vmatpush.msrb.mxu1 %v3587_v38  ;;  %646 = vmatpush.msrb.mxu3 %v3569_v32  ;;  %v3882_v32 = vld [vmem:[#allocation5 + $0xc0] sm:$0xff] }
  0xce   :  { %589 = vmatpush.msrb.mxu0 %v3609_v47  ;;  %629 = vmatpush.msrb.mxu2 %v3603_v44 }
  0xcf   :  { %607 = vmatpush.msrb.mxu1 %v3599_v42  ;;  %647 = vmatpush.msrb.mxu3 %v3581_v36 }
  0xd0   :  { %590 = vmatpush.msrb.mxu0 %v3621_v51  ;;  %630 = vmatpush.msrb.mxu2 %v3615_v49  ;;  %v3894_v49 = vld [vmem:[#allocation5 + $0x1e0] sm:$0xff]  ;;  %v3900_v51 = vld [vmem:[#allocation5 + $0x1e8] sm:$0xff] }
  0xd1   :  { %608 = vmatpush.msrb.mxu1 %v3611_v48  ;;  %648 = vmatpush.msrb.mxu3 %v3593_v40  ;;  %v3892_v48 = vld [vmem:[#allocation5 + $0xb0] sm:$0xff] }
  0xd2   :  { %591 = vmatpush.msrb.mxu0 %v3633_v55  ;;  %631 = vmatpush.msrb.mxu2 %v5534_v0  ;;  %v3912_v55 = vld [vmem:[#allocation5 + $0x1d8] sm:$0xff] }
  0xd3   :  { %609 = vmatpush.msrb.mxu1 %v5535_v1  ;;  %649 = vmatpush.msrb.mxu3 %v5536_v2  ;;  %v3944_v0 = vld [vmem:[#allocation5 + $0x78] sm:$0xff]  ;;  %v3948_v1 = vld [vmem:[#allocation5 + $0x1a8] sm:$0xff]  ;;  %v3952_v2 = vld [vmem:[#allocation5 + $0x60] sm:$0xff] }
  0xd4   :  { %592 = vmatpush.msrb.mxu0 %v5537_v3  ;;  %632 = vmatpush.msrb.mxu2 %v5538_v4  ;;  %5550 = vst [vmem:[#allocation17_spill] sm:$0xff] %v3944_v0  ;;  %v3954_v3 = vld [vmem:[#allocation5 + $0x190] sm:$0xff]  ;;  %v3956_v4 = vld [vmem:[#allocation5 + $0x68] sm:$0xff] }
  0xd5   :  { %610 = vmatpush.msrb.mxu1 %v5539_v5  ;;  %650 = vmatpush.msrb.mxu3 %v5540_v6  ;;  %5551 = vst [vmem:[#allocation16_spill] sm:$0xff] %v3952_v2  ;;  %v3960_v5 = vld [vmem:[#allocation5 + $0x198] sm:$0xff]  ;;  %v3964_v6 = vld [vmem:[#allocation5 + $0x50] sm:$0xff] }
  0xd6   :  { %593 = vmatpush.msrb.mxu0 %v5541_v7  ;;  %633 = vmatpush.msrb.mxu2 %v5542_v8  ;;  %5552 = vst [vmem:[#allocation12_spill] sm:$0xff] %v3954_v3  ;;  %v3966_v7 = vld [vmem:[#allocation5 + $0x180] sm:$0xff]  ;;  %v3968_v8 = vld [vmem:[#allocation5 + $0x58] sm:$0xff] }
  0xd7   :  { %611 = vmatpush.msrb.mxu1 %v5543_v9  ;;  %651 = vmatpush.msrb.mxu3 %v5544_v10  ;;  %v3972_v9 = vld [vmem:[#allocation5 + $0x188] sm:$0xff]  ;;  %v3976_v10 = vld [vmem:[#allocation5 + $0x40] sm:$0xff] }
  0xd9   :  { %612 = vmatpush.msrb.mxu1 %v3661_v54  ;;  %652 = vmatpush.msrb.mxu3 %v3641_v58  ;;  %v3908_v54 = vld [vmem:[#allocation5 + $0xa8] sm:$0xff]  ;;  %v3920_v58 = vld [vmem:[#allocation5 + $0x98] sm:$0xff] }
  0xda   :  { %5546 = vst [vmem:[#allocation14_spill] sm:$0xff] %v3908_v54 }
  0xdb   :  { %613 = vmatpush.msrb.mxu1 %v3665_v50  ;;  %653 = vmatpush.msrb.mxu3 %v5545_v11  ;;  %v3896_v50 = vld [vmem:[#allocation5 + $0xb8] sm:$0xff]  ;;  %v3978_v11 = vld [vmem:[#allocation5 + $0x170] sm:$0xff] }
 0x134   :  { %v289_v13 = vpop.f32.mrf.mxu0 }
 0x135   :  { %v290_v14 = vadd.f32 %v289_v13, %v270_v12  ;;  %v3982_v12 = vld [vmem:[#allocation5 + $0x48] sm:$0xff]  ;;  %v3984_v13 = vld [vmem:[#allocation5 + $0x178] sm:$0xff] }
 0x138   :  { %v309_v15 = vpop.f32.mrf.mxu1 }
 0x139   :  { %v310_v17 = vadd.f32 %v309_v15, %v290_v14  ;;  %v3988_v14 = vld [vmem:[#allocation5 + $0x30] sm:$0xff]  ;;  %v3990_v15 = vld [vmem:[#allocation5 + $0x160] sm:$0xff] }
 0x13a   :  { %v329_v18 = vpop.f32.mrf.mxu2 }
 0x13b   :  { %3294 = vtanh.f32 %v310_v17  ;;  %v330_v19 = vadd.f32 %v329_v18, %v271_v16  ;;  %v3992_v16 = vld [vmem:[#allocation5 + $0x38] sm:$0xff]  ;;  %v3996_v17 = vld [vmem:[#allocation5 + $0x168] sm:$0xff]  ;;  %v4000_v18 = vld [vmem:[#allocation5 + $0x20] sm:$0xff] }
 0x13e   :  { %v349_v20 = vpop.f32.mrf.mxu3 }
 0x13f   :  { %v350_v21 = vadd.f32 %v349_v20, %v330_v19  ;;  %v4002_v19 = vld [vmem:[#allocation5 + $0x150] sm:$0xff]  ;;  %v4004_v20 = vld [vmem:[#allocation5 + $0x28] sm:$0xff] }
 0x141   :  { %v3295_v22 = vpop.eup %3294  ;;  %3296 = vtanh.f32 %v350_v21  ;;  %v4008_v21 = vld [vmem:[#allocation5 + $0x158] sm:$0xff] }
 0x142   :  { %441 = vmatmul.f32.vlgmr.msra.gmra.mxu0 %v3295_v22  ;;  %481 = vmatmul.f32.vlgmr.msra.gmra.mxu2 %v3295_v22  ;;  %5553 = vst [vmem:[#allocation22_spill] sm:$0xff] %v4008_v21  ;;  %v4012_v22 = vld [vmem:[#allocation5 + $0x10] sm:$0xff] }
 0x143   :  { %731 = vmatpush.msra.mxu0 %v3862_v24  ;;  %771 = vmatpush.msra.mxu2 %v3864_v25  ;;  %5554 = vst [vmem:[#allocation20_spill] sm:$0xff] %v4012_v22 }
 0x145   :  { %732 = vmatpush.msra.mxu0 %v3866_v26  ;;  %772 = vmatpush.msra.mxu2 %v3870_v27 }
 0x147   :  { %v3297_v23 = vpop.eup %3296  ;;  %733 = vmatpush.msra.mxu0 %v3872_v28  ;;  %773 = vmatpush.msra.mxu2 %v3874_v29 }
 0x148   :  { %461 = vmatmul.f32.vlgmr.msra.gmra.mxu1 %v3297_v23  ;;  %501 = vmatmul.f32.vlgmr.msra.gmra.mxu3 %v3297_v23  ;;  %v4014_v23 = vld [vmem:[#allocation5 + $0x140] sm:$0xff] }
 0x149   :  { %751 = vmatpush.msra.mxu1 %v3876_v30  ;;  %791 = vmatpush.msra.mxu3 %v3880_v31  ;;  %5555 = vst [vmem:[#allocation19_spill] sm:$0xff] %v4014_v23 }
 0x14a   :  { %734 = vmatpush.msra.mxu0 %v3882_v32  ;;  %774 = vmatpush.msra.mxu2 %v3885_v33 }
 0x14b   :  { %752 = vmatpush.msra.mxu1 %v3894_v49  ;;  %792 = vmatpush.msra.mxu3 %v3900_v51 }
 0x14c   :  { %735 = vmatpush.msra.mxu0 %v3892_v48  ;;  %775 = vmatpush.msra.mxu2 %v3896_v50 }
 0x14d   :  { %753 = vmatpush.msra.mxu1 %v3906_v53  ;;  %793 = vmatpush.msra.mxu3 %v3912_v55 }
 0x14e   :  { %736 = vmatpush.msra.mxu0 %v3904_v52  ;;  %776 = vmatpush.msra.mxu2 %v3908_v54 }
 0x14f   :  { %754 = vmatpush.msra.mxu1 %v3918_v57  ;;  %794 = vmatpush.msra.mxu3 %v3924_v59 }
 0x150   :  { %737 = vmatpush.msra.mxu0 %v3916_v56  ;;  %777 = vmatpush.msra.mxu2 %v3920_v58 }
 0x151   :  { %755 = vmatpush.msra.mxu1 %v3930_v62  ;;  %795 = vmatpush.msra.mxu3 %v3936_v46 }
 0x152   :  { %738 = vmatpush.msra.mxu0 %v3928_v60  ;;  %778 = vmatpush.msra.mxu2 %v3932_v63 }
 0x153   :  { %756 = vmatpush.msra.mxu1 %v3942_v43  ;;  %796 = vmatpush.msra.mxu3 %v3948_v1 }
 0x154   :  { %739 = vmatpush.msra.mxu0 %v3940_v61  ;;  %779 = vmatpush.msra.mxu2 %v3944_v0 }
 0x155   :  { %757 = vmatpush.msra.mxu1 %v3954_v3  ;;  %797 = vmatpush.msra.mxu3 %v3960_v5 }
 0x156   :  { %740 = vmatpush.msra.mxu0 %v3952_v2  ;;  %780 = vmatpush.msra.mxu2 %v3956_v4 }
 0x157   :  { %758 = vmatpush.msra.mxu1 %v3966_v7  ;;  %798 = vmatpush.msra.mxu3 %v3972_v9 }
 0x158   :  { %741 = vmatpush.msra.mxu0 %v3964_v6  ;;  %781 = vmatpush.msra.mxu2 %v3968_v8 }
 0x159   :  { %759 = vmatpush.msra.mxu1 %v3978_v11  ;;  %799 = vmatpush.msra.mxu3 %v3984_v13 }
 0x15a   :  { %742 = vmatpush.msra.mxu0 %v3976_v10  ;;  %782 = vmatpush.msra.mxu2 %v3982_v12 }
 0x15b   :  { %760 = vmatpush.msra.mxu1 %v3990_v15  ;;  %800 = vmatpush.msra.mxu3 %v3996_v17 }
 0x15c   :  { %743 = vmatpush.msra.mxu0 %v3988_v14  ;;  %783 = vmatpush.msra.mxu2 %v3992_v16 }
 0x15d   :  { %761 = vmatpush.msra.mxu1 %v4002_v19  ;;  %801 = vmatpush.msra.mxu3 %v4008_v21 }
 0x15e   :  { %744 = vmatpush.msra.mxu0 %v4000_v18  ;;  %784 = vmatpush.msra.mxu2 %v4004_v20 }
 0x15f   :  { %762 = vmatpush.msra.mxu1 %v4014_v23 }
 0x160   :  { %745 = vmatpush.msra.mxu0 %v4012_v22 }
 0x1bf   :  { %v442_v35 = vpop.f32.mrf.mxu0 }
 0x1c0   :  { %v443_v36 = vadd.f32 %v442_v35, %v423_v34  ;;  %v4016_v34 = vld [vmem:[#allocation5 + $0x18] sm:$0xff]  ;;  %v4020_v35 = vld [vmem:[#allocation5 + $0x148] sm:$0xff] }
 0x1c1   :  { %5556 = vst [vmem:[#allocation15_spill] sm:$0xff] %v4016_v34  ;;  %785 = vmatpush.msra.mxu2 %v4016_v34  ;;  %802 = vmatpush.msra.mxu3 %v4020_v35 }
 0x1c2   :  { %5557 = vst [vmem:[#allocation21_spill] sm:$0xff] %v4020_v35 }
 0x1c5   :  { %v462_v37 = vpop.f32.mrf.mxu1  ;;  %v482_v40 = vpop.f32.mrf.mxu2 }
 0x1c6   :  { %v463_v38 = vadd.f32 %v462_v37, %v443_v36  ;;  %v483_v41 = vadd.f32 %v482_v40, %v424_v39  ;;  %v4024_v36 = vld [vmem:[#allocation5] sm:$0xff]  ;;  %v4026_v37 = vld [vmem:[#allocation5 + $0x130] sm:$0xff]  ;;  %v4032_v39 = vld [vmem:[#allocation5 + $0x138] sm:$0xff] }
 0x1c7   :  { %5558 = vst [vmem:[#allocation23_spill] sm:$0xff] %v4024_v36  ;;  %746 = vmatpush.msra.mxu0 %v4024_v36  ;;  %763 = vmatpush.msra.mxu1 %v4026_v37  ;;  %v4036_v40 = vld [vmem:[#allocation5 + $0x120] sm:$0xff] }
 0x1c8   :  { %3298 = vtanh.f32 %v463_v38  ;;  %5559 = vst [vmem:[#allocation24_spill] sm:$0xff] %v4026_v37  ;;  %v4028_v38 = vld [vmem:[#allocation5 + $0x8] sm:$0xff]  ;;  %803 = vmatpush.msra.mxu3 %v4032_v39 }
 0x1c9   :  { %5560 = vst [vmem:[#allocation25_spill] sm:$0xff] %v4028_v38  ;;  %786 = vmatpush.msra.mxu2 %v4028_v38  ;;  %764 = vmatpush.msra.mxu1 %v4036_v40 }
 0x1ca   :  { %5561 = vst [vmem:[#allocation26_spill] sm:$0xff] %v4032_v39 }
 0x1cb   :  { %v502_v42 = vpop.f32.mrf.mxu3  ;;  %5562 = vst [vmem:[#allocation27_spill] sm:$0xff] %v4036_v40 }
 0x1cc   :  { %v503_v44 = vadd.f32 %v502_v42, %v483_v41  ;;  %v4038_v41 = vld [vmem:[#allocation5 + $0x128] sm:$0xff]  ;;  %v4040_v42 = vld [vmem:[#allocation5 + $0x110] sm:$0xff] }
 0x1cd   :  { %5563 = vst [vmem:[#allocation28_spill] sm:$0xff] %v4038_v41  ;;  %804 = vmatpush.msra.mxu3 %v4038_v41  ;;  %765 = vmatpush.msra.mxu1 %v4040_v42 }
 0x1ce   :  { %v3299_v45 = vpop.eup %3298  ;;  %3300 = vtanh.f32 %v503_v44  ;;  %v4043_v44 = vld [vmem:[#allocation5 + $0x118] sm:$0xff] }
 0x1cf   :  { %594 = vmatmul.f32.vlgmr.msrb.gmra.mxu0 %v3299_v45  ;;  %634 = vmatmul.f32.vlgmr.msrb.gmra.mxu2 %v3299_v45  ;;  %v4047_v45 = vld [vmem:[#allocation5 + $0x100] sm:$0xff] }
 0x1d0   :  { %884 = vmatpush.msrb.mxu0 %v3862_v24  ;;  %924 = vmatpush.msrb.mxu2 %v3864_v25 }
 0x1d1   :  { %805 = vmatpush.msra.mxu3 %v4043_v44  ;;  %766 = vmatpush.msra.mxu1 %v4047_v45 }
 0x1d2   :  { %885 = vmatpush.msrb.mxu0 %v3866_v26  ;;  %925 = vmatpush.msrb.mxu2 %v3870_v27 }
 0x1d4   :  { %v3301_v47 = vpop.eup %3300  ;;  %886 = vmatpush.msrb.mxu0 %v3872_v28  ;;  %926 = vmatpush.msrb.mxu2 %v3874_v29 }
 0x1d5   :  { %614 = vmatmul.f32.vlgmr.msrb.gmra.mxu1 %v3301_v47  ;;  %654 = vmatmul.f32.vlgmr.msrb.gmra.mxu3 %v3301_v47  ;;  %v4051_v47 = vld [vmem:[#allocation5 + $0x108] sm:$0xff] }
 0x1d6   :  { %806 = vmatpush.msra.mxu3 %v4051_v47  ;;  %887 = vmatpush.msrb.mxu0 %v3882_v32 }
 0x1d7   :  { %904 = vmatpush.msrb.mxu1 %v3876_v30  ;;  %927 = vmatpush.msrb.mxu2 %v3885_v33 }
 0x1d8   :  { %944 = vmatpush.msrb.mxu3 %v3880_v31  ;;  %888 = vmatpush.msrb.mxu0 %v3892_v48 }
 0x1d9   :  { %905 = vmatpush.msrb.mxu1 %v3894_v49  ;;  %928 = vmatpush.msrb.mxu2 %v3896_v50 }
 0x1da   :  { %945 = vmatpush.msrb.mxu3 %v3900_v51  ;;  %889 = vmatpush.msrb.mxu0 %v3904_v52 }
 0x1db   :  { %906 = vmatpush.msrb.mxu1 %v3906_v53  ;;  %929 = vmatpush.msrb.mxu2 %v3908_v54  ;;  %v576_v54 = vld [vmem:[#allocation2 + $0x40] sm:$0xff] }
 0x1dc   :  { %946 = vmatpush.msrb.mxu3 %v3912_v55  ;;  %890 = vmatpush.msrb.mxu0 %v3916_v56 }
 0x1dd   :  { %907 = vmatpush.msrb.mxu1 %v3918_v57  ;;  %930 = vmatpush.msrb.mxu2 %v3920_v58 }
 0x1de   :  { %947 = vmatpush.msrb.mxu3 %v3924_v59  ;;  %891 = vmatpush.msrb.mxu0 %v3928_v60 }
 0x1df   :  { %908 = vmatpush.msrb.mxu1 %v3930_v62  ;;  %931 = vmatpush.msrb.mxu2 %v3932_v63 }
 0x1e0   :  { %948 = vmatpush.msrb.mxu3 %v3936_v46  ;;  %892 = vmatpush.msrb.mxu0 %v3940_v61 }
 0x1e1   :  { %909 = vmatpush.msrb.mxu1 %v3942_v43  ;;  %932 = vmatpush.msrb.mxu2 %v3944_v0 }
 0x1e2   :  { %949 = vmatpush.msrb.mxu3 %v3948_v1  ;;  %893 = vmatpush.msrb.mxu0 %v3952_v2  ;;  %v577_v2 = vld [vmem:[#allocation2 + $0x48] sm:$0xff] }
 0x1e3   :  { %910 = vmatpush.msrb.mxu1 %v3954_v3  ;;  %933 = vmatpush.msrb.mxu2 %v3956_v4 }
 0x1e4   :  { %950 = vmatpush.msrb.mxu3 %v3960_v5  ;;  %894 = vmatpush.msrb.mxu0 %v3964_v6 }
 0x1e5   :  { %911 = vmatpush.msrb.mxu1 %v3966_v7  ;;  %934 = vmatpush.msrb.mxu2 %v3968_v8 }
 0x1e6   :  { %951 = vmatpush.msrb.mxu3 %v3972_v9  ;;  %895 = vmatpush.msrb.mxu0 %v3976_v10 }
 0x1e7   :  { %912 = vmatpush.msrb.mxu1 %v3978_v11  ;;  %935 = vmatpush.msrb.mxu2 %v3982_v12 }
 0x1e8   :  { %952 = vmatpush.msrb.mxu3 %v3984_v13  ;;  %896 = vmatpush.msrb.mxu0 %v3988_v14 }
 0x1e9   :  { %913 = vmatpush.msrb.mxu1 %v3990_v15  ;;  %936 = vmatpush.msrb.mxu2 %v3992_v16 }
 0x1ea   :  { %953 = vmatpush.msrb.mxu3 %v3996_v17  ;;  %897 = vmatpush.msrb.mxu0 %v4000_v18 }
 0x1eb   :  { %914 = vmatpush.msrb.mxu1 %v4002_v19  ;;  %937 = vmatpush.msrb.mxu2 %v4004_v20 }
 0x1ec   :  { %954 = vmatpush.msrb.mxu3 %v4008_v21  ;;  %898 = vmatpush.msrb.mxu0 %v4012_v22 }
 0x1ed   :  { %915 = vmatpush.msrb.mxu1 %v4014_v23  ;;  %938 = vmatpush.msrb.mxu2 %v4016_v34 }
 0x1ee   :  { %955 = vmatpush.msrb.mxu3 %v4020_v35  ;;  %899 = vmatpush.msrb.mxu0 %v4024_v36 }
 0x1ef   :  { %916 = vmatpush.msrb.mxu1 %v4026_v37  ;;  %939 = vmatpush.msrb.mxu2 %v4028_v38 }
 0x1f0   :  { %956 = vmatpush.msrb.mxu3 %v4032_v39 }
 0x1f1   :  { %917 = vmatpush.msrb.mxu1 %v4036_v40 }
 0x1f2   :  { %957 = vmatpush.msrb.mxu3 %v4038_v41 }
 0x1f3   :  { %918 = vmatpush.msrb.mxu1 %v4040_v42 }
 0x1f4   :  { %958 = vmatpush.msrb.mxu3 %v4043_v44 }
 0x1f5   :  { %919 = vmatpush.msrb.mxu1 %v4047_v45 }
 0x1f6   :  { %959 = vmatpush.msrb.mxu3 %v4051_v47 }
 0x24c   :  { %v595_v56 = vpop.f32.mrf.mxu0 }
 0x24d   :  { %v596_v63 = vadd.f32 %v595_v56, %v576_v54 }
 0x252   :  { %v615_v61 = vpop.f32.mrf.mxu1  ;;  %v635_v3 = vpop.f32.mrf.mxu2 }
 0x253   :  { %v616_v0 = vadd.f32 %v615_v61, %v596_v63  ;;  %v636_v54 = vadd.f32 %v635_v3, %v577_v2  ;;  %v5564_v2 = vld [vmem:[#allocation14_spill] sm:$0xff]  ;;  %v5565_v3 = vld [vmem:[#allocation13_spill] sm:$0xff] }
 0x255   :  { %3302 = vtanh.f32 %v616_v0 }
 0x258   :  { %v655_v56 = vpop.f32.mrf.mxu3 }
 0x259   :  { %v656_v63 = vadd.f32 %v655_v56, %v636_v54  ;;  %v5566_v54 = vld [vmem:[#allocation11_spill] sm:$0xff]  ;;  %v5567_v56 = vld [vmem:[#allocation18_spill] sm:$0xff] }
 0x25b   :  { %v3303_v61 = vpop.eup %3302  ;;  %3304 = vtanh.f32 %v656_v63  ;;  %v5568_v63 = vld [vmem:[#allocation17_spill] sm:$0xff] }
 0x25c   :  { %747 = vmatmul.f32.vlgmr.msra.gmra.mxu0 %v3303_v61  ;;  %787 = vmatmul.f32.vlgmr.msra.gmra.mxu2 %v3303_v61  ;;  %v5569_v61 = vld [vmem:[#allocation12_spill] sm:$0xff] }
 0x25d   :  { %1037 = vmatpush.msra.mxu0 %v3862_v24  ;;  %1077 = vmatpush.msra.mxu2 %v3864_v25 }
 0x25f   :  { %1038 = vmatpush.msra.mxu0 %v3866_v26  ;;  %1078 = vmatpush.msra.mxu2 %v3870_v27 }
 0x261   :  { %v3305_v0 = vpop.eup %3304  ;;  %1039 = vmatpush.msra.mxu0 %v3872_v28  ;;  %1079 = vmatpush.msra.mxu2 %v3874_v29 }
 0x262   :  { %767 = vmatmul.f32.vlgmr.msra.gmra.mxu1 %v3305_v0  ;;  %807 = vmatmul.f32.vlgmr.msra.gmra.mxu3 %v3305_v0  ;;  %v5570_v0 = vld [vmem:[#allocation16_spill] sm:$0xff] }
 0x263   :  { %1057 = vmatpush.msra.mxu1 %v3876_v30  ;;  %1097 = vmatpush.msra.mxu3 %v3880_v31 }
 0x264   :  { %1040 = vmatpush.msra.mxu0 %v3882_v32  ;;  %1080 = vmatpush.msra.mxu2 %v3885_v33 }
 0x265   :  { %1058 = vmatpush.msra.mxu1 %v3894_v49  ;;  %1098 = vmatpush.msra.mxu3 %v3900_v51 }
 0x266   :  { %1041 = vmatpush.msra.mxu0 %v3892_v48  ;;  %1081 = vmatpush.msra.mxu2 %v3896_v50 }
 0x267   :  { %1059 = vmatpush.msra.mxu1 %v3906_v53  ;;  %1099 = vmatpush.msra.mxu3 %v3912_v55 }
 0x268   :  { %1042 = vmatpush.msra.mxu0 %v3904_v52  ;;  %1082 = vmatpush.msra.mxu2 %v5564_v2 }
 0x269   :  { %1060 = vmatpush.msra.mxu1 %v3918_v57  ;;  %1100 = vmatpush.msra.mxu3 %v3924_v59 }
 0x26a   :  { %1043 = vmatpush.msra.mxu0 %v5565_v3  ;;  %1083 = vmatpush.msra.mxu2 %v3920_v58 }
 0x26b   :  { %1061 = vmatpush.msra.mxu1 %v3930_v62  ;;  %1101 = vmatpush.msra.mxu3 %v3936_v46 }
 0x26c   :  { %1044 = vmatpush.msra.mxu0 %v3928_v60  ;;  %1084 = vmatpush.msra.mxu2 %v5566_v54 }
 0x26d   :  { %1062 = vmatpush.msra.mxu1 %v3942_v43  ;;  %1102 = vmatpush.msra.mxu3 %v3948_v1 }
 0x26e   :  { %1045 = vmatpush.msra.mxu0 %v5567_v56  ;;  %1085 = vmatpush.msra.mxu2 %v5568_v63 }
 0x26f   :  { %1063 = vmatpush.msra.mxu1 %v5569_v61  ;;  %1103 = vmatpush.msra.mxu3 %v3960_v5 }
 0x270   :  { %1046 = vmatpush.msra.mxu0 %v5570_v0  ;;  %1086 = vmatpush.msra.mxu2 %v3956_v4 }
 0x271   :  { %1064 = vmatpush.msra.mxu1 %v3966_v7  ;;  %1104 = vmatpush.msra.mxu3 %v3972_v9 }
 0x272   :  { %1047 = vmatpush.msra.mxu0 %v3964_v6  ;;  %1087 = vmatpush.msra.mxu2 %v3968_v8 }
 0x273   :  { %1065 = vmatpush.msra.mxu1 %v3978_v11  ;;  %1105 = vmatpush.msra.mxu3 %v3984_v13 }
 0x274   :  { %1048 = vmatpush.msra.mxu0 %v3976_v10  ;;  %1088 = vmatpush.msra.mxu2 %v3982_v12 }
 0x275   :  { %1066 = vmatpush.msra.mxu1 %v3990_v15  ;;  %1106 = vmatpush.msra.mxu3 %v3996_v17 }
 0x276   :  { %1049 = vmatpush.msra.mxu0 %v3988_v14  ;;  %1089 = vmatpush.msra.mxu2 %v3992_v16 }
 0x277   :  { %1067 = vmatpush.msra.mxu1 %v4002_v19  ;;  %1107 = vmatpush.msra.mxu3 %v4008_v21 }
 0x278   :  { %1050 = vmatpush.msra.mxu0 %v4000_v18  ;;  %1090 = vmatpush.msra.mxu2 %v4004_v20 }
 0x279   :  { %1068 = vmatpush.msra.mxu1 %v4014_v23  ;;  %1108 = vmatpush.msra.mxu3 %v4020_v35  ;;  %v729_v35 = vld [vmem:[#allocation2 + $0x50] sm:$0xff] }
 0x27a   :  { %1051 = vmatpush.msra.mxu0 %v4012_v22  ;;  %1091 = vmatpush.msra.mxu2 %v4016_v34 }
 0x27b   :  { %1069 = vmatpush.msra.mxu1 %v4026_v37  ;;  %1109 = vmatpush.msra.mxu3 %v4032_v39 }
 0x27c   :  { %1052 = vmatpush.msra.mxu0 %v4024_v36  ;;  %1092 = vmatpush.msra.mxu2 %v4028_v38  ;;  %v730_v36 = vld [vmem:[#allocation2 + $0x58] sm:$0xff] }
 0x27d   :  { %1070 = vmatpush.msra.mxu1 %v4036_v40  ;;  %1110 = vmatpush.msra.mxu3 %v4038_v41 }
 0x27f   :  { %1071 = vmatpush.msra.mxu1 %v4040_v42  ;;  %1111 = vmatpush.msra.mxu3 %v4043_v44 }
 0x281   :  { %1072 = vmatpush.msra.mxu1 %v4047_v45  ;;  %1112 = vmatpush.msra.mxu3 %v4051_v47 }
 0x2d9   :  { %v748_v37 = vpop.f32.mrf.mxu0 }
 0x2da   :  { %v749_v34 = vadd.f32 %v748_v37, %v729_v35  ;;  %v4280_v37 = vld [vmem:[#allocation5 + $0xb8] sm:$0xff] }
 0x2df   :  { %v768_v39 = vpop.f32.mrf.mxu1  ;;  %v788_v22 = vpop.f32.mrf.mxu2 }
 0x2e0   :  { %v769_v23 = vadd.f32 %v768_v39, %v749_v34  ;;  %v789_v38 = vadd.f32 %v788_v22, %v730_v36  ;;  %v4276_v34 = vld [vmem:[#allocation5 + $0xb0] sm:$0xff]  ;;  %v4278_v36 = vld [vmem:[#allocation5 + $0x1e0] sm:$0xff] }
 0x2e1   :  { %v4288_v39 = vld [vmem:[#allocation5 + $0xa0] sm:$0xff] }
 0x2e2   :  { %3306 = vtanh.f32 %v769_v23 }
 0x2e5   :  { %v808_v40 = vpop.f32.mrf.mxu3 }
 0x2e6   :  { %v809_v21 = vadd.f32 %v808_v40, %v789_v38  ;;  %v4284_v38 = vld [vmem:[#allocation5 + $0x1e8] sm:$0xff]  ;;  %v4290_v40 = vld [vmem:[#allocation5 + $0x1d0] sm:$0xff] }
 0x2e8   :  { %v3307_v41 = vpop.eup %3306  ;;  %3308 = vtanh.f32 %v809_v21 }
 0x2e9   :  { %900 = vmatmul.f32.vlgmr.msrb.gmra.mxu0 %v3307_v41  ;;  %940 = vmatmul.f32.vlgmr.msrb.gmra.mxu2 %v3307_v41  ;;  %v4292_v41 = vld [vmem:[#allocation5 + $0xa8] sm:$0xff] }
 0x2ea   :  { %1190 = vmatpush.msrb.mxu0 %v3862_v24  ;;  %1230 = vmatpush.msrb.mxu2 %v3864_v25  ;;  %v5571_v24 = vld [vmem:[#allocation22_spill] sm:$0xff]  ;;  %v5572_v25 = vld [vmem:[#allocation20_spill] sm:$0xff]  ;;  %5582 = vst [vmem:[#allocation14_spill] sm:$0xff] %v4292_v41 }
 0x2ec   :  { %1191 = vmatpush.msrb.mxu0 %v3866_v26  ;;  %1231 = vmatpush.msrb.mxu2 %v3870_v27  ;;  %v5573_v26 = vld [vmem:[#allocation19_spill] sm:$0xff] }
 0x2ed   :  { %v5574_v27 = vld [vmem:[#allocation15_spill] sm:$0xff] }
 0x2ee   :  { %v3309_v35 = vpop.eup %3308  ;;  %1192 = vmatpush.msrb.mxu0 %v3872_v28  ;;  %1232 = vmatpush.msrb.mxu2 %v3874_v29  ;;  %v5575_v28 = vld [vmem:[#allocation21_spill] sm:$0xff]  ;;  %v5576_v29 = vld [vmem:[#allocation23_spill] sm:$0xff] }
 0x2ef   :  { %920 = vmatmul.f32.vlgmr.msrb.gmra.mxu1 %v3309_v35  ;;  %960 = vmatmul.f32.vlgmr.msrb.gmra.mxu3 %v3309_v35  ;;  %v4328_v35 = vld [vmem:[#allocation5 + $0x78] sm:$0xff] }
 0x2f0   :  { %1193 = vmatpush.msrb.mxu0 %v3882_v32  ;;  %1210 = vmatpush.msrb.mxu1 %v3876_v30  ;;  %v5577_v30 = vld [vmem:[#allocation24_spill] sm:$0xff]  ;;  %v5579_v32 = vld [vmem:[#allocation26_spill] sm:$0xff]  ;;  %5586 = vst [vmem:[#allocation17_spill] sm:$0xff] %v4328_v35 }
 0x2f1   :  { %1233 = vmatpush.msrb.mxu2 %v3885_v33  ;;  %1250 = vmatpush.msrb.mxu3 %v3880_v31  ;;  %v5578_v31 = vld [vmem:[#allocation25_spill] sm:$0xff]  ;;  %v5580_v33 = vld [vmem:[#allocation27_spill] sm:$0xff] }
 0x2f2   :  { %1194 = vmatpush.msrb.mxu0 %v3892_v48  ;;  %1211 = vmatpush.msrb.mxu1 %v3894_v49  ;;  %v5581_v48 = vld [vmem:[#allocation28_spill] sm:$0xff]  ;;  %v882_v49 = vld [vmem:[#allocation2 + $0x60] sm:$0xff] }
 0x2f3   :  { %1234 = vmatpush.msrb.mxu2 %v3896_v50  ;;  %1251 = vmatpush.msrb.mxu3 %v3900_v51 }
 0x2f4   :  { %1195 = vmatpush.msrb.mxu0 %v3904_v52  ;;  %1212 = vmatpush.msrb.mxu1 %v3906_v53 }
 0x2f5   :  { %1235 = vmatpush.msrb.mxu2 %v5564_v2  ;;  %1252 = vmatpush.msrb.mxu3 %v3912_v55  ;;  %v883_v55 = vld [vmem:[#allocation2 + $0x68] sm:$0xff] }
 0x2f6   :  { %1196 = vmatpush.msrb.mxu0 %v5565_v3  ;;  %1213 = vmatpush.msrb.mxu1 %v3918_v57  ;;  %v4308_v2 = vld [vmem:[#allocation5 + $0x1c8] sm:$0xff]  ;;  %v4312_v3 = vld [vmem:[#allocation5 + $0x80] sm:$0xff] }
 0x2f7   :  { %1236 = vmatpush.msrb.mxu2 %v3920_v58  ;;  %1253 = vmatpush.msrb.mxu3 %v3924_v59 }
 0x2f8   :  { %1197 = vmatpush.msrb.mxu0 %v3928_v60  ;;  %1214 = vmatpush.msrb.mxu1 %v3930_v62 }
 0x2f9   :  { %1237 = vmatpush.msrb.mxu2 %v5566_v54  ;;  %1254 = vmatpush.msrb.mxu3 %v3936_v46  ;;  %v4314_v54 = vld [vmem:[#allocation5 + $0x1b0] sm:$0xff] }
 0x2fa   :  { %1198 = vmatpush.msrb.mxu0 %v5567_v56  ;;  %1215 = vmatpush.msrb.mxu1 %v3942_v43  ;;  %v4246_v43 = vld [vmem:[#allocation5 + $0xf0] sm:$0xff]  ;;  %v4316_v56 = vld [vmem:[#allocation5 + $0x88] sm:$0xff] }
 0x2fb   :  { %1238 = vmatpush.msrb.mxu2 %v5568_v63  ;;  %1255 = vmatpush.msrb.mxu3 %v3948_v1  ;;  %v4248_v1 = vld [vmem:[#allocation5 + $0xf8] sm:$0xff]  ;;  %5584 = vst [vmem:[#allocation11_spill] sm:$0xff] %v4316_v56 }
 0x2fc   :  { %1199 = vmatpush.msrb.mxu0 %v5570_v0  ;;  %1216 = vmatpush.msrb.mxu1 %v5569_v61  ;;  %v4320_v63 = vld [vmem:[#allocation5 + $0x1b8] sm:$0xff]  ;;  %v4324_v61 = vld [vmem:[#allocation5 + $0x70] sm:$0xff]  ;;  %v4326_v0 = vld [vmem:[#allocation5 + $0x1a0] sm:$0xff] }
 0x2fd   :  { %1239 = vmatpush.msrb.mxu2 %v3956_v4  ;;  %1256 = vmatpush.msrb.mxu3 %v3960_v5  ;;  %v4250_v4 = vld [vmem:[#allocation5 + $0xe0] sm:$0xff]  ;;  %v4254_v5 = vld [vmem:[#allocation5 + $0xe8] sm:$0xff]  ;;  %5585 = vst [vmem:[#allocation18_spill] sm:$0xff] %v4324_v61 }
 0x2fe   :  { %1200 = vmatpush.msrb.mxu0 %v3964_v6  ;;  %1217 = vmatpush.msrb.mxu1 %v3966_v7  ;;  %v4256_v6 = vld [vmem:[#allocation5 + $0xd0] sm:$0xff]  ;;  %v4258_v7 = vld [vmem:[#allocation5 + $0xd8] sm:$0xff] }
 0x2ff   :  { %1240 = vmatpush.msrb.mxu2 %v3968_v8  ;;  %1257 = vmatpush.msrb.mxu3 %v3972_v9  ;;  %v4260_v8 = vld [vmem:[#allocation5 + $0x1f0] sm:$0xff]  ;;  %v4264_v9 = vld [vmem:[#allocation5 + $0x1f8] sm:$0xff] }
 0x300   :  { %1201 = vmatpush.msrb.mxu0 %v3976_v10  ;;  %1218 = vmatpush.msrb.mxu1 %v3978_v11  ;;  %v4266_v10 = vld [vmem:[#allocation5 + $0xc0] sm:$0xff]  ;;  %v4269_v11 = vld [vmem:[#allocation5 + $0xc8] sm:$0xff] }
 0x301   :  { %1241 = vmatpush.msrb.mxu2 %v3982_v12  ;;  %1258 = vmatpush.msrb.mxu3 %v3984_v13  ;;  %v1035_v12 = vld [vmem:[#allocation2 + $0x70] sm:$0xff] }
 0x302   :  { %1202 = vmatpush.msrb.mxu0 %v3988_v14  ;;  %1219 = vmatpush.msrb.mxu1 %v3990_v15 }
 0x303   :  { %1242 = vmatpush.msrb.mxu2 %v3992_v16  ;;  %1259 = vmatpush.msrb.mxu3 %v3996_v17  ;;  %v1036_v17 = vld [vmem:[#allocation2 + $0x78] sm:$0xff] }
 0x304   :  { %1203 = vmatpush.msrb.mxu0 %v4000_v18  ;;  %1220 = vmatpush.msrb.mxu1 %v4002_v19 }
 0x305   :  { %1243 = vmatpush.msrb.mxu2 %v4004_v20  ;;  %1260 = vmatpush.msrb.mxu3 %v5571_v24  ;;  %v4332_v24 = vld [vmem:[#allocation5 + $0x1a8] sm:$0xff] }
 0x306   :  { %1204 = vmatpush.msrb.mxu0 %v5572_v25  ;;  %1221 = vmatpush.msrb.mxu1 %v5573_v26  ;;  %v4336_v25 = vld [vmem:[#allocation5 + $0x60] sm:$0xff]  ;;  %v4338_v26 = vld [vmem:[#allocation5 + $0x190] sm:$0xff] }
 0x307   :  { %1244 = vmatpush.msrb.mxu2 %v5574_v27  ;;  %1261 = vmatpush.msrb.mxu3 %v5575_v28  ;;  %5587 = vst [vmem:[#allocation12_spill] sm:$0xff] %v4336_v25  ;;  %v4340_v27 = vld [vmem:[#allocation5 + $0x68] sm:$0xff]  ;;  %v4344_v28 = vld [vmem:[#allocation5 + $0x198] sm:$0xff] }
 0x308   :  { %1205 = vmatpush.msrb.mxu0 %v5576_v29  ;;  %1222 = vmatpush.msrb.mxu1 %v5577_v30  ;;  %5588 = vst [vmem:[#allocation16_spill] sm:$0xff] %v4338_v26  ;;  %v4348_v29 = vld [vmem:[#allocation5 + $0x50] sm:$0xff]  ;;  %v4350_v30 = vld [vmem:[#allocation5 + $0x180] sm:$0xff] }
 0x309   :  { %1245 = vmatpush.msrb.mxu2 %v5578_v31  ;;  %1262 = vmatpush.msrb.mxu3 %v5579_v32  ;;  %v4352_v31 = vld [vmem:[#allocation5 + $0x58] sm:$0xff]  ;;  %v4356_v32 = vld [vmem:[#allocation5 + $0x188] sm:$0xff] }
 0x30a   :  { %1223 = vmatpush.msrb.mxu1 %v5580_v33  ;;  %v4360_v33 = vld [vmem:[#allocation5 + $0x40] sm:$0xff] }
 0x30b   :  { %1263 = vmatpush.msrb.mxu3 %v5581_v48  ;;  %v4362_v48 = vld [vmem:[#allocation5 + $0x170] sm:$0xff] }
 0x30c   :  { %1224 = vmatpush.msrb.mxu1 %v4040_v42  ;;  %v4296_v42 = vld [vmem:[#allocation5 + $0x1d8] sm:$0xff] }
 0x30d   :  { %1264 = vmatpush.msrb.mxu3 %v4043_v44  ;;  %v4300_v44 = vld [vmem:[#allocation5 + $0x90] sm:$0xff] }
 0x30e   :  { %1225 = vmatpush.msrb.mxu1 %v4047_v45  ;;  %5583 = vst [vmem:[#allocation13_spill] sm:$0xff] %v4300_v44  ;;  %v4302_v45 = vld [vmem:[#allocation5 + $0x1c0] sm:$0xff] }
 0x30f   :  { %1265 = vmatpush.msrb.mxu3 %v4051_v47  ;;  %v4304_v47 = vld [vmem:[#allocation5 + $0x98] sm:$0xff] }
 0x366   :  { %v901_v50 = vpop.f32.mrf.mxu0 }
 0x367   :  { %v902_v51 = vadd.f32 %v901_v50, %v882_v49  ;;  %v4366_v49 = vld [vmem:[#allocation5 + $0x48] sm:$0xff]  ;;  %v4368_v50 = vld [vmem:[#allocation5 + $0x178] sm:$0xff] }
 0x36c   :  { %v921_v52 = vpop.f32.mrf.mxu1  ;;  %v941_v57 = vpop.f32.mrf.mxu2 }
 0x36d   :  { %v922_v53 = vadd.f32 %v921_v52, %v902_v51  ;;  %v942_v58 = vadd.f32 %v941_v57, %v883_v55  ;;  %v4372_v51 = vld [vmem:[#allocation5 + $0x30] sm:$0xff]  ;;  %v4374_v52 = vld [vmem:[#allocation5 + $0x160] sm:$0xff]  ;;  %v4380_v55 = vld [vmem:[#allocation5 + $0x168] sm:$0xff] }
 0x36e   :  { %v4384_v57 = vld [vmem:[#allocation5 + $0x20] sm:$0xff] }
 0x36f   :  { %3310 = vtanh.f32 %v922_v53  ;;  %v4376_v53 = vld [vmem:[#allocation5 + $0x38] sm:$0xff] }
 0x372   :  { %v961_v59 = vpop.f32.mrf.mxu3 }
 0x373   :  { %v962_v60 = vadd.f32 %v961_v59, %v942_v58  ;;  %v4386_v58 = vld [vmem:[#allocation5 + $0x150] sm:$0xff]  ;;  %v4388_v59 = vld [vmem:[#allocation5 + $0x28] sm:$0xff] }
 0x375   :  { %v3311_v62 = vpop.eup %3310  ;;  %3312 = vtanh.f32 %v962_v60  ;;  %v4392_v60 = vld [vmem:[#allocation5 + $0x158] sm:$0xff] }
 0x376   :  { %1053 = vmatmul.f32.vlgmr.msra.gmra.mxu0 %v3311_v62  ;;  %1093 = vmatmul.f32.vlgmr.msra.gmra.mxu2 %v3311_v62  ;;  %5589 = vst [vmem:[#allocation22_spill] sm:$0xff] %v4392_v60  ;;  %v4396_v62 = vld [vmem:[#allocation5 + $0x10] sm:$0xff] }
 0x377   :  { %1343 = vmatpush.msra.mxu0 %v4246_v43  ;;  %1383 = vmatpush.msra.mxu2 %v4248_v1  ;;  %5590 = vst [vmem:[#allocation20_spill] sm:$0xff] %v4396_v62 }
 0x379   :  { %1344 = vmatpush.msra.mxu0 %v4250_v4  ;;  %1384 = vmatpush.msra.mxu2 %v4254_v5 }
 0x37b   :  { %v3313_v46 = vpop.eup %3312  ;;  %1345 = vmatpush.msra.mxu0 %v4256_v6  ;;  %1385 = vmatpush.msra.mxu2 %v4258_v7 }
 0x37c   :  { %1073 = vmatmul.f32.vlgmr.msra.gmra.mxu1 %v3313_v46  ;;  %1113 = vmatmul.f32.vlgmr.msra.gmra.mxu3 %v3313_v46  ;;  %v4398_v46 = vld [vmem:[#allocation5 + $0x140] sm:$0xff] }
 0x37d   :  { %1363 = vmatpush.msra.mxu1 %v4260_v8  ;;  %1403 = vmatpush.msra.mxu3 %v4264_v9  ;;  %5591 = vst [vmem:[#allocation19_spill] sm:$0xff] %v4398_v46 }
 0x37e   :  { %1346 = vmatpush.msra.mxu0 %v4266_v10  ;;  %1386 = vmatpush.msra.mxu2 %v4269_v11 }
 0x37f   :  { %1364 = vmatpush.msra.mxu1 %v4278_v36  ;;  %1404 = vmatpush.msra.mxu3 %v4284_v38 }
 0x380   :  { %1347 = vmatpush.msra.mxu0 %v4276_v34  ;;  %1387 = vmatpush.msra.mxu2 %v4280_v37 }
 0x381   :  { %1365 = vmatpush.msra.mxu1 %v4290_v40  ;;  %1405 = vmatpush.msra.mxu3 %v4296_v42 }
 0x382   :  { %1348 = vmatpush.msra.mxu0 %v4288_v39  ;;  %1388 = vmatpush.msra.mxu2 %v4292_v41 }
 0x383   :  { %1366 = vmatpush.msra.mxu1 %v4302_v45  ;;  %1406 = vmatpush.msra.mxu3 %v4308_v2 }
 0x384   :  { %1349 = vmatpush.msra.mxu0 %v4300_v44  ;;  %1389 = vmatpush.msra.mxu2 %v4304_v47 }
 0x385   :  { %1367 = vmatpush.msra.mxu1 %v4314_v54  ;;  %1407 = vmatpush.msra.mxu3 %v4320_v63 }
 0x386   :  { %1350 = vmatpush.msra.mxu0 %v4312_v3  ;;  %1390 = vmatpush.msra.mxu2 %v4316_v56 }
 0x387   :  { %1368 = vmatpush.msra.mxu1 %v4326_v0  ;;  %1408 = vmatpush.msra.mxu3 %v4332_v24 }
 0x388   :  { %1351 = vmatpush.msra.mxu0 %v4324_v61  ;;  %1391 = vmatpush.msra.mxu2 %v4328_v35 }
 0x389   :  { %1369 = vmatpush.msra.mxu1 %v4338_v26  ;;  %1409 = vmatpush.msra.mxu3 %v4344_v28 }
 0x38a   :  { %1352 = vmatpush.msra.mxu0 %v4336_v25  ;;  %1392 = vmatpush.msra.mxu2 %v4340_v27 }
 0x38b   :  { %1370 = vmatpush.msra.mxu1 %v4350_v30  ;;  %1410 = vmatpush.msra.mxu3 %v4356_v32 }
 0x38c   :  { %1353 = vmatpush.msra.mxu0 %v4348_v29  ;;  %1393 = vmatpush.msra.mxu2 %v4352_v31 }
 0x38d   :  { %1371 = vmatpush.msra.mxu1 %v4362_v48  ;;  %1411 = vmatpush.msra.mxu3 %v4368_v50 }
 0x38e   :  { %1354 = vmatpush.msra.mxu0 %v4360_v33  ;;  %1394 = vmatpush.msra.mxu2 %v4366_v49 }
 0x38f   :  { %1372 = vmatpush.msra.mxu1 %v4374_v52  ;;  %1412 = vmatpush.msra.mxu3 %v4380_v55 }
 0x390   :  { %1355 = vmatpush.msra.mxu0 %v4372_v51  ;;  %1395 = vmatpush.msra.mxu2 %v4376_v53 }
 0x391   :  { %1373 = vmatpush.msra.mxu1 %v4386_v58  ;;  %1413 = vmatpush.msra.mxu3 %v4392_v60 }
 0x392   :  { %1356 = vmatpush.msra.mxu0 %v4384_v57  ;;  %1396 = vmatpush.msra.mxu2 %v4388_v59 }
 0x393   :  { %1374 = vmatpush.msra.mxu1 %v4398_v46 }
 0x394   :  { %1357 = vmatpush.msra.mxu0 %v4396_v62 }
 0x3f3   :  { %v1054_v13 = vpop.f32.mrf.mxu0 }
 0x3f4   :  { %v1055_v14 = vadd.f32 %v1054_v13, %v1035_v12  ;;  %v4400_v12 = vld [vmem:[#allocation5 + $0x18] sm:$0xff]  ;;  %v4404_v13 = vld [vmem:[#allocation5 + $0x148] sm:$0xff] }
 0x3f5   :  { %5592 = vst [vmem:[#allocation15_spill] sm:$0xff] %v4400_v12  ;;  %1397 = vmatpush.msra.mxu2 %v4400_v12  ;;  %1414 = vmatpush.msra.mxu3 %v4404_v13 }
 0x3f6   :  { %5593 = vst [vmem:[#allocation21_spill] sm:$0xff] %v4404_v13 }
 0x3f9   :  { %v1074_v15 = vpop.f32.mrf.mxu1  ;;  %v1094_v18 = vpop.f32.mrf.mxu2 }
 0x3fa   :  { %v1075_v16 = vadd.f32 %v1074_v15, %v1055_v14  ;;  %v1095_v19 = vadd.f32 %v1094_v18, %v1036_v17  ;;  %v4408_v14 = vld [vmem:[#allocation5] sm:$0xff]  ;;  %v4410_v15 = vld [vmem:[#allocation5 + $0x130] sm:$0xff]  ;;  %v4416_v17 = vld [vmem:[#allocation5 + $0x138] sm:$0xff] }
 0x3fb   :  { %5594 = vst [vmem:[#allocation23_spill] sm:$0xff] %v4408_v14  ;;  %1358 = vmatpush.msra.mxu0 %v4408_v14  ;;  %1375 = vmatpush.msra.mxu1 %v4410_v15  ;;  %v4420_v18 = vld [vmem:[#allocation5 + $0x120] sm:$0xff] }
 0x3fc   :  { %3314 = vtanh.f32 %v1075_v16  ;;  %5595 = vst [vmem:[#allocation24_spill] sm:$0xff] %v4410_v15  ;;  %v4412_v16 = vld [vmem:[#allocation5 + $0x8] sm:$0xff]  ;;  %1415 = vmatpush.msra.mxu3 %v4416_v17 }
 0x3fd   :  { %5596 = vst [vmem:[#allocation25_spill] sm:$0xff] %v4412_v16  ;;  %1398 = vmatpush.msra.mxu2 %v4412_v16  ;;  %1376 = vmatpush.msra.mxu1 %v4420_v18 }
 0x3fe   :  { %5597 = vst [vmem:[#allocation26_spill] sm:$0xff] %v4416_v17 }
 0x3ff   :  { %v1114_v20 = vpop.f32.mrf.mxu3  ;;  %5598 = vst [vmem:[#allocation27_spill] sm:$0xff] %v4420_v18 }
 0x400   :  { %v1115_v21 = vadd.f32 %v1114_v20, %v1095_v19  ;;  %v4422_v19 = vld [vmem:[#allocation5 + $0x128] sm:$0xff]  ;;  %v4424_v20 = vld [vmem:[#allocation5 + $0x110] sm:$0xff] }
 0x401   :  { %5599 = vst [vmem:[#allocation28_spill] sm:$0xff] %v4422_v19  ;;  %1416 = vmatpush.msra.mxu3 %v4422_v19  ;;  %1377 = vmatpush.msra.mxu1 %v4424_v20 }
 0x402   :  { %v3315_v22 = vpop.eup %3314  ;;  %3316 = vtanh.f32 %v1115_v21  ;;  %v4427_v21 = vld [vmem:[#allocation5 + $0x118] sm:$0xff] }
 0x403   :  { %1206 = vmatmul.f32.vlgmr.msrb.gmra.mxu0 %v3315_v22  ;;  %1246 = vmatmul.f32.vlgmr.msrb.gmra.mxu2 %v3315_v22  ;;  %v4431_v22 = vld [vmem:[#allocation5 + $0x100] sm:$0xff] }
 0x404   :  { %1496 = vmatpush.msrb.mxu0 %v4246_v43  ;;  %1536 = vmatpush.msrb.mxu2 %v4248_v1 }
 0x405   :  { %1417 = vmatpush.msra.mxu3 %v4427_v21  ;;  %1378 = vmatpush.msra.mxu1 %v4431_v22 }
 0x406   :  { %1497 = vmatpush.msrb.mxu0 %v4250_v4  ;;  %1537 = vmatpush.msrb.mxu2 %v4254_v5 }
 0x408   :  { %v3317_v23 = vpop.eup %3316  ;;  %1498 = vmatpush.msrb.mxu0 %v4256_v6  ;;  %1538 = vmatpush.msrb.mxu2 %v4258_v7 }
 0x409   :  { %1226 = vmatmul.f32.vlgmr.msrb.gmra.mxu1 %v3317_v23  ;;  %1266 = vmatmul.f32.vlgmr.msrb.gmra.mxu3 %v3317_v23  ;;  %v4435_v23 = vld [vmem:[#allocation5 + $0x108] sm:$0xff] }
 0x40a   :  { %1418 = vmatpush.msra.mxu3 %v4435_v23  ;;  %1499 = vmatpush.msrb.mxu0 %v4266_v10 }
 0x40b   :  { %1516 = vmatpush.msrb.mxu1 %v4260_v8  ;;  %1539 = vmatpush.msrb.mxu2 %v4269_v11 }
 0x40c   :  { %1556 = vmatpush.msrb.mxu3 %v4264_v9  ;;  %1500 = vmatpush.msrb.mxu0 %v4276_v34 }
 0x40d   :  { %1517 = vmatpush.msrb.mxu1 %v4278_v36  ;;  %1540 = vmatpush.msrb.mxu2 %v4280_v37 }
 0x40e   :  { %1557 = vmatpush.msrb.mxu3 %v4284_v38  ;;  %1501 = vmatpush.msrb.mxu0 %v4288_v39 }
 0x40f   :  { %1518 = vmatpush.msrb.mxu1 %v4290_v40  ;;  %1541 = vmatpush.msrb.mxu2 %v4292_v41  ;;  %v1188_v41 = vld [vmem:[#allocation2 + $0x80] sm:$0xff] }
 0x410   :  { %1558 = vmatpush.msrb.mxu3 %v4296_v42  ;;  %1502 = vmatpush.msrb.mxu0 %v4300_v44 }
 0x411   :  { %1519 = vmatpush.msrb.mxu1 %v4302_v45  ;;  %1542 = vmatpush.msrb.mxu2 %v4304_v47 }
 0x412   :  { %1559 = vmatpush.msrb.mxu3 %v4308_v2  ;;  %1503 = vmatpush.msrb.mxu0 %v4312_v3 }
 0x413   :  { %1520 = vmatpush.msrb.mxu1 %v4314_v54  ;;  %1543 = vmatpush.msrb.mxu2 %v4316_v56 }
 0x414   :  { %1560 = vmatpush.msrb.mxu3 %v4320_v63  ;;  %1504 = vmatpush.msrb.mxu0 %v4324_v61 }
 0x415   :  { %1521 = vmatpush.msrb.mxu1 %v4326_v0  ;;  %1544 = vmatpush.msrb.mxu2 %v4328_v35 }
 0x416   :  { %1561 = vmatpush.msrb.mxu3 %v4332_v24  ;;  %1505 = vmatpush.msrb.mxu0 %v4336_v25  ;;  %v1189_v25 = vld [vmem:[#allocation2 + $0x88] sm:$0xff] }
 0x417   :  { %1522 = vmatpush.msrb.mxu1 %v4338_v26  ;;  %1545 = vmatpush.msrb.mxu2 %v4340_v27 }
 0x418   :  { %1562 = vmatpush.msrb.mxu3 %v4344_v28  ;;  %1506 = vmatpush.msrb.mxu0 %v4348_v29 }
 0x419   :  { %1523 = vmatpush.msrb.mxu1 %v4350_v30  ;;  %1546 = vmatpush.msrb.mxu2 %v4352_v31 }
 0x41a   :  { %1563 = vmatpush.msrb.mxu3 %v4356_v32  ;;  %1507 = vmatpush.msrb.mxu0 %v4360_v33 }
 0x41b   :  { %1524 = vmatpush.msrb.mxu1 %v4362_v48  ;;  %1547 = vmatpush.msrb.mxu2 %v4366_v49 }
 0x41c   :  { %1564 = vmatpush.msrb.mxu3 %v4368_v50  ;;  %1508 = vmatpush.msrb.mxu0 %v4372_v51 }
 0x41d   :  { %1525 = vmatpush.msrb.mxu1 %v4374_v52  ;;  %1548 = vmatpush.msrb.mxu2 %v4376_v53 }
 0x41e   :  { %1565 = vmatpush.msrb.mxu3 %v4380_v55  ;;  %1509 = vmatpush.msrb.mxu0 %v4384_v57 }
 0x41f   :  { %1526 = vmatpush.msrb.mxu1 %v4386_v58  ;;  %1549 = vmatpush.msrb.mxu2 %v4388_v59 }
 0x420   :  { %1566 = vmatpush.msrb.mxu3 %v4392_v60  ;;  %1510 = vmatpush.msrb.mxu0 %v4396_v62 }
 0x421   :  { %1527 = vmatpush.msrb.mxu1 %v4398_v46  ;;  %1550 = vmatpush.msrb.mxu2 %v4400_v12 }
 0x422   :  { %1567 = vmatpush.msrb.mxu3 %v4404_v13  ;;  %1511 = vmatpush.msrb.mxu0 %v4408_v14 }
 0x423   :  { %1528 = vmatpush.msrb.mxu1 %v4410_v15  ;;  %1551 = vmatpush.msrb.mxu2 %v4412_v16 }
 0x424   :  { %1568 = vmatpush.msrb.mxu3 %v4416_v17 }
 0x425   :  { %1529 = vmatpush.msrb.mxu1 %v4420_v18 }
 0x426   :  { %1569 = vmatpush.msrb.mxu3 %v4422_v19 }
 0x427   :  { %1530 = vmatpush.msrb.mxu1 %v4424_v20 }
 0x428   :  { %1570 = vmatpush.msrb.mxu3 %v4427_v21 }
 0x429   :  { %1531 = vmatpush.msrb.mxu1 %v4431_v22 }
 0x42a   :  { %1571 = vmatpush.msrb.mxu3 %v4435_v23 }
 0x480   :  { %v1207_v44 = vpop.f32.mrf.mxu0 }
 0x481   :  { %v1208_v56 = vadd.f32 %v1207_v44, %v1188_v41 }
 0x486   :  { %v1227_v61 = vpop.f32.mrf.mxu1  ;;  %v1247_v26 = vpop.f32.mrf.mxu2 }
 0x487   :  { %v1228_v35 = vadd.f32 %v1227_v61, %v1208_v56  ;;  %v1248_v41 = vadd.f32 %v1247_v26, %v1189_v25  ;;  %v5600_v25 = vld [vmem:[#allocation14_spill] sm:$0xff]  ;;  %v5601_v26 = vld [vmem:[#allocation13_spill] sm:$0xff] }
 0x489   :  { %3318 = vtanh.f32 %v1228_v35 }
 0x48c   :  { %v1267_v44 = vpop.f32.mrf.mxu3 }
 0x48d   :  { %v1268_v56 = vadd.f32 %v1267_v44, %v1248_v41  ;;  %v5602_v41 = vld [vmem:[#allocation11_spill] sm:$0xff]  ;;  %v5603_v44 = vld [vmem:[#allocation18_spill] sm:$0xff] }
 0x48f   :  { %v3319_v61 = vpop.eup %3318  ;;  %3320 = vtanh.f32 %v1268_v56  ;;  %v5604_v56 = vld [vmem:[#allocation17_spill] sm:$0xff] }
 0x490   :  { %1359 = vmatmul.f32.vlgmr.msra.gmra.mxu0 %v3319_v61  ;;  %1399 = vmatmul.f32.vlgmr.msra.gmra.mxu2 %v3319_v61  ;;  %v5605_v61 = vld [vmem:[#allocation16_spill] sm:$0xff] }
 0x491   :  { %1649 = vmatpush.msra.mxu0 %v4246_v43  ;;  %1689 = vmatpush.msra.mxu2 %v4248_v1 }
 0x493   :  { %1650 = vmatpush.msra.mxu0 %v4250_v4  ;;  %1690 = vmatpush.msra.mxu2 %v4254_v5 }
 0x495   :  { %v3321_v35 = vpop.eup %3320  ;;  %1651 = vmatpush.msra.mxu0 %v4256_v6  ;;  %1691 = vmatpush.msra.mxu2 %v4258_v7 }
 0x496   :  { %1379 = vmatmul.f32.vlgmr.msra.gmra.mxu1 %v3321_v35  ;;  %1419 = vmatmul.f32.vlgmr.msra.gmra.mxu3 %v3321_v35  ;;  %v5606_v35 = vld [vmem:[#allocation12_spill] sm:$0xff] }
 0x497   :  { %1669 = vmatpush.msra.mxu1 %v4260_v8  ;;  %1709 = vmatpush.msra.mxu3 %v4264_v9 }
 0x498   :  { %1652 = vmatpush.msra.mxu0 %v4266_v10  ;;  %1692 = vmatpush.msra.mxu2 %v4269_v11 }
 0x499   :  { %1670 = vmatpush.msra.mxu1 %v4278_v36  ;;  %1710 = vmatpush.msra.mxu3 %v4284_v38 }
 0x49a   :  { %1653 = vmatpush.msra.mxu0 %v4276_v34  ;;  %1693 = vmatpush.msra.mxu2 %v4280_v37 }
 0x49b   :  { %1671 = vmatpush.msra.mxu1 %v4290_v40  ;;  %1711 = vmatpush.msra.mxu3 %v4296_v42 }
 0x49c   :  { %1654 = vmatpush.msra.mxu0 %v4288_v39  ;;  %1694 = vmatpush.msra.mxu2 %v5600_v25 }
 0x49d   :  { %1672 = vmatpush.msra.mxu1 %v4302_v45  ;;  %1712 = vmatpush.msra.mxu3 %v4308_v2 }
 0x49e   :  { %1655 = vmatpush.msra.mxu0 %v5601_v26  ;;  %1695 = vmatpush.msra.mxu2 %v4304_v47 }
 0x49f   :  { %1673 = vmatpush.msra.mxu1 %v4314_v54  ;;  %1713 = vmatpush.msra.mxu3 %v4320_v63 }
 0x4a0   :  { %1656 = vmatpush.msra.mxu0 %v4312_v3  ;;  %1696 = vmatpush.msra.mxu2 %v5602_v41 }
 0x4a1   :  { %1674 = vmatpush.msra.mxu1 %v4326_v0  ;;  %1714 = vmatpush.msra.mxu3 %v4332_v24 }
 0x4a2   :  { %1657 = vmatpush.msra.mxu0 %v5603_v44  ;;  %1697 = vmatpush.msra.mxu2 %v5604_v56 }
 0x4a3   :  { %1675 = vmatpush.msra.mxu1 %v5605_v61  ;;  %1715 = vmatpush.msra.mxu3 %v4344_v28 }
 0x4a4   :  { %1658 = vmatpush.msra.mxu0 %v5606_v35  ;;  %1698 = vmatpush.msra.mxu2 %v4340_v27 }
 0x4a5   :  { %1676 = vmatpush.msra.mxu1 %v4350_v30  ;;  %1716 = vmatpush.msra.mxu3 %v4356_v32 }
 0x4a6   :  { %1659 = vmatpush.msra.mxu0 %v4348_v29  ;;  %1699 = vmatpush.msra.mxu2 %v4352_v31 }
 0x4a7   :  { %1677 = vmatpush.msra.mxu1 %v4362_v48  ;;  %1717 = vmatpush.msra.mxu3 %v4368_v50 }
 0x4a8   :  { %1660 = vmatpush.msra.mxu0 %v4360_v33  ;;  %1700 = vmatpush.msra.mxu2 %v4366_v49 }
 0x4a9   :  { %1678 = vmatpush.msra.mxu1 %v4374_v52  ;;  %1718 = vmatpush.msra.mxu3 %v4380_v55 }
 0x4aa   :  { %1661 = vmatpush.msra.mxu0 %v4372_v51  ;;  %1701 = vmatpush.msra.mxu2 %v4376_v53 }
 0x4ab   :  { %1679 = vmatpush.msra.mxu1 %v4386_v58  ;;  %1719 = vmatpush.msra.mxu3 %v4392_v60 }
 0x4ac   :  { %1662 = vmatpush.msra.mxu0 %v4384_v57  ;;  %1702 = vmatpush.msra.mxu2 %v4388_v59 }
 0x4ad   :  { %1680 = vmatpush.msra.mxu1 %v4398_v46  ;;  %1720 = vmatpush.msra.mxu3 %v4404_v13  ;;  %v1341_v13 = vld [vmem:[#allocation2 + $0x90] sm:$0xff] }
 0x4ae   :  { %1663 = vmatpush.msra.mxu0 %v4396_v62  ;;  %1703 = vmatpush.msra.mxu2 %v4400_v12 }
 0x4af   :  { %1681 = vmatpush.msra.mxu1 %v4410_v15  ;;  %1721 = vmatpush.msra.mxu3 %v4416_v17 }
 0x4b0   :  { %1664 = vmatpush.msra.mxu0 %v4408_v14  ;;  %1704 = vmatpush.msra.mxu2 %v4412_v16  ;;  %v1342_v14 = vld [vmem:[#allocation2 + $0x98] sm:$0xff] }
 0x4b1   :  { %1682 = vmatpush.msra.mxu1 %v4420_v18  ;;  %1722 = vmatpush.msra.mxu3 %v4422_v19 }
 0x4b3   :  { %1683 = vmatpush.msra.mxu1 %v4424_v20  ;;  %1723 = vmatpush.msra.mxu3 %v4427_v21 }
 0x4b5   :  { %1684 = vmatpush.msra.mxu1 %v4431_v22  ;;  %1724 = vmatpush.msra.mxu3 %v4435_v23 }
 0x50d   :  { %v1360_v15 = vpop.f32.mrf.mxu0 }
 0x50e   :  { %v1361_v12 = vadd.f32 %v1360_v15, %v1341_v13  ;;  %v4664_v15 = vld [vmem:[#allocation5 + $0xb8] sm:$0xff] }
 0x513   :  { %v1380_v17 = vpop.f32.mrf.mxu1  ;;  %v1400_v62 = vpop.f32.mrf.mxu2 }
 0x514   :  { %v1381_v46 = vadd.f32 %v1380_v17, %v1361_v12  ;;  %v1401_v16 = vadd.f32 %v1400_v62, %v1342_v14  ;;  %v4660_v12 = vld [vmem:[#allocation5 + $0xb0] sm:$0xff]  ;;  %v4662_v14 = vld [vmem:[#allocation5 + $0x1e0] sm:$0xff] }
 0x515   :  { %v4672_v17 = vld [vmem:[#allocation5 + $0xa0] sm:$0xff] }
 0x516   :  { %3322 = vtanh.f32 %v1381_v46 }
 0x519   :  { %v1420_v18 = vpop.f32.mrf.mxu3 }
 0x51a   :  { %v1421_v60 = vadd.f32 %v1420_v18, %v1401_v16  ;;  %v4668_v16 = vld [vmem:[#allocation5 + $0x1e8] sm:$0xff]  ;;  %v4674_v18 = vld [vmem:[#allocation5 + $0x1d0] sm:$0xff] }
 0x51c   :  { %v3323_v19 = vpop.eup %3322  ;;  %3324 = vtanh.f32 %v1421_v60 }
 0x51d   :  { %1512 = vmatmul.f32.vlgmr.msrb.gmra.mxu0 %v3323_v19  ;;  %1552 = vmatmul.f32.vlgmr.msrb.gmra.mxu2 %v3323_v19  ;;  %v4676_v19 = vld [vmem:[#allocation5 + $0xa8] sm:$0xff] }
 0x51e   :  { %1802 = vmatpush.msrb.mxu0 %v4246_v43  ;;  %1842 = vmatpush.msrb.mxu2 %v4248_v1  ;;  %v5607_v43 = vld [vmem:[#allocation22_spill] sm:$0xff]  ;;  %v5608_v1 = vld [vmem:[#allocation20_spill] sm:$0xff]  ;;  %5618 = vst [vmem:[#allocation14_spill] sm:$0xff] %v4676_v19 }
 0x520   :  { %1803 = vmatpush.msrb.mxu0 %v4250_v4  ;;  %1843 = vmatpush.msrb.mxu2 %v4254_v5  ;;  %v5609_v4 = vld [vmem:[#allocation19_spill] sm:$0xff] }
 0x521   :  { %v5610_v5 = vld [vmem:[#allocation15_spill] sm:$0xff] }
 0x522   :  { %v3325_v13 = vpop.eup %3324  ;;  %1804 = vmatpush.msrb.mxu0 %v4256_v6  ;;  %1844 = vmatpush.msrb.mxu2 %v4258_v7  ;;  %v5611_v6 = vld [vmem:[#allocation21_spill] sm:$0xff]  ;;  %v5612_v7 = vld [vmem:[#allocation23_spill] sm:$0xff] }
 0x523   :  { %1532 = vmatmul.f32.vlgmr.msrb.gmra.mxu1 %v3325_v13  ;;  %1572 = vmatmul.f32.vlgmr.msrb.gmra.mxu3 %v3325_v13  ;;  %v4712_v13 = vld [vmem:[#allocation5 + $0x78] sm:$0xff] }
 0x524   :  { %1805 = vmatpush.msrb.mxu0 %v4266_v10  ;;  %1822 = vmatpush.msrb.mxu1 %v4260_v8  ;;  %v5613_v8 = vld [vmem:[#allocation24_spill] sm:$0xff]  ;;  %v5615_v10 = vld [vmem:[#allocation26_spill] sm:$0xff]  ;;  %5622 = vst [vmem:[#allocation17_spill] sm:$0xff] %v4712_v13 }
 0x525   :  { %1845 = vmatpush.msrb.mxu2 %v4269_v11  ;;  %1862 = vmatpush.msrb.mxu3 %v4264_v9  ;;  %v5614_v9 = vld [vmem:[#allocation25_spill] sm:$0xff]  ;;  %v5616_v11 = vld [vmem:[#allocation27_spill] sm:$0xff] }
 0x526   :  { %1806 = vmatpush.msrb.mxu0 %v4276_v34  ;;  %1823 = vmatpush.msrb.mxu1 %v4278_v36  ;;  %v5617_v34 = vld [vmem:[#allocation28_spill] sm:$0xff]  ;;  %v1494_v36 = vld [vmem:[#allocation2 + $0xa0] sm:$0xff] }
 0x527   :  { %1846 = vmatpush.msrb.mxu2 %v4280_v37  ;;  %1863 = vmatpush.msrb.mxu3 %v4284_v38 }
 0x528   :  { %1807 = vmatpush.msrb.mxu0 %v4288_v39  ;;  %1824 = vmatpush.msrb.mxu1 %v4290_v40 }
 0x529   :  { %1847 = vmatpush.msrb.mxu2 %v5600_v25  ;;  %1864 = vmatpush.msrb.mxu3 %v4296_v42  ;;  %v1495_v42 = vld [vmem:[#allocation2 + $0xa8] sm:$0xff] }
 0x52a   :  { %1808 = vmatpush.msrb.mxu0 %v5601_v26  ;;  %1825 = vmatpush.msrb.mxu1 %v4302_v45  ;;  %v4692_v25 = vld [vmem:[#allocation5 + $0x1c8] sm:$0xff]  ;;  %v4696_v26 = vld [vmem:[#allocation5 + $0x80] sm:$0xff] }
 0x52b   :  { %1848 = vmatpush.msrb.mxu2 %v4304_v47  ;;  %1865 = vmatpush.msrb.mxu3 %v4308_v2 }
 0x52c   :  { %1809 = vmatpush.msrb.mxu0 %v4312_v3  ;;  %1826 = vmatpush.msrb.mxu1 %v4314_v54 }
 0x52d   :  { %1849 = vmatpush.msrb.mxu2 %v5602_v41  ;;  %1866 = vmatpush.msrb.mxu3 %v4320_v63  ;;  %v4698_v41 = vld [vmem:[#allocation5 + $0x1b0] sm:$0xff] }
 0x52e   :  { %1810 = vmatpush.msrb.mxu0 %v5603_v44  ;;  %1827 = vmatpush.msrb.mxu1 %v4326_v0  ;;  %v4630_v0 = vld [vmem:[#allocation5 + $0xf0] sm:$0xff]  ;;  %v4700_v44 = vld [vmem:[#allocation5 + $0x88] sm:$0xff] }
 0x52f   :  { %1850 = vmatpush.msrb.mxu2 %v5604_v56  ;;  %1867 = vmatpush.msrb.mxu3 %v4332_v24  ;;  %v4632_v24 = vld [vmem:[#allocation5 + $0xf8] sm:$0xff]  ;;  %5620 = vst [vmem:[#allocation11_spill] sm:$0xff] %v4700_v44 }
 0x530   :  { %1811 = vmatpush.msrb.mxu0 %v5606_v35  ;;  %1828 = vmatpush.msrb.mxu1 %v5605_v61  ;;  %v4704_v56 = vld [vmem:[#allocation5 + $0x1b8] sm:$0xff]  ;;  %v4708_v61 = vld [vmem:[#allocation5 + $0x70] sm:$0xff]  ;;  %v4710_v35 = vld [vmem:[#allocation5 + $0x1a0] sm:$0xff] }
 0x531   :  { %1851 = vmatpush.msrb.mxu2 %v4340_v27  ;;  %1868 = vmatpush.msrb.mxu3 %v4344_v28  ;;  %v4634_v27 = vld [vmem:[#allocation5 + $0xe0] sm:$0xff]  ;;  %v4638_v28 = vld [vmem:[#allocation5 + $0xe8] sm:$0xff]  ;;  %5621 = vst [vmem:[#allocation18_spill] sm:$0xff] %v4708_v61 }
 0x532   :  { %1812 = vmatpush.msrb.mxu0 %v4348_v29  ;;  %1829 = vmatpush.msrb.mxu1 %v4350_v30  ;;  %v4640_v29 = vld [vmem:[#allocation5 + $0xd0] sm:$0xff]  ;;  %v4642_v30 = vld [vmem:[#allocation5 + $0xd8] sm:$0xff] }
 0x533   :  { %1852 = vmatpush.msrb.mxu2 %v4352_v31  ;;  %1869 = vmatpush.msrb.mxu3 %v4356_v32  ;;  %v4644_v31 = vld [vmem:[#allocation5 + $0x1f0] sm:$0xff]  ;;  %v4648_v32 = vld [vmem:[#allocation5 + $0x1f8] sm:$0xff] }
 0x534   :  { %1813 = vmatpush.msrb.mxu0 %v4360_v33  ;;  %1830 = vmatpush.msrb.mxu1 %v4362_v48  ;;  %v4650_v33 = vld [vmem:[#allocation5 + $0xc0] sm:$0xff]  ;;  %v4653_v48 = vld [vmem:[#allocation5 + $0xc8] sm:$0xff] }
 0x535   :  { %1853 = vmatpush.msrb.mxu2 %v4366_v49  ;;  %1870 = vmatpush.msrb.mxu3 %v4368_v50  ;;  %v1647_v49 = vld [vmem:[#allocation2 + $0xb0] sm:$0xff] }
 0x536   :  { %1814 = vmatpush.msrb.mxu0 %v4372_v51  ;;  %1831 = vmatpush.msrb.mxu1 %v4374_v52 }
 0x537   :  { %1854 = vmatpush.msrb.mxu2 %v4376_v53  ;;  %1871 = vmatpush.msrb.mxu3 %v4380_v55  ;;  %v1648_v55 = vld [vmem:[#allocation2 + $0xb8] sm:$0xff] }
 0x538   :  { %1815 = vmatpush.msrb.mxu0 %v4384_v57  ;;  %1832 = vmatpush.msrb.mxu1 %v4386_v58 }
 0x539   :  { %1855 = vmatpush.msrb.mxu2 %v4388_v59  ;;  %1872 = vmatpush.msrb.mxu3 %v5607_v43  ;;  %v4716_v43 = vld [vmem:[#allocation5 + $0x1a8] sm:$0xff] }
 0x53a   :  { %1816 = vmatpush.msrb.mxu0 %v5608_v1  ;;  %1833 = vmatpush.msrb.mxu1 %v5609_v4  ;;  %v4720_v1 = vld [vmem:[#allocation5 + $0x60] sm:$0xff]  ;;  %v4722_v4 = vld [vmem:[#allocation5 + $0x190] sm:$0xff] }
 0x53b   :  { %1856 = vmatpush.msrb.mxu2 %v5610_v5  ;;  %1873 = vmatpush.msrb.mxu3 %v5611_v6  ;;  %5623 = vst [vmem:[#allocation16_spill] sm:$0xff] %v4720_v1  ;;  %v4724_v5 = vld [vmem:[#allocation5 + $0x68] sm:$0xff]  ;;  %v4728_v6 = vld [vmem:[#allocation5 + $0x198] sm:$0xff] }
 0x53c   :  { %1817 = vmatpush.msrb.mxu0 %v5612_v7  ;;  %1834 = vmatpush.msrb.mxu1 %v5613_v8  ;;  %5624 = vst [vmem:[#allocation12_spill] sm:$0xff] %v4722_v4  ;;  %v4732_v7 = vld [vmem:[#allocation5 + $0x50] sm:$0xff]  ;;  %v4734_v8 = vld [vmem:[#allocation5 + $0x180] sm:$0xff] }
 0x53d   :  { %1857 = vmatpush.msrb.mxu2 %v5614_v9  ;;  %1874 = vmatpush.msrb.mxu3 %v5615_v10  ;;  %v4736_v9 = vld [vmem:[#allocation5 + $0x58] sm:$0xff]  ;;  %v4740_v10 = vld [vmem:[#allocation5 + $0x188] sm:$0xff] }
 0x53e   :  { %1835 = vmatpush.msrb.mxu1 %v5616_v11  ;;  %v4744_v11 = vld [vmem:[#allocation5 + $0x40] sm:$0xff] }
 0x53f   :  { %1875 = vmatpush.msrb.mxu3 %v5617_v34  ;;  %v4746_v34 = vld [vmem:[#allocation5 + $0x170] sm:$0xff] }
 0x540   :  { %1836 = vmatpush.msrb.mxu1 %v4424_v20  ;;  %v4680_v20 = vld [vmem:[#allocation5 + $0x1d8] sm:$0xff] }
 0x541   :  { %1876 = vmatpush.msrb.mxu3 %v4427_v21  ;;  %v4684_v21 = vld [vmem:[#allocation5 + $0x90] sm:$0xff] }
 0x542   :  { %1837 = vmatpush.msrb.mxu1 %v4431_v22  ;;  %5619 = vst [vmem:[#allocation13_spill] sm:$0xff] %v4684_v21  ;;  %v4686_v22 = vld [vmem:[#allocation5 + $0x1c0] sm:$0xff] }
 0x543   :  { %1877 = vmatpush.msrb.mxu3 %v4435_v23  ;;  %v4688_v23 = vld [vmem:[#allocation5 + $0x98] sm:$0xff] }
 0x59a   :  { %v1513_v37 = vpop.f32.mrf.mxu0 }
 0x59b   :  { %v1514_v38 = vadd.f32 %v1513_v37, %v1494_v36  ;;  %v4750_v36 = vld [vmem:[#allocation5 + $0x48] sm:$0xff]  ;;  %v4752_v37 = vld [vmem:[#allocation5 + $0x178] sm:$0xff] }
 0x5a0   :  { %v1533_v39 = vpop.f32.mrf.mxu1  ;;  %v1553_v45 = vpop.f32.mrf.mxu2 }
 0x5a1   :  { %v1534_v40 = vadd.f32 %v1533_v39, %v1514_v38  ;;  %v1554_v47 = vadd.f32 %v1553_v45, %v1495_v42  ;;  %v4756_v38 = vld [vmem:[#allocation5 + $0x30] sm:$0xff]  ;;  %v4758_v39 = vld [vmem:[#allocation5 + $0x160] sm:$0xff]  ;;  %v4764_v42 = vld [vmem:[#allocation5 + $0x168] sm:$0xff] }
 0x5a2   :  { %v4768_v45 = vld [vmem:[#allocation5 + $0x20] sm:$0xff] }
 0x5a3   :  { %3326 = vtanh.f32 %v1534_v40  ;;  %v4760_v40 = vld [vmem:[#allocation5 + $0x38] sm:$0xff] }
 0x5a6   :  { %v1573_v2 = vpop.f32.mrf.mxu3 }
 0x5a7   :  { %v1574_v3 = vadd.f32 %v1573_v2, %v1554_v47  ;;  %v4770_v47 = vld [vmem:[#allocation5 + $0x150] sm:$0xff]  ;;  %v4772_v2 = vld [vmem:[#allocation5 + $0x28] sm:$0xff] }
 0x5a9   :  { %v3327_v54 = vpop.eup %3326  ;;  %3328 = vtanh.f32 %v1574_v3  ;;  %v4776_v3 = vld [vmem:[#allocation5 + $0x158] sm:$0xff] }
 0x5aa   :  { %1665 = vmatmul.f32.vlgmr.msra.gmra.mxu0 %v3327_v54  ;;  %1705 = vmatmul.f32.vlgmr.msra.gmra.mxu2 %v3327_v54  ;;  %5625 = vst [vmem:[#allocation22_spill] sm:$0xff] %v4776_v3  ;;  %v4780_v54 = vld [vmem:[#allocation5 + $0x10] sm:$0xff] }
 0x5ab   :  { %1955 = vmatpush.msra.mxu0 %v4630_v0  ;;  %1995 = vmatpush.msra.mxu2 %v4632_v24  ;;  %5626 = vst [vmem:[#allocation20_spill] sm:$0xff] %v4780_v54 }
 0x5ad   :  { %1956 = vmatpush.msra.mxu0 %v4634_v27  ;;  %1996 = vmatpush.msra.mxu2 %v4638_v28 }
 0x5af   :  { %v3329_v63 = vpop.eup %3328  ;;  %1957 = vmatpush.msra.mxu0 %v4640_v29  ;;  %1997 = vmatpush.msra.mxu2 %v4642_v30 }
 0x5b0   :  { %1685 = vmatmul.f32.vlgmr.msra.gmra.mxu1 %v3329_v63  ;;  %1725 = vmatmul.f32.vlgmr.msra.gmra.mxu3 %v3329_v63  ;;  %v4782_v63 = vld [vmem:[#allocation5 + $0x140] sm:$0xff] }
 0x5b1   :  { %1975 = vmatpush.msra.mxu1 %v4644_v31  ;;  %2015 = vmatpush.msra.mxu3 %v4648_v32  ;;  %5627 = vst [vmem:[#allocation19_spill] sm:$0xff] %v4782_v63 }
 0x5b2   :  { %1958 = vmatpush.msra.mxu0 %v4650_v33  ;;  %1998 = vmatpush.msra.mxu2 %v4653_v48 }
 0x5b3   :  { %1976 = vmatpush.msra.mxu1 %v4662_v14  ;;  %2016 = vmatpush.msra.mxu3 %v4668_v16 }
 0x5b4   :  { %1959 = vmatpush.msra.mxu0 %v4660_v12  ;;  %1999 = vmatpush.msra.mxu2 %v4664_v15 }
 0x5b5   :  { %1977 = vmatpush.msra.mxu1 %v4674_v18  ;;  %2017 = vmatpush.msra.mxu3 %v4680_v20 }
 0x5b6   :  { %1960 = vmatpush.msra.mxu0 %v4672_v17  ;;  %2000 = vmatpush.msra.mxu2 %v4676_v19 }
 0x5b7   :  { %1978 = vmatpush.msra.mxu1 %v4686_v22  ;;  %2018 = vmatpush.msra.mxu3 %v4692_v25 }
 0x5b8   :  { %1961 = vmatpush.msra.mxu0 %v4684_v21  ;;  %2001 = vmatpush.msra.mxu2 %v4688_v23 }
 0x5b9   :  { %1979 = vmatpush.msra.mxu1 %v4698_v41  ;;  %2019 = vmatpush.msra.mxu3 %v4704_v56 }
 0x5ba   :  { %1962 = vmatpush.msra.mxu0 %v4696_v26  ;;  %2002 = vmatpush.msra.mxu2 %v4700_v44 }
 0x5bb   :  { %1980 = vmatpush.msra.mxu1 %v4710_v35  ;;  %2020 = vmatpush.msra.mxu3 %v4716_v43 }
 0x5bc   :  { %1963 = vmatpush.msra.mxu0 %v4708_v61  ;;  %2003 = vmatpush.msra.mxu2 %v4712_v13 }
 0x5bd   :  { %1981 = vmatpush.msra.mxu1 %v4722_v4  ;;  %2021 = vmatpush.msra.mxu3 %v4728_v6 }
 0x5be   :  { %1964 = vmatpush.msra.mxu0 %v4720_v1  ;;  %2004 = vmatpush.msra.mxu2 %v4724_v5 }
 0x5bf   :  { %1982 = vmatpush.msra.mxu1 %v4734_v8  ;;  %2022 = vmatpush.msra.mxu3 %v4740_v10 }
 0x5c0   :  { %1965 = vmatpush.msra.mxu0 %v4732_v7  ;;  %2005 = vmatpush.msra.mxu2 %v4736_v9 }
 0x5c1   :  { %1983 = vmatpush.msra.mxu1 %v4746_v34  ;;  %2023 = vmatpush.msra.mxu3 %v4752_v37 }
 0x5c2   :  { %1966 = vmatpush.msra.mxu0 %v4744_v11  ;;  %2006 = vmatpush.msra.mxu2 %v4750_v36 }
 0x5c3   :  { %1984 = vmatpush.msra.mxu1 %v4758_v39  ;;  %2024 = vmatpush.msra.mxu3 %v4764_v42 }
 0x5c4   :  { %1967 = vmatpush.msra.mxu0 %v4756_v38  ;;  %2007 = vmatpush.msra.mxu2 %v4760_v40 }
 0x5c5   :  { %1985 = vmatpush.msra.mxu1 %v4770_v47  ;;  %2025 = vmatpush.msra.mxu3 %v4776_v3 }
 0x5c6   :  { %1968 = vmatpush.msra.mxu0 %v4768_v45  ;;  %2008 = vmatpush.msra.mxu2 %v4772_v2 }
 0x5c7   :  { %1986 = vmatpush.msra.mxu1 %v4782_v63 }
 0x5c8   :  { %1969 = vmatpush.msra.mxu0 %v4780_v54 }
 0x627   :  { %v1666_v50 = vpop.f32.mrf.mxu0 }
 0x628   :  { %v1667_v51 = vadd.f32 %v1666_v50, %v1647_v49  ;;  %v4784_v49 = vld [vmem:[#allocation5 + $0x18] sm:$0xff]  ;;  %v4788_v50 = vld [vmem:[#allocation5 + $0x148] sm:$0xff] }
 0x629   :  { %5628 = vst [vmem:[#allocation15_spill] sm:$0xff] %v4784_v49  ;;  %2009 = vmatpush.msra.mxu2 %v4784_v49  ;;  %2026 = vmatpush.msra.mxu3 %v4788_v50 }
 0x62a   :  { %5629 = vst [vmem:[#allocation21_spill] sm:$0xff] %v4788_v50 }
 0x62d   :  { %v1686_v52 = vpop.f32.mrf.mxu1  ;;  %v1706_v57 = vpop.f32.mrf.mxu2 }
 0x62e   :  { %v1687_v53 = vadd.f32 %v1686_v52, %v1667_v51  ;;  %v1707_v58 = vadd.f32 %v1706_v57, %v1648_v55  ;;  %v4792_v51 = vld [vmem:[#allocation5] sm:$0xff]  ;;  %v4794_v52 = vld [vmem:[#allocation5 + $0x130] sm:$0xff]  ;;  %v4800_v55 = vld [vmem:[#allocation5 + $0x138] sm:$0xff] }
 0x62f   :  { %5630 = vst [vmem:[#allocation23_spill] sm:$0xff] %v4792_v51  ;;  %1970 = vmatpush.msra.mxu0 %v4792_v51  ;;  %1987 = vmatpush.msra.mxu1 %v4794_v52  ;;  %v4804_v57 = vld [vmem:[#allocation5 + $0x120] sm:$0xff] }
 0x630   :  { %3330 = vtanh.f32 %v1687_v53  ;;  %5631 = vst [vmem:[#allocation24_spill] sm:$0xff] %v4794_v52  ;;  %v4796_v53 = vld [vmem:[#allocation5 + $0x8] sm:$0xff]  ;;  %2027 = vmatpush.msra.mxu3 %v4800_v55 }
 0x631   :  { %5632 = vst [vmem:[#allocation25_spill] sm:$0xff] %v4796_v53  ;;  %2010 = vmatpush.msra.mxu2 %v4796_v53  ;;  %1988 = vmatpush.msra.mxu1 %v4804_v57 }
 0x632   :  { %5633 = vst [vmem:[#allocation26_spill] sm:$0xff] %v4800_v55 }
 0x633   :  { %v1726_v59 = vpop.f32.mrf.mxu3  ;;  %5634 = vst [vmem:[#allocation27_spill] sm:$0xff] %v4804_v57 }
 0x634   :  { %v1727_v60 = vadd.f32 %v1726_v59, %v1707_v58  ;;  %v4806_v58 = vld [vmem:[#allocation5 + $0x128] sm:$0xff]  ;;  %v4808_v59 = vld [vmem:[#allocation5 + $0x110] sm:$0xff] }
 0x635   :  { %5635 = vst [vmem:[#allocation28_spill] sm:$0xff] %v4806_v58  ;;  %2028 = vmatpush.msra.mxu3 %v4806_v58  ;;  %1989 = vmatpush.msra.mxu1 %v4808_v59 }
 0x636   :  { %v3331_v62 = vpop.eup %3330  ;;  %3332 = vtanh.f32 %v1727_v60  ;;  %v4811_v60 = vld [vmem:[#allocation5 + $0x118] sm:$0xff] }
 0x637   :  { %1818 = vmatmul.f32.vlgmr.msrb.gmra.mxu0 %v3331_v62  ;;  %1858 = vmatmul.f32.vlgmr.msrb.gmra.mxu2 %v3331_v62  ;;  %v4815_v62 = vld [vmem:[#allocation5 + $0x100] sm:$0xff] }
 0x638   :  { %2108 = vmatpush.msrb.mxu0 %v4630_v0  ;;  %2148 = vmatpush.msrb.mxu2 %v4632_v24 }
 0x639   :  { %2029 = vmatpush.msra.mxu3 %v4811_v60  ;;  %1990 = vmatpush.msra.mxu1 %v4815_v62 }
 0x63a   :  { %2109 = vmatpush.msrb.mxu0 %v4634_v27  ;;  %2149 = vmatpush.msrb.mxu2 %v4638_v28 }
 0x63c   :  { %v3333_v46 = vpop.eup %3332  ;;  %2110 = vmatpush.msrb.mxu0 %v4640_v29  ;;  %2150 = vmatpush.msrb.mxu2 %v4642_v30 }
 0x63d   :  { %1838 = vmatmul.f32.vlgmr.msrb.gmra.mxu1 %v3333_v46  ;;  %1878 = vmatmul.f32.vlgmr.msrb.gmra.mxu3 %v3333_v46  ;;  %v4819_v46 = vld [vmem:[#allocation5 + $0x108] sm:$0xff] }
 0x63e   :  { %2030 = vmatpush.msra.mxu3 %v4819_v46  ;;  %2111 = vmatpush.msrb.mxu0 %v4650_v33 }
 0x63f   :  { %2128 = vmatpush.msrb.mxu1 %v4644_v31  ;;  %2151 = vmatpush.msrb.mxu2 %v4653_v48 }
 0x640   :  { %2168 = vmatpush.msrb.mxu3 %v4648_v32  ;;  %2112 = vmatpush.msrb.mxu0 %v4660_v12 }
 0x641   :  { %2129 = vmatpush.msrb.mxu1 %v4662_v14  ;;  %2152 = vmatpush.msrb.mxu2 %v4664_v15 }
 0x642   :  { %2169 = vmatpush.msrb.mxu3 %v4668_v16  ;;  %2113 = vmatpush.msrb.mxu0 %v4672_v17 }
 0x643   :  { %2130 = vmatpush.msrb.mxu1 %v4674_v18  ;;  %2153 = vmatpush.msrb.mxu2 %v4676_v19  ;;  %v1800_v19 = vld [vmem:[#allocation2 + $0xc0] sm:$0xff] }
 0x644   :  { %2170 = vmatpush.msrb.mxu3 %v4680_v20  ;;  %2114 = vmatpush.msrb.mxu0 %v4684_v21 }
 0x645   :  { %2131 = vmatpush.msrb.mxu1 %v4686_v22  ;;  %2154 = vmatpush.msrb.mxu2 %v4688_v23 }
 0x646   :  { %2171 = vmatpush.msrb.mxu3 %v4692_v25  ;;  %2115 = vmatpush.msrb.mxu0 %v4696_v26 }
 0x647   :  { %2132 = vmatpush.msrb.mxu1 %v4698_v41  ;;  %2155 = vmatpush.msrb.mxu2 %v4700_v44 }
 0x648   :  { %2172 = vmatpush.msrb.mxu3 %v4704_v56  ;;  %2116 = vmatpush.msrb.mxu0 %v4708_v61 }
 0x649   :  { %2133 = vmatpush.msrb.mxu1 %v4710_v35  ;;  %2156 = vmatpush.msrb.mxu2 %v4712_v13 }
 0x64a   :  { %2173 = vmatpush.msrb.mxu3 %v4716_v43  ;;  %2117 = vmatpush.msrb.mxu0 %v4720_v1  ;;  %v1801_v1 = vld [vmem:[#allocation2 + $0xc8] sm:$0xff] }
 0x64b   :  { %2134 = vmatpush.msrb.mxu1 %v4722_v4  ;;  %2157 = vmatpush.msrb.mxu2 %v4724_v5 }
 0x64c   :  { %2174 = vmatpush.msrb.mxu3 %v4728_v6  ;;  %2118 = vmatpush.msrb.mxu0 %v4732_v7 }
 0x64d   :  { %2135 = vmatpush.msrb.mxu1 %v4734_v8  ;;  %2158 = vmatpush.msrb.mxu2 %v4736_v9 }
 0x64e   :  { %2175 = vmatpush.msrb.mxu3 %v4740_v10  ;;  %2119 = vmatpush.msrb.mxu0 %v4744_v11 }
 0x64f   :  { %2136 = vmatpush.msrb.mxu1 %v4746_v34  ;;  %2159 = vmatpush.msrb.mxu2 %v4750_v36 }
 0x650   :  { %2176 = vmatpush.msrb.mxu3 %v4752_v37  ;;  %2120 = vmatpush.msrb.mxu0 %v4756_v38 }
 0x651   :  { %2137 = vmatpush.msrb.mxu1 %v4758_v39  ;;  %2160 = vmatpush.msrb.mxu2 %v4760_v40 }
 0x652   :  { %2177 = vmatpush.msrb.mxu3 %v4764_v42  ;;  %2121 = vmatpush.msrb.mxu0 %v4768_v45 }
 0x653   :  { %2138 = vmatpush.msrb.mxu1 %v4770_v47  ;;  %2161 = vmatpush.msrb.mxu2 %v4772_v2 }
 0x654   :  { %2178 = vmatpush.msrb.mxu3 %v4776_v3  ;;  %2122 = vmatpush.msrb.mxu0 %v4780_v54 }
 0x655   :  { %2139 = vmatpush.msrb.mxu1 %v4782_v63  ;;  %2162 = vmatpush.msrb.mxu2 %v4784_v49 }
 0x656   :  { %2179 = vmatpush.msrb.mxu3 %v4788_v50  ;;  %2123 = vmatpush.msrb.mxu0 %v4792_v51 }
 0x657   :  { %2140 = vmatpush.msrb.mxu1 %v4794_v52  ;;  %2163 = vmatpush.msrb.mxu2 %v4796_v53 }
 0x658   :  { %2180 = vmatpush.msrb.mxu3 %v4800_v55 }
 0x659   :  { %2141 = vmatpush.msrb.mxu1 %v4804_v57 }
 0x65a   :  { %2181 = vmatpush.msrb.mxu3 %v4806_v58 }
 0x65b   :  { %2142 = vmatpush.msrb.mxu1 %v4808_v59 }
 0x65c   :  { %2182 = vmatpush.msrb.mxu3 %v4811_v60 }
 0x65d   :  { %2143 = vmatpush.msrb.mxu1 %v4815_v62 }
 0x65e   :  { %2183 = vmatpush.msrb.mxu3 %v4819_v46 }
 0x6b4   :  { %v1819_v21 = vpop.f32.mrf.mxu0 }
 0x6b5   :  { %v1820_v44 = vadd.f32 %v1819_v21, %v1800_v19 }
 0x6ba   :  { %v1839_v61 = vpop.f32.mrf.mxu1  ;;  %v1859_v4 = vpop.f32.mrf.mxu2 }
 0x6bb   :  { %v1840_v13 = vadd.f32 %v1839_v61, %v1820_v44  ;;  %v1860_v19 = vadd.f32 %v1859_v4, %v1801_v1  ;;  %v5636_v1 = vld [vmem:[#allocation14_spill] sm:$0xff]  ;;  %v5637_v4 = vld [vmem:[#allocation13_spill] sm:$0xff] }
 0x6bd   :  { %3334 = vtanh.f32 %v1840_v13 }
 0x6c0   :  { %v1879_v21 = vpop.f32.mrf.mxu3 }
 0x6c1   :  { %v1880_v44 = vadd.f32 %v1879_v21, %v1860_v19  ;;  %v5638_v19 = vld [vmem:[#allocation11_spill] sm:$0xff]  ;;  %v5639_v21 = vld [vmem:[#allocation18_spill] sm:$0xff] }
 0x6c3   :  { %v3335_v61 = vpop.eup %3334  ;;  %3336 = vtanh.f32 %v1880_v44  ;;  %v5640_v44 = vld [vmem:[#allocation17_spill] sm:$0xff] }
 0x6c4   :  { %1971 = vmatmul.f32.vlgmr.msra.gmra.mxu0 %v3335_v61  ;;  %2011 = vmatmul.f32.vlgmr.msra.gmra.mxu2 %v3335_v61  ;;  %v5641_v61 = vld [vmem:[#allocation12_spill] sm:$0xff] }
 0x6c5   :  { %2261 = vmatpush.msra.mxu0 %v4630_v0  ;;  %2301 = vmatpush.msra.mxu2 %v4632_v24 }
 0x6c7   :  { %2262 = vmatpush.msra.mxu0 %v4634_v27  ;;  %2302 = vmatpush.msra.mxu2 %v4638_v28 }
 0x6c9   :  { %v3337_v13 = vpop.eup %3336  ;;  %2263 = vmatpush.msra.mxu0 %v4640_v29  ;;  %2303 = vmatpush.msra.mxu2 %v4642_v30 }
 0x6ca   :  { %1991 = vmatmul.f32.vlgmr.msra.gmra.mxu1 %v3337_v13  ;;  %2031 = vmatmul.f32.vlgmr.msra.gmra.mxu3 %v3337_v13  ;;  %v5642_v13 = vld [vmem:[#allocation16_spill] sm:$0xff] }
 0x6cb   :  { %2281 = vmatpush.msra.mxu1 %v4644_v31  ;;  %2321 = vmatpush.msra.mxu3 %v4648_v32 }
 0x6cc   :  { %2264 = vmatpush.msra.mxu0 %v4650_v33  ;;  %2304 = vmatpush.msra.mxu2 %v4653_v48 }
 0x6cd   :  { %2282 = vmatpush.msra.mxu1 %v4662_v14  ;;  %2322 = vmatpush.msra.mxu3 %v4668_v16 }
 0x6ce   :  { %2265 = vmatpush.msra.mxu0 %v4660_v12  ;;  %2305 = vmatpush.msra.mxu2 %v4664_v15 }
 0x6cf   :  { %2283 = vmatpush.msra.mxu1 %v4674_v18  ;;  %2323 = vmatpush.msra.mxu3 %v4680_v20 }
 0x6d0   :  { %2266 = vmatpush.msra.mxu0 %v4672_v17  ;;  %2306 = vmatpush.msra.mxu2 %v5636_v1 }
 0x6d1   :  { %2284 = vmatpush.msra.mxu1 %v4686_v22  ;;  %2324 = vmatpush.msra.mxu3 %v4692_v25 }
 0x6d2   :  { %2267 = vmatpush.msra.mxu0 %v5637_v4  ;;  %2307 = vmatpush.msra.mxu2 %v4688_v23 }
 0x6d3   :  { %2285 = vmatpush.msra.mxu1 %v4698_v41  ;;  %2325 = vmatpush.msra.mxu3 %v4704_v56 }
 0x6d4   :  { %2268 = vmatpush.msra.mxu0 %v4696_v26  ;;  %2308 = vmatpush.msra.mxu2 %v5638_v19 }
 0x6d5   :  { %2286 = vmatpush.msra.mxu1 %v4710_v35  ;;  %2326 = vmatpush.msra.mxu3 %v4716_v43 }
 0x6d6   :  { %2269 = vmatpush.msra.mxu0 %v5639_v21  ;;  %2309 = vmatpush.msra.mxu2 %v5640_v44 }
 0x6d7   :  { %2287 = vmatpush.msra.mxu1 %v5641_v61  ;;  %2327 = vmatpush.msra.mxu3 %v4728_v6 }
 0x6d8   :  { %2270 = vmatpush.msra.mxu0 %v5642_v13  ;;  %2310 = vmatpush.msra.mxu2 %v4724_v5 }
 0x6d9   :  { %2288 = vmatpush.msra.mxu1 %v4734_v8  ;;  %2328 = vmatpush.msra.mxu3 %v4740_v10 }
 0x6da   :  { %2271 = vmatpush.msra.mxu0 %v4732_v7  ;;  %2311 = vmatpush.msra.mxu2 %v4736_v9 }
 0x6db   :  { %2289 = vmatpush.msra.mxu1 %v4746_v34  ;;  %2329 = vmatpush.msra.mxu3 %v4752_v37 }
 0x6dc   :  { %2272 = vmatpush.msra.mxu0 %v4744_v11  ;;  %2312 = vmatpush.msra.mxu2 %v4750_v36 }
 0x6dd   :  { %2290 = vmatpush.msra.mxu1 %v4758_v39  ;;  %2330 = vmatpush.msra.mxu3 %v4764_v42 }
 0x6de   :  { %2273 = vmatpush.msra.mxu0 %v4756_v38  ;;  %2313 = vmatpush.msra.mxu2 %v4760_v40 }
 0x6df   :  { %2291 = vmatpush.msra.mxu1 %v4770_v47  ;;  %2331 = vmatpush.msra.mxu3 %v4776_v3 }
 0x6e0   :  { %2274 = vmatpush.msra.mxu0 %v4768_v45  ;;  %2314 = vmatpush.msra.mxu2 %v4772_v2 }
 0x6e1   :  { %2292 = vmatpush.msra.mxu1 %v4782_v63  ;;  %2332 = vmatpush.msra.mxu3 %v4788_v50  ;;  %v1953_v50 = vld [vmem:[#allocation2 + $0xd0] sm:$0xff] }
 0x6e2   :  { %2275 = vmatpush.msra.mxu0 %v4780_v54  ;;  %2315 = vmatpush.msra.mxu2 %v4784_v49 }
 0x6e3   :  { %2293 = vmatpush.msra.mxu1 %v4794_v52  ;;  %2333 = vmatpush.msra.mxu3 %v4800_v55 }
 0x6e4   :  { %2276 = vmatpush.msra.mxu0 %v4792_v51  ;;  %2316 = vmatpush.msra.mxu2 %v4796_v53  ;;  %v1954_v51 = vld [vmem:[#allocation2 + $0xd8] sm:$0xff] }
 0x6e5   :  { %2294 = vmatpush.msra.mxu1 %v4804_v57  ;;  %2334 = vmatpush.msra.mxu3 %v4806_v58 }
 0x6e7   :  { %2295 = vmatpush.msra.mxu1 %v4808_v59  ;;  %2335 = vmatpush.msra.mxu3 %v4811_v60 }
 0x6e9   :  { %2296 = vmatpush.msra.mxu1 %v4815_v62  ;;  %2336 = vmatpush.msra.mxu3 %v4819_v46 }
 0x741   :  { %v1972_v52 = vpop.f32.mrf.mxu0 }
 0x742   :  { %v1973_v49 = vadd.f32 %v1972_v52, %v1953_v50  ;;  %v5048_v52 = vld [vmem:[#allocation5 + $0xb8] sm:$0xff] }
 0x747   :  { %v1992_v55 = vpop.f32.mrf.mxu1  ;;  %v2012_v54 = vpop.f32.mrf.mxu2 }
 0x748   :  { %v1993_v63 = vadd.f32 %v1992_v55, %v1973_v49  ;;  %v2013_v53 = vadd.f32 %v2012_v54, %v1954_v51  ;;  %v5044_v49 = vld [vmem:[#allocation5 + $0xb0] sm:$0xff]  ;;  %v5046_v51 = vld [vmem:[#allocation5 + $0x1e0] sm:$0xff] }
 0x749   :  { %v5056_v55 = vld [vmem:[#allocation5 + $0xa0] sm:$0xff] }
 0x74a   :  { %3338 = vtanh.f32 %v1993_v63 }
 0x74d   :  { %v2032_v57 = vpop.f32.mrf.mxu3 }
 0x74e   :  { %v2033_v3 = vadd.f32 %v2032_v57, %v2013_v53  ;;  %v5052_v53 = vld [vmem:[#allocation5 + $0x1e8] sm:$0xff]  ;;  %v5058_v57 = vld [vmem:[#allocation5 + $0x1d0] sm:$0xff] }
 0x750   :  { %v3339_v58 = vpop.eup %3338  ;;  %3340 = vtanh.f32 %v2033_v3 }
 0x751   :  { %2124 = vmatmul.f32.vlgmr.msrb.gmra.mxu0 %v3339_v58  ;;  %2164 = vmatmul.f32.vlgmr.msrb.gmra.mxu2 %v3339_v58  ;;  %v5060_v58 = vld [vmem:[#allocation5 + $0xa8] sm:$0xff] }
 0x752   :  { %2414 = vmatpush.msrb.mxu0 %v4630_v0  ;;  %2454 = vmatpush.msrb.mxu2 %v4632_v24  ;;  %v5643_v0 = vld [vmem:[#allocation22_spill] sm:$0xff]  ;;  %v5644_v24 = vld [vmem:[#allocation20_spill] sm:$0xff]  ;;  %5654 = vst [vmem:[#allocation14_spill] sm:$0xff] %v5060_v58 }
 0x754   :  { %2415 = vmatpush.msrb.mxu0 %v4634_v27  ;;  %2455 = vmatpush.msrb.mxu2 %v4638_v28  ;;  %v5645_v27 = vld [vmem:[#allocation19_spill] sm:$0xff] }
 0x755   :  { %v5646_v28 = vld [vmem:[#allocation15_spill] sm:$0xff] }
 0x756   :  { %v3341_v50 = vpop.eup %3340  ;;  %2416 = vmatpush.msrb.mxu0 %v4640_v29  ;;  %2456 = vmatpush.msrb.mxu2 %v4642_v30  ;;  %v5647_v29 = vld [vmem:[#allocation21_spill] sm:$0xff]  ;;  %v5648_v30 = vld [vmem:[#allocation23_spill] sm:$0xff] }
 0x757   :  { %2144 = vmatmul.f32.vlgmr.msrb.gmra.mxu1 %v3341_v50  ;;  %2184 = vmatmul.f32.vlgmr.msrb.gmra.mxu3 %v3341_v50  ;;  %v5096_v50 = vld [vmem:[#allocation5 + $0x78] sm:$0xff] }
 0x758   :  { %2417 = vmatpush.msrb.mxu0 %v4650_v33  ;;  %2434 = vmatpush.msrb.mxu1 %v4644_v31  ;;  %v5649_v31 = vld [vmem:[#allocation24_spill] sm:$0xff]  ;;  %v5651_v33 = vld [vmem:[#allocation26_spill] sm:$0xff]  ;;  %5658 = vst [vmem:[#allocation17_spill] sm:$0xff] %v5096_v50 }
 0x759   :  { %2457 = vmatpush.msrb.mxu2 %v4653_v48  ;;  %2474 = vmatpush.msrb.mxu3 %v4648_v32  ;;  %v5650_v32 = vld [vmem:[#allocation25_spill] sm:$0xff]  ;;  %v5652_v48 = vld [vmem:[#allocation27_spill] sm:$0xff] }
 0x75a   :  { %2418 = vmatpush.msrb.mxu0 %v4660_v12  ;;  %2435 = vmatpush.msrb.mxu1 %v4662_v14  ;;  %v5653_v12 = vld [vmem:[#allocation28_spill] sm:$0xff]  ;;  %v2106_v14 = vld [vmem:[#allocation2 + $0xe0] sm:$0xff] }
 0x75b   :  { %2458 = vmatpush.msrb.mxu2 %v4664_v15  ;;  %2475 = vmatpush.msrb.mxu3 %v4668_v16 }
 0x75c   :  { %2419 = vmatpush.msrb.mxu0 %v4672_v17  ;;  %2436 = vmatpush.msrb.mxu1 %v4674_v18 }
 0x75d   :  { %2459 = vmatpush.msrb.mxu2 %v5636_v1  ;;  %2476 = vmatpush.msrb.mxu3 %v4680_v20  ;;  %v2107_v20 = vld [vmem:[#allocation2 + $0xe8] sm:$0xff] }
 0x75e   :  { %2420 = vmatpush.msrb.mxu0 %v5637_v4  ;;  %2437 = vmatpush.msrb.mxu1 %v4686_v22  ;;  %v5076_v1 = vld [vmem:[#allocation5 + $0x1c8] sm:$0xff]  ;;  %v5080_v4 = vld [vmem:[#allocation5 + $0x80] sm:$0xff] }
 0x75f   :  { %2460 = vmatpush.msrb.mxu2 %v4688_v23  ;;  %2477 = vmatpush.msrb.mxu3 %v4692_v25 }
 0x760   :  { %2421 = vmatpush.msrb.mxu0 %v4696_v26  ;;  %2438 = vmatpush.msrb.mxu1 %v4698_v41 }
 0x761   :  { %2461 = vmatpush.msrb.mxu2 %v5638_v19  ;;  %2478 = vmatpush.msrb.mxu3 %v4704_v56  ;;  %v5082_v19 = vld [vmem:[#allocation5 + $0x1b0] sm:$0xff] }
 0x762   :  { %2422 = vmatpush.msrb.mxu0 %v5639_v21  ;;  %2439 = vmatpush.msrb.mxu1 %v4710_v35  ;;  %v5014_v35 = vld [vmem:[#allocation5 + $0xf0] sm:$0xff]  ;;  %v5084_v21 = vld [vmem:[#allocation5 + $0x88] sm:$0xff] }
 0x763   :  { %2462 = vmatpush.msrb.mxu2 %v5640_v44  ;;  %2479 = vmatpush.msrb.mxu3 %v4716_v43  ;;  %v5016_v43 = vld [vmem:[#allocation5 + $0xf8] sm:$0xff]  ;;  %5656 = vst [vmem:[#allocation11_spill] sm:$0xff] %v5084_v21 }
 0x764   :  { %2423 = vmatpush.msrb.mxu0 %v5642_v13  ;;  %2440 = vmatpush.msrb.mxu1 %v5641_v61  ;;  %v5088_v44 = vld [vmem:[#allocation5 + $0x1b8] sm:$0xff]  ;;  %v5092_v61 = vld [vmem:[#allocation5 + $0x70] sm:$0xff]  ;;  %v5094_v13 = vld [vmem:[#allocation5 + $0x1a0] sm:$0xff] }
 0x765   :  { %2463 = vmatpush.msrb.mxu2 %v4724_v5  ;;  %2480 = vmatpush.msrb.mxu3 %v4728_v6  ;;  %v5018_v5 = vld [vmem:[#allocation5 + $0xe0] sm:$0xff]  ;;  %v5022_v6 = vld [vmem:[#allocation5 + $0xe8] sm:$0xff]  ;;  %5657 = vst [vmem:[#allocation18_spill] sm:$0xff] %v5092_v61 }
 0x766   :  { %2424 = vmatpush.msrb.mxu0 %v4732_v7  ;;  %2441 = vmatpush.msrb.mxu1 %v4734_v8  ;;  %v5024_v7 = vld [vmem:[#allocation5 + $0xd0] sm:$0xff]  ;;  %v5026_v8 = vld [vmem:[#allocation5 + $0xd8] sm:$0xff] }
 0x767   :  { %2464 = vmatpush.msrb.mxu2 %v4736_v9  ;;  %2481 = vmatpush.msrb.mxu3 %v4740_v10  ;;  %v5028_v9 = vld [vmem:[#allocation5 + $0x1f0] sm:$0xff]  ;;  %v5032_v10 = vld [vmem:[#allocation5 + $0x1f8] sm:$0xff] }
 0x768   :  { %2425 = vmatpush.msrb.mxu0 %v4744_v11  ;;  %2442 = vmatpush.msrb.mxu1 %v4746_v34  ;;  %v5034_v11 = vld [vmem:[#allocation5 + $0xc0] sm:$0xff]  ;;  %v5037_v34 = vld [vmem:[#allocation5 + $0xc8] sm:$0xff] }
 0x769   :  { %2465 = vmatpush.msrb.mxu2 %v4750_v36  ;;  %2482 = vmatpush.msrb.mxu3 %v4752_v37  ;;  %v2259_v36 = vld [vmem:[#allocation2 + $0xf0] sm:$0xff] }
 0x76a   :  { %2426 = vmatpush.msrb.mxu0 %v4756_v38  ;;  %2443 = vmatpush.msrb.mxu1 %v4758_v39 }
 0x76b   :  { %2466 = vmatpush.msrb.mxu2 %v4760_v40  ;;  %2483 = vmatpush.msrb.mxu3 %v4764_v42  ;;  %v2260_v42 = vld [vmem:[#allocation2 + $0xf8] sm:$0xff] }
 0x76c   :  { %2427 = vmatpush.msrb.mxu0 %v4768_v45  ;;  %2444 = vmatpush.msrb.mxu1 %v4770_v47 }
 0x76d   :  { %2467 = vmatpush.msrb.mxu2 %v4772_v2  ;;  %2484 = vmatpush.msrb.mxu3 %v5643_v0  ;;  %v5100_v0 = vld [vmem:[#allocation5 + $0x1a8] sm:$0xff] }
 0x76e   :  { %2428 = vmatpush.msrb.mxu0 %v5644_v24  ;;  %2445 = vmatpush.msrb.mxu1 %v5645_v27  ;;  %v5104_v24 = vld [vmem:[#allocation5 + $0x60] sm:$0xff]  ;;  %v5106_v27 = vld [vmem:[#allocation5 + $0x190] sm:$0xff] }
 0x76f   :  { %2468 = vmatpush.msrb.mxu2 %v5646_v28  ;;  %2485 = vmatpush.msrb.mxu3 %v5647_v29  ;;  %5659 = vst [vmem:[#allocation12_spill] sm:$0xff] %v5104_v24  ;;  %v5108_v28 = vld [vmem:[#allocation5 + $0x68] sm:$0xff]  ;;  %v5112_v29 = vld [vmem:[#allocation5 + $0x198] sm:$0xff] }
 0x770   :  { %2429 = vmatpush.msrb.mxu0 %v5648_v30  ;;  %2446 = vmatpush.msrb.mxu1 %v5649_v31  ;;  %5660 = vst [vmem:[#allocation16_spill] sm:$0xff] %v5106_v27  ;;  %v5116_v30 = vld [vmem:[#allocation5 + $0x50] sm:$0xff]  ;;  %v5118_v31 = vld [vmem:[#allocation5 + $0x180] sm:$0xff] }
 0x771   :  { %2469 = vmatpush.msrb.mxu2 %v5650_v32  ;;  %2486 = vmatpush.msrb.mxu3 %v5651_v33  ;;  %v5120_v32 = vld [vmem:[#allocation5 + $0x58] sm:$0xff]  ;;  %v5124_v33 = vld [vmem:[#allocation5 + $0x188] sm:$0xff] }
 0x772   :  { %2447 = vmatpush.msrb.mxu1 %v5652_v48  ;;  %v5128_v48 = vld [vmem:[#allocation5 + $0x40] sm:$0xff] }
 0x773   :  { %2487 = vmatpush.msrb.mxu3 %v5653_v12  ;;  %v5130_v12 = vld [vmem:[#allocation5 + $0x170] sm:$0xff] }
 0x774   :  { %2448 = vmatpush.msrb.mxu1 %v4808_v59  ;;  %v5064_v59 = vld [vmem:[#allocation5 + $0x1d8] sm:$0xff] }
 0x775   :  { %2488 = vmatpush.msrb.mxu3 %v4811_v60  ;;  %v5068_v60 = vld [vmem:[#allocation5 + $0x90] sm:$0xff] }
 0x776   :  { %2449 = vmatpush.msrb.mxu1 %v4815_v62  ;;  %5655 = vst [vmem:[#allocation13_spill] sm:$0xff] %v5068_v60  ;;  %v5070_v62 = vld [vmem:[#allocation5 + $0x1c0] sm:$0xff] }
 0x777   :  { %2489 = vmatpush.msrb.mxu3 %v4819_v46  ;;  %v5072_v46 = vld [vmem:[#allocation5 + $0x98] sm:$0xff] }
 0x7ce   :  { %v2125_v15 = vpop.f32.mrf.mxu0 }
 0x7cf   :  { %v2126_v16 = vadd.f32 %v2125_v15, %v2106_v14  ;;  %v5134_v14 = vld [vmem:[#allocation5 + $0x48] sm:$0xff]  ;;  %v5136_v15 = vld [vmem:[#allocation5 + $0x178] sm:$0xff] }
 0x7d4   :  { %v2145_v17 = vpop.f32.mrf.mxu1  ;;  %v2165_v22 = vpop.f32.mrf.mxu2 }
 0x7d5   :  { %v2146_v18 = vadd.f32 %v2145_v17, %v2126_v16  ;;  %v2166_v23 = vadd.f32 %v2165_v22, %v2107_v20  ;;  %v5140_v16 = vld [vmem:[#allocation5 + $0x30] sm:$0xff]  ;;  %v5142_v17 = vld [vmem:[#allocation5 + $0x160] sm:$0xff]  ;;  %v5148_v20 = vld [vmem:[#allocation5 + $0x168] sm:$0xff] }
 0x7d6   :  { %v5152_v22 = vld [vmem:[#allocation5 + $0x20] sm:$0xff] }
 0x7d7   :  { %3342 = vtanh.f32 %v2146_v18  ;;  %v5144_v18 = vld [vmem:[#allocation5 + $0x38] sm:$0xff] }
 0x7da   :  { %v2185_v25 = vpop.f32.mrf.mxu3 }
 0x7db   :  { %v2186_v26 = vadd.f32 %v2185_v25, %v2166_v23  ;;  %v5154_v23 = vld [vmem:[#allocation5 + $0x150] sm:$0xff]  ;;  %v5156_v25 = vld [vmem:[#allocation5 + $0x28] sm:$0xff] }
 0x7dd   :  { %v3343_v41 = vpop.eup %3342  ;;  %3344 = vtanh.f32 %v2186_v26  ;;  %v5160_v26 = vld [vmem:[#allocation5 + $0x158] sm:$0xff] }
 0x7de   :  { %2277 = vmatmul.f32.vlgmr.msra.gmra.mxu0 %v3343_v41  ;;  %2317 = vmatmul.f32.vlgmr.msra.gmra.mxu2 %v3343_v41  ;;  %5661 = vst [vmem:[#allocation22_spill] sm:$0xff] %v5160_v26  ;;  %v5164_v41 = vld [vmem:[#allocation5 + $0x10] sm:$0xff] }
 0x7df   :  { %2567 = vmatpush.msra.mxu0 %v5014_v35  ;;  %2607 = vmatpush.msra.mxu2 %v5016_v43  ;;  %5662 = vst [vmem:[#allocation20_spill] sm:$0xff] %v5164_v41 }
 0x7e1   :  { %2568 = vmatpush.msra.mxu0 %v5018_v5  ;;  %2608 = vmatpush.msra.mxu2 %v5022_v6 }
 0x7e3   :  { %v3345_v56 = vpop.eup %3344  ;;  %2569 = vmatpush.msra.mxu0 %v5024_v7  ;;  %2609 = vmatpush.msra.mxu2 %v5026_v8 }
 0x7e4   :  { %2297 = vmatmul.f32.vlgmr.msra.gmra.mxu1 %v3345_v56  ;;  %2337 = vmatmul.f32.vlgmr.msra.gmra.mxu3 %v3345_v56  ;;  %v5166_v56 = vld [vmem:[#allocation5 + $0x140] sm:$0xff] }
 0x7e5   :  { %2587 = vmatpush.msra.mxu1 %v5028_v9  ;;  %2627 = vmatpush.msra.mxu3 %v5032_v10  ;;  %5663 = vst [vmem:[#allocation19_spill] sm:$0xff] %v5166_v56 }
 0x7e6   :  { %2570 = vmatpush.msra.mxu0 %v5034_v11  ;;  %2610 = vmatpush.msra.mxu2 %v5037_v34 }
 0x7e7   :  { %2588 = vmatpush.msra.mxu1 %v5046_v51  ;;  %2628 = vmatpush.msra.mxu3 %v5052_v53 }
 0x7e8   :  { %2571 = vmatpush.msra.mxu0 %v5044_v49  ;;  %2611 = vmatpush.msra.mxu2 %v5048_v52 }
 0x7e9   :  { %2589 = vmatpush.msra.mxu1 %v5058_v57  ;;  %2629 = vmatpush.msra.mxu3 %v5064_v59 }
 0x7ea   :  { %2572 = vmatpush.msra.mxu0 %v5056_v55  ;;  %2612 = vmatpush.msra.mxu2 %v5060_v58 }
 0x7eb   :  { %2590 = vmatpush.msra.mxu1 %v5070_v62  ;;  %2630 = vmatpush.msra.mxu3 %v5076_v1 }
 0x7ec   :  { %2573 = vmatpush.msra.mxu0 %v5068_v60  ;;  %2613 = vmatpush.msra.mxu2 %v5072_v46 }
 0x7ed   :  { %2591 = vmatpush.msra.mxu1 %v5082_v19  ;;  %2631 = vmatpush.msra.mxu3 %v5088_v44 }
 0x7ee   :  { %2574 = vmatpush.msra.mxu0 %v5080_v4  ;;  %2614 = vmatpush.msra.mxu2 %v5084_v21 }
 0x7ef   :  { %2592 = vmatpush.msra.mxu1 %v5094_v13  ;;  %2632 = vmatpush.msra.mxu3 %v5100_v0 }
 0x7f0   :  { %2575 = vmatpush.msra.mxu0 %v5092_v61  ;;  %2615 = vmatpush.msra.mxu2 %v5096_v50 }
 0x7f1   :  { %2593 = vmatpush.msra.mxu1 %v5106_v27  ;;  %2633 = vmatpush.msra.mxu3 %v5112_v29 }
 0x7f2   :  { %2576 = vmatpush.msra.mxu0 %v5104_v24  ;;  %2616 = vmatpush.msra.mxu2 %v5108_v28 }
 0x7f3   :  { %2594 = vmatpush.msra.mxu1 %v5118_v31  ;;  %2634 = vmatpush.msra.mxu3 %v5124_v33 }
 0x7f4   :  { %2577 = vmatpush.msra.mxu0 %v5116_v30  ;;  %2617 = vmatpush.msra.mxu2 %v5120_v32 }
 0x7f5   :  { %2595 = vmatpush.msra.mxu1 %v5130_v12  ;;  %2635 = vmatpush.msra.mxu3 %v5136_v15 }
 0x7f6   :  { %2578 = vmatpush.msra.mxu0 %v5128_v48  ;;  %2618 = vmatpush.msra.mxu2 %v5134_v14 }
 0x7f7   :  { %2596 = vmatpush.msra.mxu1 %v5142_v17  ;;  %2636 = vmatpush.msra.mxu3 %v5148_v20 }
 0x7f8   :  { %2579 = vmatpush.msra.mxu0 %v5140_v16  ;;  %2619 = vmatpush.msra.mxu2 %v5144_v18 }
 0x7f9   :  { %2597 = vmatpush.msra.mxu1 %v5154_v23  ;;  %2637 = vmatpush.msra.mxu3 %v5160_v26 }
 0x7fa   :  { %2580 = vmatpush.msra.mxu0 %v5152_v22  ;;  %2620 = vmatpush.msra.mxu2 %v5156_v25 }
 0x7fb   :  { %2598 = vmatpush.msra.mxu1 %v5166_v56 }
 0x7fc   :  { %2581 = vmatpush.msra.mxu0 %v5164_v41 }
 0x85b   :  { %v2278_v37 = vpop.f32.mrf.mxu0 }
 0x85c   :  { %v2279_v38 = vadd.f32 %v2278_v37, %v2259_v36  ;;  %v5168_v36 = vld [vmem:[#allocation5 + $0x18] sm:$0xff]  ;;  %v5172_v37 = vld [vmem:[#allocation5 + $0x148] sm:$0xff] }
 0x85d   :  { %5664 = vst [vmem:[#allocation15_spill] sm:$0xff] %v5168_v36  ;;  %2621 = vmatpush.msra.mxu2 %v5168_v36  ;;  %2638 = vmatpush.msra.mxu3 %v5172_v37 }
 0x85e   :  { %5665 = vst [vmem:[#allocation21_spill] sm:$0xff] %v5172_v37 }
 0x861   :  { %v2298_v39 = vpop.f32.mrf.mxu1  ;;  %v2318_v45 = vpop.f32.mrf.mxu2 }
 0x862   :  { %v2299_v40 = vadd.f32 %v2298_v39, %v2279_v38  ;;  %v2319_v47 = vadd.f32 %v2318_v45, %v2260_v42  ;;  %v5176_v38 = vld [vmem:[#allocation5] sm:$0xff]  ;;  %v5178_v39 = vld [vmem:[#allocation5 + $0x130] sm:$0xff]  ;;  %v5184_v42 = vld [vmem:[#allocation5 + $0x138] sm:$0xff] }
 0x863   :  { %5666 = vst [vmem:[#allocation23_spill] sm:$0xff] %v5176_v38  ;;  %2582 = vmatpush.msra.mxu0 %v5176_v38  ;;  %2599 = vmatpush.msra.mxu1 %v5178_v39  ;;  %v5188_v45 = vld [vmem:[#allocation5 + $0x120] sm:$0xff] }
 0x864   :  { %3346 = vtanh.f32 %v2299_v40  ;;  %5667 = vst [vmem:[#allocation24_spill] sm:$0xff] %v5178_v39  ;;  %v5180_v40 = vld [vmem:[#allocation5 + $0x8] sm:$0xff]  ;;  %2639 = vmatpush.msra.mxu3 %v5184_v42 }
 0x865   :  { %5668 = vst [vmem:[#allocation25_spill] sm:$0xff] %v5180_v40  ;;  %2622 = vmatpush.msra.mxu2 %v5180_v40  ;;  %2600 = vmatpush.msra.mxu1 %v5188_v45 }
 0x866   :  { %5669 = vst [vmem:[#allocation26_spill] sm:$0xff] %v5184_v42 }
 0x867   :  { %v2338_v2 = vpop.f32.mrf.mxu3  ;;  %5670 = vst [vmem:[#allocation27_spill] sm:$0xff] %v5188_v45 }
 0x868   :  { %v2339_v3 = vadd.f32 %v2338_v2, %v2319_v47  ;;  %v5190_v47 = vld [vmem:[#allocation5 + $0x128] sm:$0xff]  ;;  %v5192_v2 = vld [vmem:[#allocation5 + $0x110] sm:$0xff] }
 0x869   :  { %5671 = vst [vmem:[#allocation28_spill] sm:$0xff] %v5190_v47  ;;  %2640 = vmatpush.msra.mxu3 %v5190_v47  ;;  %2601 = vmatpush.msra.mxu1 %v5192_v2 }
 0x86a   :  { %v3347_v54 = vpop.eup %3346  ;;  %3348 = vtanh.f32 %v2339_v3  ;;  %v5195_v3 = vld [vmem:[#allocation5 + $0x118] sm:$0xff] }
 0x86b   :  { %2430 = vmatmul.f32.vlgmr.msrb.gmra.mxu0 %v3347_v54  ;;  %2470 = vmatmul.f32.vlgmr.msrb.gmra.mxu2 %v3347_v54  ;;  %v5199_v54 = vld [vmem:[#allocation5 + $0x100] sm:$0xff] }
 0x86c   :  { %2720 = vmatpush.msrb.mxu0 %v5014_v35  ;;  %2760 = vmatpush.msrb.mxu2 %v5016_v43 }
 0x86d   :  { %2641 = vmatpush.msra.mxu3 %v5195_v3  ;;  %2602 = vmatpush.msra.mxu1 %v5199_v54 }
 0x86e   :  { %2721 = vmatpush.msrb.mxu0 %v5018_v5  ;;  %2761 = vmatpush.msrb.mxu2 %v5022_v6 }
 0x870   :  { %v3349_v63 = vpop.eup %3348  ;;  %2722 = vmatpush.msrb.mxu0 %v5024_v7  ;;  %2762 = vmatpush.msrb.mxu2 %v5026_v8 }
 0x871   :  { %2450 = vmatmul.f32.vlgmr.msrb.gmra.mxu1 %v3349_v63  ;;  %2490 = vmatmul.f32.vlgmr.msrb.gmra.mxu3 %v3349_v63  ;;  %v5203_v63 = vld [vmem:[#allocation5 + $0x108] sm:$0xff] }
 0x872   :  { %2642 = vmatpush.msra.mxu3 %v5203_v63  ;;  %2723 = vmatpush.msrb.mxu0 %v5034_v11 }
 0x873   :  { %2740 = vmatpush.msrb.mxu1 %v5028_v9  ;;  %2763 = vmatpush.msrb.mxu2 %v5037_v34 }
 0x874   :  { %2780 = vmatpush.msrb.mxu3 %v5032_v10  ;;  %2724 = vmatpush.msrb.mxu0 %v5044_v49 }
 0x875   :  { %2741 = vmatpush.msrb.mxu1 %v5046_v51  ;;  %2764 = vmatpush.msrb.mxu2 %v5048_v52 }
 0x876   :  { %2781 = vmatpush.msrb.mxu3 %v5052_v53  ;;  %2725 = vmatpush.msrb.mxu0 %v5056_v55 }
 0x877   :  { %2742 = vmatpush.msrb.mxu1 %v5058_v57  ;;  %2765 = vmatpush.msrb.mxu2 %v5060_v58  ;;  %v2412_v58 = vld [vmem:[#allocation2 + $0x100] sm:$0xff] }
 0x878   :  { %2782 = vmatpush.msrb.mxu3 %v5064_v59  ;;  %2726 = vmatpush.msrb.mxu0 %v5068_v60 }
 0x879   :  { %2743 = vmatpush.msrb.mxu1 %v5070_v62  ;;  %2766 = vmatpush.msrb.mxu2 %v5072_v46 }
 0x87a   :  { %2783 = vmatpush.msrb.mxu3 %v5076_v1  ;;  %2727 = vmatpush.msrb.mxu0 %v5080_v4 }
 0x87b   :  { %2744 = vmatpush.msrb.mxu1 %v5082_v19  ;;  %2767 = vmatpush.msrb.mxu2 %v5084_v21 }
 0x87c   :  { %2784 = vmatpush.msrb.mxu3 %v5088_v44  ;;  %2728 = vmatpush.msrb.mxu0 %v5092_v61 }
 0x87d   :  { %2745 = vmatpush.msrb.mxu1 %v5094_v13  ;;  %2768 = vmatpush.msrb.mxu2 %v5096_v50 }
 0x87e   :  { %2785 = vmatpush.msrb.mxu3 %v5100_v0  ;;  %2729 = vmatpush.msrb.mxu0 %v5104_v24  ;;  %v2413_v24 = vld [vmem:[#allocation2 + $0x108] sm:$0xff] }
 0x87f   :  { %2746 = vmatpush.msrb.mxu1 %v5106_v27  ;;  %2769 = vmatpush.msrb.mxu2 %v5108_v28 }
 0x880   :  { %2786 = vmatpush.msrb.mxu3 %v5112_v29  ;;  %2730 = vmatpush.msrb.mxu0 %v5116_v30 }
 0x881   :  { %2747 = vmatpush.msrb.mxu1 %v5118_v31  ;;  %2770 = vmatpush.msrb.mxu2 %v5120_v32 }
 0x882   :  { %2787 = vmatpush.msrb.mxu3 %v5124_v33  ;;  %2731 = vmatpush.msrb.mxu0 %v5128_v48 }
 0x883   :  { %2748 = vmatpush.msrb.mxu1 %v5130_v12  ;;  %2771 = vmatpush.msrb.mxu2 %v5134_v14 }
 0x884   :  { %2788 = vmatpush.msrb.mxu3 %v5136_v15  ;;  %2732 = vmatpush.msrb.mxu0 %v5140_v16 }
 0x885   :  { %2749 = vmatpush.msrb.mxu1 %v5142_v17  ;;  %2772 = vmatpush.msrb.mxu2 %v5144_v18 }
 0x886   :  { %2789 = vmatpush.msrb.mxu3 %v5148_v20  ;;  %2733 = vmatpush.msrb.mxu0 %v5152_v22 }
 0x887   :  { %2750 = vmatpush.msrb.mxu1 %v5154_v23  ;;  %2773 = vmatpush.msrb.mxu2 %v5156_v25 }
 0x888   :  { %2790 = vmatpush.msrb.mxu3 %v5160_v26  ;;  %2734 = vmatpush.msrb.mxu0 %v5164_v41 }
 0x889   :  { %2751 = vmatpush.msrb.mxu1 %v5166_v56  ;;  %2774 = vmatpush.msrb.mxu2 %v5168_v36 }
 0x88a   :  { %2791 = vmatpush.msrb.mxu3 %v5172_v37  ;;  %2735 = vmatpush.msrb.mxu0 %v5176_v38 }
 0x88b   :  { %2752 = vmatpush.msrb.mxu1 %v5178_v39  ;;  %2775 = vmatpush.msrb.mxu2 %v5180_v40 }
 0x88c   :  { %2792 = vmatpush.msrb.mxu3 %v5184_v42 }
 0x88d   :  { %2753 = vmatpush.msrb.mxu1 %v5188_v45 }
 0x88e   :  { %2793 = vmatpush.msrb.mxu3 %v5190_v47 }
 0x88f   :  { %2754 = vmatpush.msrb.mxu1 %v5192_v2 }
 0x890   :  { %2794 = vmatpush.msrb.mxu3 %v5195_v3 }
 0x891   :  { %2755 = vmatpush.msrb.mxu1 %v5199_v54 }
 0x892   :  { %2795 = vmatpush.msrb.mxu3 %v5203_v63 }
 0x8e8   :  { %v2431_v60 = vpop.f32.mrf.mxu0 }
 0x8e9   :  { %v2432_v21 = vadd.f32 %v2431_v60, %v2412_v58 }
 0x8ee   :  { %v2451_v61 = vpop.f32.mrf.mxu1  ;;  %v2471_v27 = vpop.f32.mrf.mxu2 }
 0x8ef   :  { %v2452_v50 = vadd.f32 %v2451_v61, %v2432_v21  ;;  %v2472_v58 = vadd.f32 %v2471_v27, %v2413_v24  ;;  %v5672_v24 = vld [vmem:[#allocation14_spill] sm:$0xff]  ;;  %v5673_v27 = vld [vmem:[#allocation13_spill] sm:$0xff] }
 0x8f1   :  { %3350 = vtanh.f32 %v2452_v50 }
 0x8f4   :  { %v2491_v60 = vpop.f32.mrf.mxu3 }
 0x8f5   :  { %v2492_v21 = vadd.f32 %v2491_v60, %v2472_v58  ;;  %v5674_v58 = vld [vmem:[#allocation11_spill] sm:$0xff]  ;;  %v5675_v60 = vld [vmem:[#allocation18_spill] sm:$0xff] }
 0x8f7   :  { %v3351_v61 = vpop.eup %3350  ;;  %3352 = vtanh.f32 %v2492_v21  ;;  %v5676_v21 = vld [vmem:[#allocation17_spill] sm:$0xff] }
 0x8f8   :  { %2583 = vmatmul.f32.vlgmr.msra.gmra.mxu0 %v3351_v61  ;;  %2623 = vmatmul.f32.vlgmr.msra.gmra.mxu2 %v3351_v61  ;;  %v5677_v61 = vld [vmem:[#allocation16_spill] sm:$0xff] }
 0x8f9   :  { %2873 = vmatpush.msra.mxu0 %v5014_v35  ;;  %2913 = vmatpush.msra.mxu2 %v5016_v43 }
 0x8fb   :  { %2874 = vmatpush.msra.mxu0 %v5018_v5  ;;  %2914 = vmatpush.msra.mxu2 %v5022_v6 }
 0x8fd   :  { %v3353_v50 = vpop.eup %3352  ;;  %2875 = vmatpush.msra.mxu0 %v5024_v7  ;;  %2915 = vmatpush.msra.mxu2 %v5026_v8 }
 0x8fe   :  { %2603 = vmatmul.f32.vlgmr.msra.gmra.mxu1 %v3353_v50  ;;  %2643 = vmatmul.f32.vlgmr.msra.gmra.mxu3 %v3353_v50  ;;  %v5678_v50 = vld [vmem:[#allocation12_spill] sm:$0xff] }
 0x8ff   :  { %2893 = vmatpush.msra.mxu1 %v5028_v9  ;;  %2933 = vmatpush.msra.mxu3 %v5032_v10 }
 0x900   :  { %2876 = vmatpush.msra.mxu0 %v5034_v11  ;;  %2916 = vmatpush.msra.mxu2 %v5037_v34 }
 0x901   :  { %2894 = vmatpush.msra.mxu1 %v5046_v51  ;;  %2934 = vmatpush.msra.mxu3 %v5052_v53 }
 0x902   :  { %2877 = vmatpush.msra.mxu0 %v5044_v49  ;;  %2917 = vmatpush.msra.mxu2 %v5048_v52 }
 0x903   :  { %2895 = vmatpush.msra.mxu1 %v5058_v57  ;;  %2935 = vmatpush.msra.mxu3 %v5064_v59 }
 0x904   :  { %2878 = vmatpush.msra.mxu0 %v5056_v55  ;;  %2918 = vmatpush.msra.mxu2 %v5672_v24 }
 0x905   :  { %2896 = vmatpush.msra.mxu1 %v5070_v62  ;;  %2936 = vmatpush.msra.mxu3 %v5076_v1 }
 0x906   :  { %2879 = vmatpush.msra.mxu0 %v5673_v27  ;;  %2919 = vmatpush.msra.mxu2 %v5072_v46 }
 0x907   :  { %2897 = vmatpush.msra.mxu1 %v5082_v19  ;;  %2937 = vmatpush.msra.mxu3 %v5088_v44 }
 0x908   :  { %2880 = vmatpush.msra.mxu0 %v5080_v4  ;;  %2920 = vmatpush.msra.mxu2 %v5674_v58 }
 0x909   :  { %2898 = vmatpush.msra.mxu1 %v5094_v13  ;;  %2938 = vmatpush.msra.mxu3 %v5100_v0 }
 0x90a   :  { %2881 = vmatpush.msra.mxu0 %v5675_v60  ;;  %2921 = vmatpush.msra.mxu2 %v5676_v21 }
 0x90b   :  { %2899 = vmatpush.msra.mxu1 %v5677_v61  ;;  %2939 = vmatpush.msra.mxu3 %v5112_v29 }
 0x90c   :  { %2882 = vmatpush.msra.mxu0 %v5678_v50  ;;  %2922 = vmatpush.msra.mxu2 %v5108_v28 }
 0x90d   :  { %2900 = vmatpush.msra.mxu1 %v5118_v31  ;;  %2940 = vmatpush.msra.mxu3 %v5124_v33 }
 0x90e   :  { %2883 = vmatpush.msra.mxu0 %v5116_v30  ;;  %2923 = vmatpush.msra.mxu2 %v5120_v32 }
 0x90f   :  { %2901 = vmatpush.msra.mxu1 %v5130_v12  ;;  %2941 = vmatpush.msra.mxu3 %v5136_v15 }
 0x910   :  { %2884 = vmatpush.msra.mxu0 %v5128_v48  ;;  %2924 = vmatpush.msra.mxu2 %v5134_v14 }
 0x911   :  { %2902 = vmatpush.msra.mxu1 %v5142_v17  ;;  %2942 = vmatpush.msra.mxu3 %v5148_v20 }
 0x912   :  { %2885 = vmatpush.msra.mxu0 %v5140_v16  ;;  %2925 = vmatpush.msra.mxu2 %v5144_v18 }
 0x913   :  { %2903 = vmatpush.msra.mxu1 %v5154_v23  ;;  %2943 = vmatpush.msra.mxu3 %v5160_v26 }
 0x914   :  { %2886 = vmatpush.msra.mxu0 %v5152_v22  ;;  %2926 = vmatpush.msra.mxu2 %v5156_v25 }
 0x915   :  { %2904 = vmatpush.msra.mxu1 %v5166_v56  ;;  %2944 = vmatpush.msra.mxu3 %v5172_v37  ;;  %v2565_v37 = vld [vmem:[#allocation2 + $0x110] sm:$0xff] }
 0x916   :  { %2887 = vmatpush.msra.mxu0 %v5164_v41  ;;  %2927 = vmatpush.msra.mxu2 %v5168_v36 }
 0x917   :  { %2905 = vmatpush.msra.mxu1 %v5178_v39  ;;  %2945 = vmatpush.msra.mxu3 %v5184_v42 }
 0x918   :  { %2888 = vmatpush.msra.mxu0 %v5176_v38  ;;  %2928 = vmatpush.msra.mxu2 %v5180_v40  ;;  %v2566_v38 = vld [vmem:[#allocation2 + $0x118] sm:$0xff] }
 0x919   :  { %2906 = vmatpush.msra.mxu1 %v5188_v45  ;;  %2946 = vmatpush.msra.mxu3 %v5190_v47 }
 0x91b   :  { %2907 = vmatpush.msra.mxu1 %v5192_v2  ;;  %2947 = vmatpush.msra.mxu3 %v5195_v3 }
 0x91d   :  { %2908 = vmatpush.msra.mxu1 %v5199_v54  ;;  %2948 = vmatpush.msra.mxu3 %v5203_v63 }
 0x975   :  { %v2584_v39 = vpop.f32.mrf.mxu0 }
 0x976   :  { %v2585_v36 = vadd.f32 %v2584_v39, %v2565_v37  ;;  %v3135_v39 = vld [vmem:[#allocation5 + $0xb8] sm:$0xff] }
 0x97b   :  { %v2604_v42 = vpop.f32.mrf.mxu1  ;;  %v2624_v41 = vpop.f32.mrf.mxu2 }
 0x97c   :  { %v2605_v56 = vadd.f32 %v2604_v42, %v2585_v36  ;;  %v2625_v40 = vadd.f32 %v2624_v41, %v2566_v38  ;;  %v3134_v36 = vld [vmem:[#allocation5 + $0xb0] sm:$0xff]  ;;  %v3172_v38 = vld [vmem:[#allocation5 + $0x1e0] sm:$0xff] }
 0x97d   :  { %v3132_v42 = vld [vmem:[#allocation5 + $0xa0] sm:$0xff] }
 0x97e   :  { %3354 = vtanh.f32 %v2605_v56 }
 0x981   :  { %v2644_v45 = vpop.f32.mrf.mxu3 }
 0x982   :  { %v2645_v26 = vadd.f32 %v2644_v45, %v2625_v40  ;;  %v3173_v40 = vld [vmem:[#allocation5 + $0x1e8] sm:$0xff]  ;;  %v3170_v45 = vld [vmem:[#allocation5 + $0x1d0] sm:$0xff] }
 0x984   :  { %v3355_v47 = vpop.eup %3354  ;;  %3356 = vtanh.f32 %v2645_v26 }
 0x985   :  { %2736 = vmatmul.f32.vlgmr.msrb.gmra.mxu0 %v3355_v47  ;;  %2776 = vmatmul.f32.vlgmr.msrb.gmra.mxu2 %v3355_v47  ;;  %v3133_v47 = vld [vmem:[#allocation5 + $0xa8] sm:$0xff] }
 0x986   :  { %3026 = vmatpush.msrb.mxu0 %v5014_v35  ;;  %3066 = vmatpush.msrb.mxu2 %v5016_v43  ;;  %v5679_v35 = vld [vmem:[#allocation22_spill] sm:$0xff]  ;;  %v5680_v43 = vld [vmem:[#allocation20_spill] sm:$0xff] }
 0x988   :  { %3027 = vmatpush.msrb.mxu0 %v5018_v5  ;;  %3067 = vmatpush.msrb.mxu2 %v5022_v6  ;;  %v5681_v5 = vld [vmem:[#allocation19_spill] sm:$0xff] }
 0x989   :  { %v5682_v6 = vld [vmem:[#allocation15_spill] sm:$0xff] }
 0x98a   :  { %v3357_v37 = vpop.eup %3356  ;;  %3028 = vmatpush.msrb.mxu0 %v5024_v7  ;;  %3068 = vmatpush.msrb.mxu2 %v5026_v8  ;;  %v5683_v7 = vld [vmem:[#allocation21_spill] sm:$0xff]  ;;  %v5684_v8 = vld [vmem:[#allocation23_spill] sm:$0xff] }
 0x98b   :  { %2756 = vmatmul.f32.vlgmr.msrb.gmra.mxu1 %v3357_v37  ;;  %2796 = vmatmul.f32.vlgmr.msrb.gmra.mxu3 %v3357_v37  ;;  %v3127_v37 = vld [vmem:[#allocation5 + $0x78] sm:$0xff] }
 0x98c   :  { %3029 = vmatpush.msrb.mxu0 %v5034_v11  ;;  %3046 = vmatpush.msrb.mxu1 %v5028_v9  ;;  %v5685_v9 = vld [vmem:[#allocation24_spill] sm:$0xff]  ;;  %v5687_v11 = vld [vmem:[#allocation26_spill] sm:$0xff] }
 0x98d   :  { %3069 = vmatpush.msrb.mxu2 %v5037_v34  ;;  %3086 = vmatpush.msrb.mxu3 %v5032_v10  ;;  %v5686_v10 = vld [vmem:[#allocation25_spill] sm:$0xff]  ;;  %v5688_v34 = vld [vmem:[#allocation27_spill] sm:$0xff] }
 0x98e   :  { %3030 = vmatpush.msrb.mxu0 %v5044_v49  ;;  %3047 = vmatpush.msrb.mxu1 %v5046_v51  ;;  %v5689_v49 = vld [vmem:[#allocation28_spill] sm:$0xff]  ;;  %v2718_v51 = vld [vmem:[#allocation2 + $0x120] sm:$0xff] }
 0x98f   :  { %3070 = vmatpush.msrb.mxu2 %v5048_v52  ;;  %3087 = vmatpush.msrb.mxu3 %v5052_v53 }
 0x990   :  { %3031 = vmatpush.msrb.mxu0 %v5056_v55  ;;  %3048 = vmatpush.msrb.mxu1 %v5058_v57 }
 0x991   :  { %3071 = vmatpush.msrb.mxu2 %v5672_v24  ;;  %3088 = vmatpush.msrb.mxu3 %v5064_v59  ;;  %v2719_v59 = vld [vmem:[#allocation2 + $0x128] sm:$0xff] }
 0x992   :  { %3032 = vmatpush.msrb.mxu0 %v5673_v27  ;;  %3049 = vmatpush.msrb.mxu1 %v5070_v62  ;;  %v3169_v24 = vld [vmem:[#allocation5 + $0x1c8] sm:$0xff]  ;;  %v3128_v27 = vld [vmem:[#allocation5 + $0x80] sm:$0xff] }
 0x993   :  { %3072 = vmatpush.msrb.mxu2 %v5072_v46  ;;  %3089 = vmatpush.msrb.mxu3 %v5076_v1 }
 0x994   :  { %3033 = vmatpush.msrb.mxu0 %v5080_v4  ;;  %3050 = vmatpush.msrb.mxu1 %v5082_v19 }
 0x995   :  { %3073 = vmatpush.msrb.mxu2 %v5674_v58  ;;  %3090 = vmatpush.msrb.mxu3 %v5088_v44  ;;  %v3166_v58 = vld [vmem:[#allocation5 + $0x1b0] sm:$0xff] }
 0x996   :  { %3034 = vmatpush.msrb.mxu0 %v5675_v60  ;;  %3051 = vmatpush.msrb.mxu1 %v5094_v13  ;;  %v3142_v13 = vld [vmem:[#allocation5 + $0xf0] sm:$0xff]  ;;  %v3129_v60 = vld [vmem:[#allocation5 + $0x88] sm:$0xff] }
 0x997   :  { %3074 = vmatpush.msrb.mxu2 %v5676_v21  ;;  %3091 = vmatpush.msrb.mxu3 %v5100_v0  ;;  %v3143_v0 = vld [vmem:[#allocation5 + $0xf8] sm:$0xff] }
 0x998   :  { %3035 = vmatpush.msrb.mxu0 %v5678_v50  ;;  %3052 = vmatpush.msrb.mxu1 %v5677_v61  ;;  %v3167_v21 = vld [vmem:[#allocation5 + $0x1b8] sm:$0xff]  ;;  %v3126_v61 = vld [vmem:[#allocation5 + $0x70] sm:$0xff]  ;;  %v3164_v50 = vld [vmem:[#allocation5 + $0x1a0] sm:$0xff] }
 0x999   :  { %3075 = vmatpush.msrb.mxu2 %v5108_v28  ;;  %3092 = vmatpush.msrb.mxu3 %v5112_v29  ;;  %v3140_v28 = vld [vmem:[#allocation5 + $0xe0] sm:$0xff]  ;;  %v3141_v29 = vld [vmem:[#allocation5 + $0xe8] sm:$0xff] }
 0x99a   :  { %3036 = vmatpush.msrb.mxu0 %v5116_v30  ;;  %3053 = vmatpush.msrb.mxu1 %v5118_v31  ;;  %v3138_v30 = vld [vmem:[#allocation5 + $0xd0] sm:$0xff]  ;;  %v3139_v31 = vld [vmem:[#allocation5 + $0xd8] sm:$0xff] }
 0x99b   :  { %3076 = vmatpush.msrb.mxu2 %v5120_v32  ;;  %3093 = vmatpush.msrb.mxu3 %v5124_v33  ;;  %v3174_v32 = vld [vmem:[#allocation5 + $0x1f0] sm:$0xff]  ;;  %v3175_v33 = vld [vmem:[#allocation5 + $0x1f8] sm:$0xff] }
 0x99c   :  { %3037 = vmatpush.msrb.mxu0 %v5128_v48  ;;  %3054 = vmatpush.msrb.mxu1 %v5130_v12  ;;  %v3136_v48 = vld [vmem:[#allocation5 + $0xc0] sm:$0xff]  ;;  %v3137_v12 = vld [vmem:[#allocation5 + $0xc8] sm:$0xff] }
 0x99d   :  { %3077 = vmatpush.msrb.mxu2 %v5134_v14  ;;  %3094 = vmatpush.msrb.mxu3 %v5136_v15  ;;  %v2871_v14 = vld [vmem:[#allocation2 + $0x130] sm:$0xff] }
 0x99e   :  { %3038 = vmatpush.msrb.mxu0 %v5140_v16  ;;  %3055 = vmatpush.msrb.mxu1 %v5142_v17 }
 0x99f   :  { %3078 = vmatpush.msrb.mxu2 %v5144_v18  ;;  %3095 = vmatpush.msrb.mxu3 %v5148_v20  ;;  %v2872_v20 = vld [vmem:[#allocation2 + $0x138] sm:$0xff] }
 0x9a0   :  { %3039 = vmatpush.msrb.mxu0 %v5152_v22  ;;  %3056 = vmatpush.msrb.mxu1 %v5154_v23 }
 0x9a1   :  { %3079 = vmatpush.msrb.mxu2 %v5156_v25  ;;  %3096 = vmatpush.msrb.mxu3 %v5679_v35  ;;  %v3165_v35 = vld [vmem:[#allocation5 + $0x1a8] sm:$0xff] }
 0x9a2   :  { %3040 = vmatpush.msrb.mxu0 %v5680_v43  ;;  %3057 = vmatpush.msrb.mxu1 %v5681_v5  ;;  %v3124_v43 = vld [vmem:[#allocation5 + $0x60] sm:$0xff]  ;;  %v3162_v5 = vld [vmem:[#allocation5 + $0x190] sm:$0xff] }
 0x9a3   :  { %3080 = vmatpush.msrb.mxu2 %v5682_v6  ;;  %3097 = vmatpush.msrb.mxu3 %v5683_v7  ;;  %v3125_v6 = vld [vmem:[#allocation5 + $0x68] sm:$0xff]  ;;  %v3163_v7 = vld [vmem:[#allocation5 + $0x198] sm:$0xff] }
 0x9a4   :  { %3041 = vmatpush.msrb.mxu0 %v5684_v8  ;;  %3058 = vmatpush.msrb.mxu1 %v5685_v9  ;;  %v3122_v8 = vld [vmem:[#allocation5 + $0x50] sm:$0xff]  ;;  %v3160_v9 = vld [vmem:[#allocation5 + $0x180] sm:$0xff] }
 0x9a5   :  { %3081 = vmatpush.msrb.mxu2 %v5686_v10  ;;  %3098 = vmatpush.msrb.mxu3 %v5687_v11  ;;  %v3123_v10 = vld [vmem:[#allocation5 + $0x58] sm:$0xff]  ;;  %v3161_v11 = vld [vmem:[#allocation5 + $0x188] sm:$0xff] }
 0x9a6   :  { %3059 = vmatpush.msrb.mxu1 %v5688_v34  ;;  %v3120_v34 = vld [vmem:[#allocation5 + $0x40] sm:$0xff] }
 0x9a7   :  { %3099 = vmatpush.msrb.mxu3 %v5689_v49  ;;  %v3158_v49 = vld [vmem:[#allocation5 + $0x170] sm:$0xff] }
 0x9a8   :  { %3060 = vmatpush.msrb.mxu1 %v5192_v2  ;;  %v3171_v2 = vld [vmem:[#allocation5 + $0x1d8] sm:$0xff] }
 0x9a9   :  { %3100 = vmatpush.msrb.mxu3 %v5195_v3  ;;  %v3130_v3 = vld [vmem:[#allocation5 + $0x90] sm:$0xff] }
 0x9aa   :  { %3061 = vmatpush.msrb.mxu1 %v5199_v54  ;;  %v3168_v54 = vld [vmem:[#allocation5 + $0x1c0] sm:$0xff] }
 0x9ab   :  { %3101 = vmatpush.msrb.mxu3 %v5203_v63  ;;  %v3131_v63 = vld [vmem:[#allocation5 + $0x98] sm:$0xff] }
 0xa02   :  { %v2737_v52 = vpop.f32.mrf.mxu0 }
 0xa03   :  { %v2738_v53 = vadd.f32 %v2737_v52, %v2718_v51  ;;  %v3121_v51 = vld [vmem:[#allocation5 + $0x48] sm:$0xff]  ;;  %v3159_v52 = vld [vmem:[#allocation5 + $0x178] sm:$0xff] }
 0xa08   :  { %v2757_v55 = vpop.f32.mrf.mxu1  ;;  %v2777_v62 = vpop.f32.mrf.mxu2 }
 0xa09   :  { %v2758_v57 = vadd.f32 %v2757_v55, %v2738_v53  ;;  %v2778_v46 = vadd.f32 %v2777_v62, %v2719_v59  ;;  %v3118_v53 = vld [vmem:[#allocation5 + $0x30] sm:$0xff]  ;;  %v3156_v55 = vld [vmem:[#allocation5 + $0x160] sm:$0xff]  ;;  %v3157_v59 = vld [vmem:[#allocation5 + $0x168] sm:$0xff] }
 0xa0a   :  { %v3116_v62 = vld [vmem:[#allocation5 + $0x20] sm:$0xff] }
 0xa0b   :  { %3358 = vtanh.f32 %v2758_v57  ;;  %v3119_v57 = vld [vmem:[#allocation5 + $0x38] sm:$0xff] }
 0xa0e   :  { %v2797_v1 = vpop.f32.mrf.mxu3 }
 0xa0f   :  { %v2798_v4 = vadd.f32 %v2797_v1, %v2778_v46  ;;  %v3154_v46 = vld [vmem:[#allocation5 + $0x150] sm:$0xff]  ;;  %v3117_v1 = vld [vmem:[#allocation5 + $0x28] sm:$0xff] }
 0xa11   :  { %v3359_v19 = vpop.eup %3358  ;;  %3360 = vtanh.f32 %v2798_v4  ;;  %v3155_v4 = vld [vmem:[#allocation5 + $0x158] sm:$0xff] }
 0xa12   :  { %2889 = vmatmul.f32.vlgmr.msra.gmra.mxu0 %v3359_v19  ;;  %2929 = vmatmul.f32.vlgmr.msra.gmra.mxu2 %v3359_v19  ;;  %v3114_v19 = vld [vmem:[#allocation5 + $0x10] sm:$0xff] }
 0xa13   :  { %3179 = vmatpush.msra.mxu0 %v3142_v13  ;;  %3219 = vmatpush.msra.mxu2 %v3143_v0  ;;  %v3115_v13 = vld [vmem:[#allocation5 + $0x18] sm:$0xff]  ;;  %v3153_v0 = vld [vmem:[#allocation5 + $0x148] sm:$0xff] }
 0xa15   :  { %3180 = vmatpush.msra.mxu0 %v3140_v28  ;;  %3220 = vmatpush.msra.mxu2 %v3141_v29  ;;  %v3112_v28 = vld [vmem:[#allocation5] sm:$0xff]  ;;  %v3150_v29 = vld [vmem:[#allocation5 + $0x130] sm:$0xff] }
 0xa17   :  { %v3361_v44 = vpop.eup %3360  ;;  %3181 = vmatpush.msra.mxu0 %v3138_v30  ;;  %3221 = vmatpush.msra.mxu2 %v3139_v31  ;;  %v3113_v30 = vld [vmem:[#allocation5 + $0x8] sm:$0xff]  ;;  %v3151_v31 = vld [vmem:[#allocation5 + $0x138] sm:$0xff] }
 0xa18   :  { %2909 = vmatmul.f32.vlgmr.msra.gmra.mxu1 %v3361_v44  ;;  %2949 = vmatmul.f32.vlgmr.msra.gmra.mxu3 %v3361_v44  ;;  %v3152_v44 = vld [vmem:[#allocation5 + $0x140] sm:$0xff] }
 0xa19   :  { %3199 = vmatpush.msra.mxu1 %v3174_v32  ;;  %3239 = vmatpush.msra.mxu3 %v3175_v33  ;;  %v3148_v32 = vld [vmem:[#allocation5 + $0x120] sm:$0xff]  ;;  %v3149_v33 = vld [vmem:[#allocation5 + $0x128] sm:$0xff] }
 0xa1a   :  { %3182 = vmatpush.msra.mxu0 %v3136_v48  ;;  %3222 = vmatpush.msra.mxu2 %v3137_v12  ;;  %v3146_v48 = vld [vmem:[#allocation5 + $0x110] sm:$0xff]  ;;  %v3147_v12 = vld [vmem:[#allocation5 + $0x118] sm:$0xff] }
 0xa1b   :  { %3200 = vmatpush.msra.mxu1 %v3172_v38  ;;  %3240 = vmatpush.msra.mxu3 %v3173_v40 }
 0xa1c   :  { %3183 = vmatpush.msra.mxu0 %v3134_v36  ;;  %3223 = vmatpush.msra.mxu2 %v3135_v39  ;;  %v3177_v39 = vld [vmem:[#allocation2 + $0x150] sm:$0xff] }
 0xa1d   :  { %3201 = vmatpush.msra.mxu1 %v3170_v45  ;;  %3241 = vmatpush.msra.mxu3 %v3171_v2  ;;  %v3178_v2 = vld [vmem:[#allocation2 + $0x158] sm:$0xff] }
 0xa1e   :  { %3184 = vmatpush.msra.mxu0 %v3132_v42  ;;  %3224 = vmatpush.msra.mxu2 %v3133_v47 }
 0xa1f   :  { %3202 = vmatpush.msra.mxu1 %v3168_v54  ;;  %3242 = vmatpush.msra.mxu3 %v3169_v24 }
 0xa20   :  { %3185 = vmatpush.msra.mxu0 %v3130_v3  ;;  %3225 = vmatpush.msra.mxu2 %v3131_v63 }
 0xa21   :  { %3203 = vmatpush.msra.mxu1 %v3166_v58  ;;  %3243 = vmatpush.msra.mxu3 %v3167_v21 }
 0xa22   :  { %3186 = vmatpush.msra.mxu0 %v3128_v27  ;;  %3226 = vmatpush.msra.mxu2 %v3129_v60 }
 0xa23   :  { %3204 = vmatpush.msra.mxu1 %v3164_v50  ;;  %3244 = vmatpush.msra.mxu3 %v3165_v35 }
 0xa24   :  { %3187 = vmatpush.msra.mxu0 %v3126_v61  ;;  %3227 = vmatpush.msra.mxu2 %v3127_v37 }
 0xa25   :  { %3205 = vmatpush.msra.mxu1 %v3162_v5  ;;  %3245 = vmatpush.msra.mxu3 %v3163_v7 }
 0xa26   :  { %3188 = vmatpush.msra.mxu0 %v3124_v43  ;;  %3228 = vmatpush.msra.mxu2 %v3125_v6 }
 0xa27   :  { %3206 = vmatpush.msra.mxu1 %v3160_v9  ;;  %3246 = vmatpush.msra.mxu3 %v3161_v11 }
 0xa28   :  { %3189 = vmatpush.msra.mxu0 %v3122_v8  ;;  %3229 = vmatpush.msra.mxu2 %v3123_v10 }
 0xa29   :  { %3207 = vmatpush.msra.mxu1 %v3158_v49  ;;  %3247 = vmatpush.msra.mxu3 %v3159_v52 }
 0xa2a   :  { %3190 = vmatpush.msra.mxu0 %v3120_v34  ;;  %3230 = vmatpush.msra.mxu2 %v3121_v51 }
 0xa2b   :  { %3208 = vmatpush.msra.mxu1 %v3156_v55  ;;  %3248 = vmatpush.msra.mxu3 %v3157_v59 }
 0xa2c   :  { %3191 = vmatpush.msra.mxu0 %v3118_v53  ;;  %3231 = vmatpush.msra.mxu2 %v3119_v57 }
 0xa2d   :  { %3209 = vmatpush.msra.mxu1 %v3154_v46  ;;  %3249 = vmatpush.msra.mxu3 %v3155_v4 }
 0xa2e   :  { %3192 = vmatpush.msra.mxu0 %v3116_v62  ;;  %3232 = vmatpush.msra.mxu2 %v3117_v1 }
 0xa2f   :  { %3210 = vmatpush.msra.mxu1 %v3152_v44  ;;  %3250 = vmatpush.msra.mxu3 %v3153_v0 }
 0xa30   :  { %3193 = vmatpush.msra.mxu0 %v3114_v19  ;;  %3233 = vmatpush.msra.mxu2 %v3115_v13 }
 0xa31   :  { %3211 = vmatpush.msra.mxu1 %v3150_v29  ;;  %3251 = vmatpush.msra.mxu3 %v3151_v31 }
 0xa32   :  { %3194 = vmatpush.msra.mxu0 %v3112_v28  ;;  %3234 = vmatpush.msra.mxu2 %v3113_v30 }
 0xa33   :  { %3212 = vmatpush.msra.mxu1 %v3148_v32  ;;  %3252 = vmatpush.msra.mxu3 %v3149_v33 }
 0xa35   :  { %3213 = vmatpush.msra.mxu1 %v3146_v48  ;;  %3253 = vmatpush.msra.mxu3 %v3147_v12 }
 0xa8f   :  { %v2890_v15 = vpop.f32.mrf.mxu0 }
 0xa90   :  { %v2891_v16 = vadd.f32 %v2890_v15, %v2871_v14  ;;  %v3144_v14 = vld [vmem:[#allocation5 + $0x100] sm:$0xff]  ;;  %v3145_v15 = vld [vmem:[#allocation5 + $0x108] sm:$0xff] }
 0xa91   :  { %3214 = vmatpush.msra.mxu1 %v3144_v14  ;;  %3254 = vmatpush.msra.mxu3 %v3145_v15 }
 0xa95   :  { %v2910_v17 = vpop.f32.mrf.mxu1  ;;  %v2930_v22 = vpop.f32.mrf.mxu2 }
 0xa96   :  { %v2911_v18 = vadd.f32 %v2910_v17, %v2891_v16  ;;  %v2931_v23 = vadd.f32 %v2930_v22, %v2872_v20  ;;  %v3024_v16 = vld [vmem:[#allocation2 + $0x140] sm:$0xff] }
 0xa98   :  { %3362 = vtanh.f32 %v2911_v18 }
 0xa9b   :  { %v2950_v25 = vpop.f32.mrf.mxu3 }
 0xa9c   :  { %v2951_v26 = vadd.f32 %v2950_v25, %v2931_v23  ;;  %v3025_v23 = vld [vmem:[#allocation2 + $0x148] sm:$0xff] }
 0xa9e   :  { %v3363_v41 = vpop.eup %3362  ;;  %3364 = vtanh.f32 %v2951_v26 }
 0xa9f   :  { %3042 = vmatmul.f32.vlgmr.msrb.gmra.mxu0 %v3363_v41  ;;  %3082 = vmatmul.f32.vlgmr.msrb.gmra.mxu2 %v3363_v41 }
 0xaa4   :  { %v3365_v56 = vpop.eup %3364 }
 0xaa5   :  { %3062 = vmatmul.f32.vlgmr.msrb.gmra.mxu1 %v3365_v56  ;;  %3102 = vmatmul.f32.vlgmr.msrb.gmra.mxu3 %v3365_v56 }
 0xb1c   :  { %v3043_v17 = vpop.f32.mrf.mxu0 }
 0xb1d   :  { %v3044_v18 = vadd.f32 %v3043_v17, %v3024_v16 }
 0xb22   :  { %v3063_v20 = vpop.f32.mrf.mxu1  ;;  %v3083_v25 = vpop.f32.mrf.mxu2 }
 0xb23   :  { %v3064_v22 = vadd.f32 %v3063_v20, %v3044_v18  ;;  %v3084_v26 = vadd.f32 %v3083_v25, %v3025_v23 }
 0xb25   :  { %3366 = vtanh.f32 %v3064_v22 }
 0xb28   :  { %v3103_v41 = vpop.f32.mrf.mxu3 }
 0xb29   :  { %v3104_v56 = vadd.f32 %v3103_v41, %v3084_v26 }
 0xb2b   :  { %v3367_v36 = vpop.eup %3366  ;;  %3368 = vtanh.f32 %v3104_v56 }
 0xb2c   :  { %3195 = vmatmul.f32.vlgmr.msra.gmra.mxu0 %v3367_v36  ;;  %3235 = vmatmul.f32.vlgmr.msra.gmra.mxu2 %v3367_v36 }
 0xb31   :  { %v3369_v38 = vpop.eup %3368 }
 0xb32   :  { %3215 = vmatmul.f32.vlgmr.msra.gmra.mxu1 %v3369_v38  ;;  %3255 = vmatmul.f32.vlgmr.msra.gmra.mxu3 %v3369_v38 }
 0xba9   :  { %v3196_v40 = vpop.f32.mrf.mxu0 }
 0xbaa   :  { %v3197_v42 = vadd.f32 %v3196_v40, %v3177_v39 }
 0xbaf   :  { %v3216_v45 = vpop.f32.mrf.mxu1  ;;  %v3236_v3 = vpop.f32.mrf.mxu2 }
 0xbb0   :  { %v3217_v47 = vadd.f32 %v3216_v45, %v3197_v42  ;;  %v3237_v54 = vadd.f32 %v3236_v3, %v3178_v2 }
 0xbb2   :  { %3370 = vtanh.f32 %v3217_v47 }
 0xbb5   :  { %v3256_v63 = vpop.f32.mrf.mxu3 }
 0xbb6   :  { %v3257_v24 = vadd.f32 %v3256_v63, %v3237_v54 }
 0xbb8   :  { %v3371_v27 = vpop.eup %3370  ;;  %3372 = vtanh.f32 %v3257_v24 }
 0xbb9   :  { %3261 = vst [vmem:[#allocation7] sm:$0xff] %v3371_v27 }
 0xbbe   :  { %v3373_v58 = vpop.eup %3372 }
 0xbbf   :  { %3262 = vst [vmem:[#allocation7 + $0x8] sm:$0xff] %v3373_v58 }
 0xbc0   :  { %3273 = dma.vmem_to_hbm [thread:$0]  %s3269_s1, 256, %s3271_s23, [#allocation4]  }
 0xbc1   :  { %3450 = dma.done.wait [#allocation4], 256  }
 0xbc2   :  { %3451 = vsyncadd [#allocation4], 4294967040 }
 0xbc3   :  { %3278 = vsyncpa [#allocation3], 1 }
 0xbc4   :  { %3279 = vsyncpa [#allocation6], 1 }
 0xbc5   :  { %3280 = vsyncpa [#allocation4], 1 }

</bundles_post_ra>
